<compile_context>
chip_gen: v5e
topology: v5e:2x2
jax: 0.10.0
libtpu: 0.0.40
codegen_flags: <defaults>
</compile_context>

<pallas_src>
import numpy as np
import jax
import jax.numpy as jnp
from jax.experimental import pallas as pl
from jax.experimental.pallas import tpu as pltpu


def _round_up(x, m):
    return ((x + m - 1) // m) * m


def _vmem_capacity_bytes():
    """Per-core VMEM capacity; falls back to the smallest current part (v7x, 64 MiB)."""
    try:
        return int(pltpu.get_tpu_info().vmem_capacity_bytes)
    except Exception:
        return 64 * 1024 * 1024


# ----------------------------------------------------------------------------
# Pallas kernel: pointwise MLP (bias1 folded) + fused max-pool over nsample
# ----------------------------------------------------------------------------
def _sa_mlp_maxpool_kernel(x_ref, w1_ref, w2_ref, b2_ref, o_ref):
    # x_ref : (nsample, cin_pad, TP) bf16  grouped points, ones-row at channel `cin`
    # w1_ref: (H1, cin_pad)          bf16  layer-1 bias folded into the ones column
    # w2_ref: (Cout, H1)             bf16
    # b2_ref: (Cout, 1)              f32
    # o_ref : (Cout, TP)             f32   lane axis = point tile -> lane-dense store
    nsample = x_ref.shape[0]
    w1 = w1_ref[...]
    w2 = w2_ref[...]
    acc = None
    # nsample is small and static -> unrolled loop; each iteration is two
    # lane-dense MXU matmuls plus one VPU max (no big f32 intermediates live).
    for s in range(nsample):
        x_s = x_ref[s]                                                 # (cin_pad, TP)
        h1 = jnp.dot(w1, x_s, preferred_element_type=jnp.float32)      # (H1, TP)
        h1 = jnp.maximum(h1, 0.0).astype(jnp.bfloat16)
        h2 = jnp.dot(w2, h1, preferred_element_type=jnp.float32)       # (Cout, TP)
        acc = h2 if acc is None else jnp.maximum(acc, h2)
    # bias + ReLU hoisted past the max-pool (exact).
    o_ref[...] = jnp.maximum(acc + b2_ref[...], 0.0)


def _choose_point_tile(npoint, nsample, cin_pad, h1, cout, budget_bytes):
    """Largest point-tile TP dividing npoint, preferring MXU-friendly lane widths
    (256 on v6e/v7x, then 128), with a padding-aware per-tile VMEM estimate.
    TP is always a multiple of 128 or the full npoint (lane-dense blocks)."""
    def tile_bytes(tp):
        # streamed input (bf16); cin_pad sublanes pack in 16s for bf16. x2 buffers.
        x_tile = nsample * _round_up(cin_pad, 16) * tp * 2 * 2
        # resident weights / bias (lane-padded to 128), default-double-buffered.
        w = (h1 * _round_up(cin_pad, 128) + cout * _round_up(h1, 128)) * 2 * 2 \
            + _round_up(cout, 8) * 128 * 4 * 2
        out = _round_up(cout, 8) * tp * 4 * 2                          # f32 out, x2
        inter = (2 * h1 + 3 * cout) * tp * 4                           # live per-sample f32
        return x_tile + w + out + inter

    divisors = [d for d in range(1, npoint + 1) if npoint % d == 0]
    for align in (256, 128, 8, 1):
        cands = [d for d in divisors
                 if d % align == 0 and (d % 128 == 0 or d == npoint)
                 and tile_bytes(d) <= budget_bytes]
        if cands:
            return max(cands)
    return npoint   # nothing fits the budget; take the full axis


def sa_mlp_maxpool(grouped, w1t, w2t, b2, *, npoint, nsample):
    """grouped: (B, nsample, cin_pad, npoint) bf16 -> (B, Cout, npoint) f32."""
    B, ns, cin_pad, P = grouped.shape
    assert ns == nsample and P == npoint
    h1dim = w1t.shape[0]
    cout = w2t.shape[0]

    cap = _vmem_capacity_bytes()
    budget = (cap * 3) // 8                       # ~24 MiB on v7x, ~48 MiB on v5e/v6e
    tp = _choose_point_tile(npoint, nsample, cin_pad, h1dim, cout, budget)
    vmem_limit = int(min(cap - 8 * 2**20, max(32 * 2**20, budget + 16 * 2**20)))

    flops = 2 * B * npoint * nsample * (cin_pad * h1dim + h1dim * cout)
    bytes_accessed = int(grouped.size * grouped.dtype.itemsize
                         + w1t.size * 2 + w2t.size * 2 + b2.size * 4
                         + B * cout * npoint * 4)

    return pl.pallas_call(
        _sa_mlp_maxpool_kernel,
        out_shape=jax.ShapeDtypeStruct((B, cout, npoint), jnp.float32),
        grid=(B, npoint // tp),
        in_specs=[
            pl.BlockSpec((None, nsample, cin_pad, tp), lambda b, p: (b, 0, 0, p)),
            pl.BlockSpec((h1dim, cin_pad), lambda b, p: (0, 0)),   # resident weights
            pl.BlockSpec((cout, h1dim), lambda b, p: (0, 0)),
            pl.BlockSpec((cout, 1), lambda b, p: (0, 0)),
        ],
        out_specs=pl.BlockSpec((None, cout, tp), lambda b, p: (b, 0, p)),
        compiler_params=pltpu.CompilerParams(
            dimension_semantics=("parallel", "parallel"),
            vmem_limit_bytes=vmem_limit),
        cost_estimate=pl.CostEstimate(flops=int(flops), transcendentals=0,
                                      bytes_accessed=bytes_accessed),
    )(grouped, w1t, w2t, b2)


# ----------------------------------------------------------------------------
# Plain-JAX glue: FPS, ball-query, grouping (data-dependent gathers)
# ----------------------------------------------------------------------------
def furthest_point_sample(xyz, npoint):
    """xyz: (B, N, 3) -> (B, npoint) int32 indices (matches CUDA FPS: start at 0)."""
    B, N, _ = xyz.shape

    def body(i, state):
        idxs, dists, farthest = state
        idxs = idxs.at[:, i].set(farthest)
        centroid = jnp.take_along_axis(xyz, farthest[:, None, None], axis=1)  # (B,1,3)
        d = jnp.sum((xyz - centroid) ** 2, axis=-1)                           # (B,N)
        dists = jnp.minimum(dists, d)
        farthest = jnp.argmax(dists, axis=-1).astype(jnp.int32)
        return idxs, dists, farthest

    init = (jnp.zeros((B, npoint), jnp.int32),
            jnp.full((B, N), 1e10, jnp.float32),
            jnp.zeros((B,), jnp.int32))
    idxs, _, _ = jax.lax.fori_loop(0, npoint, body, init)
    return idxs


def ball_query(radius, nsample, xyz, new_xyz):
    """(B, S, nsample) int32: first `nsample` points (in index order) within `radius`.
    NOTE: empty-ball slots fall back to index 0, which coincides with the CUDA
    kernel's zero-initialized slots — documented behavior, not an accident."""
    B, N, _ = xyz.shape
    d2 = jnp.sum((new_xyz[:, :, None, :] - xyz[:, None, :, :]) ** 2, axis=-1)  # (B,S,N)
    in_ball = d2 < radius * radius
    key = jnp.where(in_ball, jnp.arange(N, dtype=jnp.int32), jnp.int32(N))
    neg_top, _ = jax.lax.top_k(-key, nsample)          # nsample smallest keys
    idx = -neg_top                                     # ascending index order
    first = jnp.where(idx[..., :1] >= N, 0, idx[..., :1])
    return jnp.where(idx >= N, first, idx).astype(jnp.int32)


def query_and_group(radius, nsample, xyz, new_xyz, features, cin_pad):
    """-> (B, nsample, cin_pad, npoint) bf16 grouped features (use_xyz=True),
    sample-major / channel-sublane / point-lane layout for the kernel; a
    ones-column sits at channel index 3+C (layer-1 bias trick), zeros pad to cin_pad."""
    B, N, _ = xyz.shape
    S = new_xyz.shape[1]
    idx = ball_query(radius, nsample, xyz, new_xyz)              # (B, S, ns)
    bidx = jnp.arange(B)[:, None, None]
    grouped_xyz = xyz[bidx, idx] - new_xyz[:, :, None, :]        # (B, S, ns, 3)
    feats_nlc = jnp.transpose(features, (0, 2, 1))               # (B, N, C)
    grouped_feat = feats_nlc[bidx, idx]                          # (B, S, ns, C)
    ones = jnp.ones((B, S, nsample, 1), jnp.float32)
    g = jnp.concatenate([grouped_xyz, grouped_feat, ones], axis=-1)
    pad = cin_pad - g.shape[-1]
    if pad > 0:
        g = jnp.pad(g, ((0, 0), (0, 0), (0, 0), (0, pad)))
    g = jnp.transpose(g, (0, 2, 3, 1))                           # (B, ns, cin_pad, S)
    return g.astype(jnp.bfloat16)


def fold_bn_into_conv(W, gamma, beta, mean, var, eps=1e-5):
    """Fold eval-mode BatchNorm into a 1x1 conv: W (Cout,Cin) -> (Wf, bf)."""
    scale = gamma / jnp.sqrt(var + eps)
    return W * scale[:, None], beta - mean * scale


# ----------------------------------------------------------------------------
# The module
# ----------------------------------------------------------------------------
class PointnetSAModule:
    def __init__(self, key, *, npoint, radii, nsamples, mlps, in_channels):
        assert len(radii) == len(nsamples) == len(mlps)
        self.npoint = npoint
        self.radii = list(radii)
        self.nsamples = list(nsamples)
        self.cin = in_channels + 3                      # use_xyz=True
        self.cin_pad = _round_up(self.cin + 1, 8)       # +1 for the bias-1 column
        self.params = []
        for spec in mlps:
            h1, cout = spec
            key, k1, k2, k3, k4, k5, k6 = jax.random.split(key, 7)
            W1 = 0.1 * jax.random.normal(k1, (h1, self.cin), jnp.float32)
            W2 = 0.1 * jax.random.normal(k2, (cout, h1), jnp.float32)
            g1 = 1.0 + 0.05 * jax.random.normal(k3, (h1,), jnp.float32)
            b1 = 0.05 * jax.random.normal(k4, (h1,), jnp.float32)
            g2 = 1.0 + 0.05 * jax.random.normal(k5, (cout,), jnp.float32)
            b2 = 0.05 * jax.random.normal(k6, (cout,), jnp.float32)
            W1f, b1f = fold_bn_into_conv(W1, g1, b1, jnp.zeros((h1,)), jnp.ones((h1,)))
            W2f, b2f = fold_bn_into_conv(W2, g2, b2, jnp.zeros((cout,)), jnp.ones((cout,)))
            # layer-1 weight in (H1, cin_pad) matmul layout; bias1 folded into the
            # ones-column; bf16 weights feed the MXU natively.
            w1t = jnp.zeros((h1, self.cin_pad), jnp.float32)
            w1t = w1t.at[:, : self.cin].set(W1f).at[:, self.cin].set(b1f)
            self.params.append((w1t.astype(jnp.bfloat16),
                                W2f.astype(jnp.bfloat16),            # (Cout, H1)
                                b2f[:, None].astype(jnp.float32)))   # (Cout, 1)

    def __call__(self, xyz, features):
        B = xyz.shape[0]
        fps_idx = furthest_point_sample(xyz, self.npoint)              # (B, npoint)
        new_xyz = xyz[jnp.arange(B)[:, None], fps_idx]                 # (B, npoint, 3)
        outs = []
        for radius, nsample, (w1t, w2t, b2) in zip(self.radii, self.nsamples, self.params):
            g = query_and_group(radius, nsample, xyz, new_xyz, features, self.cin_pad)
            outs.append(sa_mlp_maxpool(g, w1t, w2t, b2,
                                       npoint=self.npoint, nsample=nsample))
        return new_xyz, jnp.concatenate(outs, axis=1)                  # (B, sum Cout, npoint)

    # pure-JAX reference of the Pallas hot path (same bf16/f32 recipe), for verification.
    # NOTE: inputs/weights are bf16-rounded vs. the PyTorch f32 path; the reference uses
    # the same recipe so the tolerance checks kernel-vs-reference, not bf16-vs-f32 drift.
    def reference(self, xyz, features):
        B = xyz.shape[0]
        fps_idx = furthest_point_sample(xyz, self.npoint)
        new_xyz = xyz[jnp.arange(B)[:, None], fps_idx]
        outs = []
        for radius, nsample, (w1t, w2t, b2) in zip(self.radii, self.nsamples, self.params):
            g = query_and_group(radius, nsample, xyz, new_xyz, features, self.cin_pad)
            h1 = jnp.einsum('hc,bscp->bshp', w1t, g, preferred_element_type=jnp.float32)
            h1 = jnp.maximum(h1, 0.0).astype(jnp.bfloat16)
            h2 = jnp.einsum('oh,bshp->bsop', w2t, h1, preferred_element_type=jnp.float32)
            pooled = jnp.max(h2, axis=1)                               # (B, Cout, P)
            outs.append(jnp.maximum(pooled + b2[None], 0.0))
        return new_xyz, jnp.concatenate(outs, axis=1)


if __name__ == "__main__":
    key = jax.random.PRNGKey(0)
    k_xyz, k_feat, k_par = jax.random.split(key, 3)

    B, N, C = 2, 512, 4
    npoint = 256
    xyz = jax.random.uniform(k_xyz, (B, N, 3), jnp.float32)        # (B, N, 3)
    features = jax.random.normal(k_feat, (B, C, N), jnp.float32)   # (B, C, N)

    module = PointnetSAModule(
        k_par,
        npoint=npoint,
        radii=[0.4, 0.8],
        nsamples=[16, 8],
        mlps=[[32, 64], [32, 32]],     # each grouper: (3+C) -> 32 -> last
        in_channels=C,
    )

    forward = jax.jit(lambda p, f: module(p, f))
    new_xyz, new_features = jax.block_until_ready(forward(xyz, features))

    assert new_xyz.shape == (B, npoint, 3)
    assert new_features.shape == (B, 64 + 32, npoint)

    ref_xyz, ref_features = module.reference(xyz, features)
    np.testing.assert_allclose(np.asarray(new_xyz), np.asarray(ref_xyz),
                               rtol=1e-5, atol=1e-5)
    np.testing.assert_allclose(np.asarray(new_features), np.asarray(ref_features),
                               rtol=1e-2, atol=1e-2)

    print("KERNEL_OK")
</pallas_src>

<mosaic_0001>
module attributes {stable_mosaic.version = 11 : i64} {
  func.func @_sa_mlp_maxpool_kernel(%arg0: i32, %arg1: i32, %arg2: memref<1x8x8x256xbf16, #tpu.memory_space<vmem>>, %arg3: memref<32x8xbf16, #tpu.memory_space<vmem>>, %arg4: memref<32x32xbf16, #tpu.memory_space<vmem>>, %arg5: memref<32x1xf32, #tpu.memory_space<vmem>>, %arg6: memref<1x32x256xf32, #tpu.memory_space<vmem>>) attributes {dimension_semantics = [#tpu.dimension_semantics<parallel>, #tpu.dimension_semantics<parallel>], iteration_bounds = array<i64: 2, 1>, scalar_prefetch = 0 : i64, scratch_operands = 0 : i64, tpu.core_type = #tpu.core_type<tc>, window_params = [{transform_indices = @transform_0, window_bounds = array<i64: 1, 8, 8, 256>}, {pipeline_mode = #tpu.pipeline_mode<synchronous>, transform_indices = @transform_1, window_bounds = array<i64: 32, 8>}, {pipeline_mode = #tpu.pipeline_mode<synchronous>, transform_indices = @transform_2, window_bounds = array<i64: 32, 32>}, {pipeline_mode = #tpu.pipeline_mode<synchronous>, transform_indices = @transform_3, window_bounds = array<i64: 32, 1>}, {transform_indices = @transform_4, window_bounds = array<i64: 1, 32, 256>}]} {
    %c0 = arith.constant 0 : index
    %c0_0 = arith.constant 0 : index
    %0 = vector.load %arg3[%c0, %c0_0] : memref<32x8xbf16, #tpu.memory_space<vmem>>, vector<32x8xbf16>
    %c0_1 = arith.constant 0 : index
    %c0_2 = arith.constant 0 : index
    %1 = vector.load %arg4[%c0_1, %c0_2] : memref<32x32xbf16, #tpu.memory_space<vmem>>, vector<32x32xbf16>
    %c0_3 = arith.constant 0 : index
    %c0_4 = arith.constant 0 : index
    %c0_5 = arith.constant 0 : index
    %c0_6 = arith.constant 0 : index
    %2 = vector.load %arg2[%c0_3, %c0_4, %c0_5, %c0_6] : memref<1x8x8x256xbf16, #tpu.memory_space<vmem>>, vector<1x1x8x256xbf16>
    %3 = vector.shape_cast %2 : vector<1x1x8x256xbf16> to vector<8x256xbf16>
    %cst = arith.constant dense<0.000000e+00> : vector<32x256xf32>
    %4 = tpu.matmul %0, %3, %cst {dimension_numbers = #tpu.dot_dimension_numbers<[1], [0], [0], [1], [0, 0, 1, 1], [], []>} : vector<32x8xbf16>, vector<8x256xbf16>, vector<32x256xf32> -> vector<32x256xf32>
    %cst_7 = arith.constant 0.000000e+00 : f32
    %5 = vector.broadcast %cst_7 : f32 to vector<32x256xf32>
    %6 = arith.maximumf %4, %5 : vector<32x256xf32>
    %7 = arith.truncf %6 : vector<32x256xf32> to vector<32x256xbf16>
    %cst_8 = arith.constant dense<0.000000e+00> : vector<32x256xf32>
    %8 = tpu.matmul %1, %7, %cst_8 {dimension_numbers = #tpu.dot_dimension_numbers<[1], [0], [0], [1], [0, 0, 1, 1], [], []>} : vector<32x32xbf16>, vector<32x256xbf16>, vector<32x256xf32> -> vector<32x256xf32>
    %c0_9 = arith.constant 0 : index
    %c1 = arith.constant 1 : index
    %c0_10 = arith.constant 0 : index
    %c0_11 = arith.constant 0 : index
    %9 = vector.load %arg2[%c0_9, %c1, %c0_10, %c0_11] : memref<1x8x8x256xbf16, #tpu.memory_space<vmem>>, vector<1x1x8x256xbf16>
    %10 = vector.shape_cast %9 : vector<1x1x8x256xbf16> to vector<8x256xbf16>
    %cst_12 = arith.constant dense<0.000000e+00> : vector<32x256xf32>
    %11 = tpu.matmul %0, %10, %cst_12 {dimension_numbers = #tpu.dot_dimension_numbers<[1], [0], [0], [1], [0, 0, 1, 1], [], []>} : vector<32x8xbf16>, vector<8x256xbf16>, vector<32x256xf32> -> vector<32x256xf32>
    %cst_13 = arith.constant 0.000000e+00 : f32
    %12 = vector.broadcast %cst_13 : f32 to vector<32x256xf32>
    %13 = arith.maximumf %11, %12 : vector<32x256xf32>
    %14 = arith.truncf %13 : vector<32x256xf32> to vector<32x256xbf16>
    %cst_14 = arith.constant dense<0.000000e+00> : vector<32x256xf32>
    %15 = tpu.matmul %1, %14, %cst_14 {dimension_numbers = #tpu.dot_dimension_numbers<[1], [0], [0], [1], [0, 0, 1, 1], [], []>} : vector<32x32xbf16>, vector<32x256xbf16>, vector<32x256xf32> -> vector<32x256xf32>
    %16 = arith.maximumf %8, %15 : vector<32x256xf32>
    %c0_15 = arith.constant 0 : index
    %c2 = arith.constant 2 : index
    %c0_16 = arith.constant 0 : index
    %c0_17 = arith.constant 0 : index
    %17 = vector.load %arg2[%c0_15, %c2, %c0_16, %c0_17] : memref<1x8x8x256xbf16, #tpu.memory_space<vmem>>, vector<1x1x8x256xbf16>
    %18 = vector.shape_cast %17 : vector<1x1x8x256xbf16> to vector<8x256xbf16>
    %cst_18 = arith.constant dense<0.000000e+00> : vector<32x256xf32>
    %19 = tpu.matmul %0, %18, %cst_18 {dimension_numbers = #tpu.dot_dimension_numbers<[1], [0], [0], [1], [0, 0, 1, 1], [], []>} : vector<32x8xbf16>, vector<8x256xbf16>, vector<32x256xf32> -> vector<32x256xf32>
    %cst_19 = arith.constant 0.000000e+00 : f32
    %20 = vector.broadcast %cst_19 : f32 to vector<32x256xf32>
    %21 = arith.maximumf %19, %20 : vector<32x256xf32>
    %22 = arith.truncf %21 : vector<32x256xf32> to vector<32x256xbf16>
    %cst_20 = arith.constant dense<0.000000e+00> : vector<32x256xf32>
    %23 = tpu.matmul %1, %22, %cst_20 {dimension_numbers = #tpu.dot_dimension_numbers<[1], [0], [0], [1], [0, 0, 1, 1], [], []>} : vector<32x32xbf16>, vector<32x256xbf16>, vector<32x256xf32> -> vector<32x256xf32>
    %24 = arith.maximumf %16, %23 : vector<32x256xf32>
    %c0_21 = arith.constant 0 : index
    %c3 = arith.constant 3 : index
    %c0_22 = arith.constant 0 : index
    %c0_23 = arith.constant 0 : index
    %25 = vector.load %arg2[%c0_21, %c3, %c0_22, %c0_23] : memref<1x8x8x256xbf16, #tpu.memory_space<vmem>>, vector<1x1x8x256xbf16>
    %26 = vector.shape_cast %25 : vector<1x1x8x256xbf16> to vector<8x256xbf16>
    %cst_24 = arith.constant dense<0.000000e+00> : vector<32x256xf32>
    %27 = tpu.matmul %0, %26, %cst_24 {dimension_numbers = #tpu.dot_dimension_numbers<[1], [0], [0], [1], [0, 0, 1, 1], [], []>} : vector<32x8xbf16>, vector<8x256xbf16>, vector<32x256xf32> -> vector<32x256xf32>
    %cst_25 = arith.constant 0.000000e+00 : f32
    %28 = vector.broadcast %cst_25 : f32 to vector<32x256xf32>
    %29 = arith.maximumf %27, %28 : vector<32x256xf32>
    %30 = arith.truncf %29 : vector<32x256xf32> to vector<32x256xbf16>
    %cst_26 = arith.constant dense<0.000000e+00> : vector<32x256xf32>
    %31 = tpu.matmul %1, %30, %cst_26 {dimension_numbers = #tpu.dot_dimension_numbers<[1], [0], [0], [1], [0, 0, 1, 1], [], []>} : vector<32x32xbf16>, vector<32x256xbf16>, vector<32x256xf32> -> vector<32x256xf32>
    %32 = arith.maximumf %24, %31 : vector<32x256xf32>
    %c0_27 = arith.constant 0 : index
    %c4 = arith.constant 4 : index
    %c0_28 = arith.constant 0 : index
    %c0_29 = arith.constant 0 : index
    %33 = vector.load %arg2[%c0_27, %c4, %c0_28, %c0_29] : memref<1x8x8x256xbf16, #tpu.memory_space<vmem>>, vector<1x1x8x256xbf16>
    %34 = vector.shape_cast %33 : vector<1x1x8x256xbf16> to vector<8x256xbf16>
    %cst_30 = arith.constant dense<0.000000e+00> : vector<32x256xf32>
    %35 = tpu.matmul %0, %34, %cst_30 {dimension_numbers = #tpu.dot_dimension_numbers<[1], [0], [0], [1], [0, 0, 1, 1], [], []>} : vector<32x8xbf16>, vector<8x256xbf16>, vector<32x256xf32> -> vector<32x256xf32>
    %cst_31 = arith.constant 0.000000e+00 : f32
    %36 = vector.broadcast %cst_31 : f32 to vector<32x256xf32>
    %37 = arith.maximumf %35, %36 : vector<32x256xf32>
    %38 = arith.truncf %37 : vector<32x256xf32> to vector<32x256xbf16>
    %cst_32 = arith.constant dense<0.000000e+00> : vector<32x256xf32>
    %39 = tpu.matmul %1, %38, %cst_32 {dimension_numbers = #tpu.dot_dimension_numbers<[1], [0], [0], [1], [0, 0, 1, 1], [], []>} : vector<32x32xbf16>, vector<32x256xbf16>, vector<32x256xf32> -> vector<32x256xf32>
    %40 = arith.maximumf %32, %39 : vector<32x256xf32>
    %c0_33 = arith.constant 0 : index
    %c5 = arith.constant 5 : index
    %c0_34 = arith.constant 0 : index
    %c0_35 = arith.constant 0 : index
    %41 = vector.load %arg2[%c0_33, %c5, %c0_34, %c0_35] : memref<1x8x8x256xbf16, #tpu.memory_space<vmem>>, vector<1x1x8x256xbf16>
    %42 = vector.shape_cast %41 : vector<1x1x8x256xbf16> to vector<8x256xbf16>
    %cst_36 = arith.constant dense<0.000000e+00> : vector<32x256xf32>
    %43 = tpu.matmul %0, %42, %cst_36 {dimension_numbers = #tpu.dot_dimension_numbers<[1], [0], [0], [1], [0, 0, 1, 1], [], []>} : vector<32x8xbf16>, vector<8x256xbf16>, vector<32x256xf32> -> vector<32x256xf32>
    %cst_37 = arith.constant 0.000000e+00 : f32
    %44 = vector.broadcast %cst_37 : f32 to vector<32x256xf32>
    %45 = arith.maximumf %43, %44 : vector<32x256xf32>
    %46 = arith.truncf %45 : vector<32x256xf32> to vector<32x256xbf16>
    %cst_38 = arith.constant dense<0.000000e+00> : vector<32x256xf32>
    %47 = tpu.matmul %1, %46, %cst_38 {dimension_numbers = #tpu.dot_dimension_numbers<[1], [0], [0], [1], [0, 0, 1, 1], [], []>} : vector<32x32xbf16>, vector<32x256xbf16>, vector<32x256xf32> -> vector<32x256xf32>
    %48 = arith.maximumf %40, %47 : vector<32x256xf32>
    %c0_39 = arith.constant 0 : index
    %c6 = arith.constant 6 : index
    %c0_40 = arith.constant 0 : index
    %c0_41 = arith.constant 0 : index
    %49 = vector.load %arg2[%c0_39, %c6, %c0_40, %c0_41] : memref<1x8x8x256xbf16, #tpu.memory_space<vmem>>, vector<1x1x8x256xbf16>
    %50 = vector.shape_cast %49 : vector<1x1x8x256xbf16> to vector<8x256xbf16>
    %cst_42 = arith.constant dense<0.000000e+00> : vector<32x256xf32>
    %51 = tpu.matmul %0, %50, %cst_42 {dimension_numbers = #tpu.dot_dimension_numbers<[1], [0], [0], [1], [0, 0, 1, 1], [], []>} : vector<32x8xbf16>, vector<8x256xbf16>, vector<32x256xf32> -> vector<32x256xf32>
    %cst_43 = arith.constant 0.000000e+00 : f32
    %52 = vector.broadcast %cst_43 : f32 to vector<32x256xf32>
    %53 = arith.maximumf %51, %52 : vector<32x256xf32>
    %54 = arith.truncf %53 : vector<32x256xf32> to vector<32x256xbf16>
    %cst_44 = arith.constant dense<0.000000e+00> : vector<32x256xf32>
    %55 = tpu.matmul %1, %54, %cst_44 {dimension_numbers = #tpu.dot_dimension_numbers<[1], [0], [0], [1], [0, 0, 1, 1], [], []>} : vector<32x32xbf16>, vector<32x256xbf16>, vector<32x256xf32> -> vector<32x256xf32>
    %56 = arith.maximumf %48, %55 : vector<32x256xf32>
    %c0_45 = arith.constant 0 : index
    %c7 = arith.constant 7 : index
    %c0_46 = arith.constant 0 : index
    %c0_47 = arith.constant 0 : index
    %57 = vector.load %arg2[%c0_45, %c7, %c0_46, %c0_47] : memref<1x8x8x256xbf16, #tpu.memory_space<vmem>>, vector<1x1x8x256xbf16>
    %58 = vector.shape_cast %57 : vector<1x1x8x256xbf16> to vector<8x256xbf16>
    %cst_48 = arith.constant dense<0.000000e+00> : vector<32x256xf32>
    %59 = tpu.matmul %0, %58, %cst_48 {dimension_numbers = #tpu.dot_dimension_numbers<[1], [0], [0], [1], [0, 0, 1, 1], [], []>} : vector<32x8xbf16>, vector<8x256xbf16>, vector<32x256xf32> -> vector<32x256xf32>
    %cst_49 = arith.constant 0.000000e+00 : f32
    %60 = vector.broadcast %cst_49 : f32 to vector<32x256xf32>
    %61 = arith.maximumf %59, %60 : vector<32x256xf32>
    %62 = arith.truncf %61 : vector<32x256xf32> to vector<32x256xbf16>
    %cst_50 = arith.constant dense<0.000000e+00> : vector<32x256xf32>
    %63 = tpu.matmul %1, %62, %cst_50 {dimension_numbers = #tpu.dot_dimension_numbers<[1], [0], [0], [1], [0, 0, 1, 1], [], []>} : vector<32x32xbf16>, vector<32x256xbf16>, vector<32x256xf32> -> vector<32x256xf32>
    %64 = arith.maximumf %56, %63 : vector<32x256xf32>
    %c0_51 = arith.constant 0 : index
    %c0_52 = arith.constant 0 : index
    %65 = vector.load %arg5[%c0_51, %c0_52] : memref<32x1xf32, #tpu.memory_space<vmem>>, vector<32x1xf32>
    %66 = vector.broadcast %65 : vector<32x1xf32> to vector<32x256xf32>
    %67 = arith.addf %64, %66 : vector<32x256xf32>
    %cst_53 = arith.constant 0.000000e+00 : f32
    %68 = vector.broadcast %cst_53 : f32 to vector<32x256xf32>
    %69 = arith.maximumf %67, %68 : vector<32x256xf32>
    %c0_54 = arith.constant 0 : index
    %c0_55 = arith.constant 0 : index
    %c0_56 = arith.constant 0 : index
    %70 = vector.load %arg6[%c0_54, %c0_55, %c0_56] : memref<1x32x256xf32, #tpu.memory_space<vmem>>, vector<1x32x256xf32>
    %71 = vector.shape_cast %70 : vector<1x32x256xf32> to vector<32x256xf32>
    %72 = vector.shape_cast %69 : vector<32x256xf32> to vector<1x32x256xf32>
    tpu.vector_store %arg6[%c0_54, %c0_55, %c0_56], %72 {strides = array<i32>} : memref<1x32x256xf32, #tpu.memory_space<vmem>>, vector<1x32x256xf32>,
    return
  }
  func.func @transform_0(%arg0: i32, %arg1: i32) -> (i32, i32, i32, i32) {
    %c0_i32 = arith.constant 0 : i32
    %c0_i32_0 = arith.constant 0 : i32
    %c0_i32_1 = arith.constant 0 : i32
    return %arg0, %c0_i32, %c0_i32_0, %arg1 : i32, i32, i32, i32
  }
  func.func @transform_1(%arg0: i32, %arg1: i32) -> (i32, i32) {
    %c0_i32 = arith.constant 0 : i32
    %c0_i32_0 = arith.constant 0 : i32
    %c0_i32_1 = arith.constant 0 : i32
    return %c0_i32, %c0_i32_0 : i32, i32
  }
  func.func @transform_2(%arg0: i32, %arg1: i32) -> (i32, i32) {
    %c0_i32 = arith.constant 0 : i32
    %c0_i32_0 = arith.constant 0 : i32
    %c0_i32_1 = arith.constant 0 : i32
    return %c0_i32, %c0_i32_0 : i32, i32
  }
  func.func @transform_3(%arg0: i32, %arg1: i32) -> (i32, i32) {
    %c0_i32 = arith.constant 0 : i32
    %c0_i32_0 = arith.constant 0 : i32
    %c0_i32_1 = arith.constant 0 : i32
    return %c0_i32, %c0_i32_0 : i32, i32
  }
  func.func @transform_4(%arg0: i32, %arg1: i32) -> (i32, i32, i32) {
    %c0_i32 = arith.constant 0 : i32
    %c0_i32_0 = arith.constant 0 : i32
    return %arg0, %c0_i32, %arg1 : i32, i32, i32
  }
}

module attributes {stable_mosaic.version = 11 : i64} {
  func.func @_sa_mlp_maxpool_kernel(%arg0: i32, %arg1: i32, %arg2: memref<1x16x8x256xbf16, #tpu.memory_space<vmem>>, %arg3: memref<32x8xbf16, #tpu.memory_space<vmem>>, %arg4: memref<64x32xbf16, #tpu.memory_space<vmem>>, %arg5: memref<64x1xf32, #tpu.memory_space<vmem>>, %arg6: memref<1x64x256xf32, #tpu.memory_space<vmem>>) attributes {dimension_semantics = [#tpu.dimension_semantics<parallel>, #tpu.dimension_semantics<parallel>], iteration_bounds = array<i64: 2, 1>, scalar_prefetch = 0 : i64, scratch_operands = 0 : i64, tpu.core_type = #tpu.core_type<tc>, window_params = [{transform_indices = @transform_0, window_bounds = array<i64: 1, 16, 8, 256>}, {pipeline_mode = #tpu.pipeline_mode<synchronous>, transform_indices = @transform_1, window_bounds = array<i64: 32, 8>}, {pipeline_mode = #tpu.pipeline_mode<synchronous>, transform_indices = @transform_2, window_bounds = array<i64: 64, 32>}, {pipeline_mode = #tpu.pipeline_mode<synchronous>, transform_indices = @transform_3, window_bounds = array<i64: 64, 1>}, {transform_indices = @transform_4, window_bounds = array<i64: 1, 64, 256>}]} {
    %c0 = arith.constant 0 : index
    %c0_0 = arith.constant 0 : index
    %0 = vector.load %arg3[%c0, %c0_0] : memref<32x8xbf16, #tpu.memory_space<vmem>>, vector<32x8xbf16>
    %c0_1 = arith.constant 0 : index
    %c0_2 = arith.constant 0 : index
    %1 = vector.load %arg4[%c0_1, %c0_2] : memref<64x32xbf16, #tpu.memory_space<vmem>>, vector<64x32xbf16>
    %c0_3 = arith.constant 0 : index
    %c0_4 = arith.constant 0 : index
    %c0_5 = arith.constant 0 : index
    %c0_6 = arith.constant 0 : index
    %2 = vector.load %arg2[%c0_3, %c0_4, %c0_5, %c0_6] : memref<1x16x8x256xbf16, #tpu.memory_space<vmem>>, vector<1x1x8x256xbf16>
    %3 = vector.shape_cast %2 : vector<1x1x8x256xbf16> to vector<8x256xbf16>
    %cst = arith.constant dense<0.000000e+00> : vector<32x256xf32>
    %4 = tpu.matmul %0, %3, %cst {dimension_numbers = #tpu.dot_dimension_numbers<[1], [0], [0], [1], [0, 0, 1, 1], [], []>} : vector<32x8xbf16>, vector<8x256xbf16>, vector<32x256xf32> -> vector<32x256xf32>
    %cst_7 = arith.constant 0.000000e+00 : f32
    %5 = vector.broadcast %cst_7 : f32 to vector<32x256xf32>
    %6 = arith.maximumf %4, %5 : vector<32x256xf32>
    %7 = arith.truncf %6 : vector<32x256xf32> to vector<32x256xbf16>
    %cst_8 = arith.constant dense<0.000000e+00> : vector<64x256xf32>
    %8 = tpu.matmul %1, %7, %cst_8 {dimension_numbers = #tpu.dot_dimension_numbers<[1], [0], [0], [1], [0, 0, 1, 1], [], []>} : vector<64x32xbf16>, vector<32x256xbf16>, vector<64x256xf32> -> vector<64x256xf32>
    %c0_9 = arith.constant 0 : index
    %c1 = arith.constant 1 : index
    %c0_10 = arith.constant 0 : index
    %c0_11 = arith.constant 0 : index
    %9 = vector.load %arg2[%c0_9, %c1, %c0_10, %c0_11] : memref<1x16x8x256xbf16, #tpu.memory_space<vmem>>, vector<1x1x8x256xbf16>
    %10 = vector.shape_cast %9 : vector<1x1x8x256xbf16> to vector<8x256xbf16>
    %cst_12 = arith.constant dense<0.000000e+00> : vector<32x256xf32>
    %11 = tpu.matmul %0, %10, %cst_12 {dimension_numbers = #tpu.dot_dimension_numbers<[1], [0], [0], [1], [0, 0, 1, 1], [], []>} : vector<32x8xbf16>, vector<8x256xbf16>, vector<32x256xf32> -> vector<32x256xf32>
    %cst_13 = arith.constant 0.000000e+00 : f32
    %12 = vector.broadcast %cst_13 : f32 to vector<32x256xf32>
    %13 = arith.maximumf %11, %12 : vector<32x256xf32>
    %14 = arith.truncf %13 : vector<32x256xf32> to vector<32x256xbf16>
    %cst_14 = arith.constant dense<0.000000e+00> : vector<64x256xf32>
    %15 = tpu.matmul %1, %14, %cst_14 {dimension_numbers = #tpu.dot_dimension_numbers<[1], [0], [0], [1], [0, 0, 1, 1], [], []>} : vector<64x32xbf16>, vector<32x256xbf16>, vector<64x256xf32> -> vector<64x256xf32>
    %16 = arith.maximumf %8, %15 : vector<64x256xf32>
    %c0_15 = arith.constant 0 : index
    %c2 = arith.constant 2 : index
    %c0_16 = arith.constant 0 : index
    %c0_17 = arith.constant 0 : index
    %17 = vector.load %arg2[%c0_15, %c2, %c0_16, %c0_17] : memref<1x16x8x256xbf16, #tpu.memory_space<vmem>>, vector<1x1x8x256xbf16>
    %18 = vector.shape_cast %17 : vector<1x1x8x256xbf16> to vector<8x256xbf16>
    %cst_18 = arith.constant dense<0.000000e+00> : vector<32x256xf32>
    %19 = tpu.matmul %0, %18, %cst_18 {dimension_numbers = #tpu.dot_dimension_numbers<[1], [0], [0], [1], [0, 0, 1, 1], [], []>} : vector<32x8xbf16>, vector<8x256xbf16>, vector<32x256xf32> -> vector<32x256xf32>
    %cst_19 = arith.constant 0.000000e+00 : f32
    %20 = vector.broadcast %cst_19 : f32 to vector<32x256xf32>
    %21 = arith.maximumf %19, %20 : vector<32x256xf32>
    %22 = arith.truncf %21 : vector<32x256xf32> to vector<32x256xbf16>
    %cst_20 = arith.constant dense<0.000000e+00> : vector<64x256xf32>
    %23 = tpu.matmul %1, %22, %cst_20 {dimension_numbers = #tpu.dot_dimension_numbers<[1], [0], [0], [1], [0, 0, 1, 1], [], []>} : vector<64x32xbf16>, vector<32x256xbf16>, vector<64x256xf32> -> vector<64x256xf32>
    %24 = arith.maximumf %16, %23 : vector<64x256xf32>
    %c0_21 = arith.constant 0 : index
    %c3 = arith.constant 3 : index
    %c0_22 = arith.constant 0 : index
    %c0_23 = arith.constant 0 : index
    %25 = vector.load %arg2[%c0_21, %c3, %c0_22, %c0_23] : memref<1x16x8x256xbf16, #tpu.memory_space<vmem>>, vector<1x1x8x256xbf16>
    %26 = vector.shape_cast %25 : vector<1x1x8x256xbf16> to vector<8x256xbf16>
    %cst_24 = arith.constant dense<0.000000e+00> : vector<32x256xf32>
    %27 = tpu.matmul %0, %26, %cst_24 {dimension_numbers = #tpu.dot_dimension_numbers<[1], [0], [0], [1], [0, 0, 1, 1], [], []>} : vector<32x8xbf16>, vector<8x256xbf16>, vector<32x256xf32> -> vector<32x256xf32>
    %cst_25 = arith.constant 0.000000e+00 : f32
    %28 = vector.broadcast %cst_25 : f32 to vector<32x256xf32>
    %29 = arith.maximumf %27, %28 : vector<32x256xf32>
    %30 = arith.truncf %29 : vector<32x256xf32> to vector<32x256xbf16>
    %cst_26 = arith.constant dense<0.000000e+00> : vector<64x256xf32>
    %31 = tpu.matmul %1, %30, %cst_26 {dimension_numbers = #tpu.dot_dimension_numbers<[1], [0], [0], [1], [0, 0, 1, 1], [], []>} : vector<64x32xbf16>, vector<32x256xbf16>, vector<64x256xf32> -> vector<64x256xf32>
    %32 = arith.maximumf %24, %31 : vector<64x256xf32>
    %c0_27 = arith.constant 0 : index
    %c4 = arith.constant 4 : index
    %c0_28 = arith.constant 0 : index
    %c0_29 = arith.constant 0 : index
    %33 = vector.load %arg2[%c0_27, %c4, %c0_28, %c0_29] : memref<1x16x8x256xbf16, #tpu.memory_space<vmem>>, vector<1x1x8x256xbf16>
    %34 = vector.shape_cast %33 : vector<1x1x8x256xbf16> to vector<8x256xbf16>
    %cst_30 = arith.constant dense<0.000000e+00> : vector<32x256xf32>
    %35 = tpu.matmul %0, %34, %cst_30 {dimension_numbers = #tpu.dot_dimension_numbers<[1], [0], [0], [1], [0, 0, 1, 1], [], []>} : vector<32x8xbf16>, vector<8x256xbf16>, vector<32x256xf32> -> vector<32x256xf32>
    %cst_31 = arith.constant 0.000000e+00 : f32
    %36 = vector.broadcast %cst_31 : f32 to vector<32x256xf32>
    %37 = arith.maximumf %35, %36 : vector<32x256xf32>
    %38 = arith.truncf %37 : vector<32x256xf32> to vector<32x256xbf16>
    %cst_32 = arith.constant dense<0.000000e+00> : vector<64x256xf32>
    %39 = tpu.matmul %1, %38, %cst_32 {dimension_numbers = #tpu.dot_dimension_numbers<[1], [0], [0], [1], [0, 0, 1, 1], [], []>} : vector<64x32xbf16>, vector<32x256xbf16>, vector<64x256xf32> -> vector<64x256xf32>
    %40 = arith.maximumf %32, %39 : vector<64x256xf32>
    %c0_33 = arith.constant 0 : index
    %c5 = arith.constant 5 : index
    %c0_34 = arith.constant 0 : index
    %c0_35 = arith.constant 0 : index
    %41 = vector.load %arg2[%c0_33, %c5, %c0_34, %c0_35] : memref<1x16x8x256xbf16, #tpu.memory_space<vmem>>, vector<1x1x8x256xbf16>
    %42 = vector.shape_cast %41 : vector<1x1x8x256xbf16> to vector<8x256xbf16>
    %cst_36 = arith.constant dense<0.000000e+00> : vector<32x256xf32>
    %43 = tpu.matmul %0, %42, %cst_36 {dimension_numbers = #tpu.dot_dimension_numbers<[1], [0], [0], [1], [0, 0, 1, 1], [], []>} : vector<32x8xbf16>, vector<8x256xbf16>, vector<32x256xf32> -> vector<32x256xf32>
    %cst_37 = arith.constant 0.000000e+00 : f32
    %44 = vector.broadcast %cst_37 : f32 to vector<32x256xf32>
    %45 = arith.maximumf %43, %44 : vector<32x256xf32>
    %46 = arith.truncf %45 : vector<32x256xf32> to vector<32x256xbf16>
    %cst_38 = arith.constant dense<0.000000e+00> : vector<64x256xf32>
    %47 = tpu.matmul %1, %46, %cst_38 {dimension_numbers = #tpu.dot_dimension_numbers<[1], [0], [0], [1], [0, 0, 1, 1], [], []>} : vector<64x32xbf16>, vector<32x256xbf16>, vector<64x256xf32> -> vector<64x256xf32>
    %48 = arith.maximumf %40, %47 : vector<64x256xf32>
    %c0_39 = arith.constant 0 : index
    %c6 = arith.constant 6 : index
    %c0_40 = arith.constant 0 : index
    %c0_41 = arith.constant 0 : index
    %49 = vector.load %arg2[%c0_39, %c6, %c0_40, %c0_41] : memref<1x16x8x256xbf16, #tpu.memory_space<vmem>>, vector<1x1x8x256xbf16>
    %50 = vector.shape_cast %49 : vector<1x1x8x256xbf16> to vector<8x256xbf16>
    %cst_42 = arith.constant dense<0.000000e+00> : vector<32x256xf32>
    %51 = tpu.matmul %0, %50, %cst_42 {dimension_numbers = #tpu.dot_dimension_numbers<[1], [0], [0], [1], [0, 0, 1, 1], [], []>} : vector<32x8xbf16>, vector<8x256xbf16>, vector<32x256xf32> -> vector<32x256xf32>
    %cst_43 = arith.constant 0.000000e+00 : f32
    %52 = vector.broadcast %cst_43 : f32 to vector<32x256xf32>
    %53 = arith.maximumf %51, %52 : vector<32x256xf32>
    %54 = arith.truncf %53 : vector<32x256xf32> to vector<32x256xbf16>
    %cst_44 = arith.constant dense<0.000000e+00> : vector<64x256xf32>
    %55 = tpu.matmul %1, %54, %cst_44 {dimension_numbers = #tpu.dot_dimension_numbers<[1], [0], [0], [1], [0, 0, 1, 1], [], []>} : vector<64x32xbf16>, vector<32x256xbf16>, vector<64x256xf32> -> vector<64x256xf32>
    %56 = arith.maximumf %48, %55 : vector<64x256xf32>
    %c0_45 = arith.constant 0 : index
    %c7 = arith.constant 7 : index
    %c0_46 = arith.constant 0 : index
    %c0_47 = arith.constant 0 : index
    %57 = vector.load %arg2[%c0_45, %c7, %c0_46, %c0_47] : memref<1x16x8x256xbf16, #tpu.memory_space<vmem>>, vector<1x1x8x256xbf16>
    %58 = vector.shape_cast %57 : vector<1x1x8x256xbf16> to vector<8x256xbf16>
    %cst_48 = arith.constant dense<0.000000e+00> : vector<32x256xf32>
    %59 = tpu.matmul %0, %58, %cst_48 {dimension_numbers = #tpu.dot_dimension_numbers<[1], [0], [0], [1], [0, 0, 1, 1], [], []>} : vector<32x8xbf16>, vector<8x256xbf16>, vector<32x256xf32> -> vector<32x256xf32>
    %cst_49 = arith.constant 0.000000e+00 : f32
    %60 = vector.broadcast %cst_49 : f32 to vector<32x256xf32>
    %61 = arith.maximumf %59, %60 : vector<32x256xf32>
    %62 = arith.truncf %61 : vector<32x256xf32> to vector<32x256xbf16>
    %cst_50 = arith.constant dense<0.000000e+00> : vector<64x256xf32>
    %63 = tpu.matmul %1, %62, %cst_50 {dimension_numbers = #tpu.dot_dimension_numbers<[1], [0], [0], [1], [0, 0, 1, 1], [], []>} : vector<64x32xbf16>, vector<32x256xbf16>, vector<64x256xf32> -> vector<64x256xf32>
    %64 = arith.maximumf %56, %63 : vector<64x256xf32>
    %c0_51 = arith.constant 0 : index
    %c8 = arith.constant 8 : index
    %c0_52 = arith.constant 0 : index
    %c0_53 = arith.constant 0 : index
    %65 = vector.load %arg2[%c0_51, %c8, %c0_52, %c0_53] : memref<1x16x8x256xbf16, #tpu.memory_space<vmem>>, vector<1x1x8x256xbf16>
    %66 = vector.shape_cast %65 : vector<1x1x8x256xbf16> to vector<8x256xbf16>
    %cst_54 = arith.constant dense<0.000000e+00> : vector<32x256xf32>
    %67 = tpu.matmul %0, %66, %cst_54 {dimension_numbers = #tpu.dot_dimension_numbers<[1], [0], [0], [1], [0, 0, 1, 1], [], []>} : vector<32x8xbf16>, vector<8x256xbf16>, vector<32x256xf32> -> vector<32x256xf32>
    %cst_55 = arith.constant 0.000000e+00 : f32
    %68 = vector.broadcast %cst_55 : f32 to vector<32x256xf32>
    %69 = arith.maximumf %67, %68 : vector<32x256xf32>
    %70 = arith.truncf %69 : vector<32x256xf32> to vector<32x256xbf16>
    %cst_56 = arith.constant dense<0.000000e+00> : vector<64x256xf32>
    %71 = tpu.matmul %1, %70, %cst_56 {dimension_numbers = #tpu.dot_dimension_numbers<[1], [0], [0], [1], [0, 0, 1, 1], [], []>} : vector<64x32xbf16>, vector<32x256xbf16>, vector<64x256xf32> -> vector<64x256xf32>
    %72 = arith.maximumf %64, %71 : vector<64x256xf32>
    %c0_57 = arith.constant 0 : index
    %c9 = arith.constant 9 : index
    %c0_58 = arith.constant 0 : index
    %c0_59 = arith.constant 0 : index
    %73 = vector.load %arg2[%c0_57, %c9, %c0_58, %c0_59] : memref<1x16x8x256xbf16, #tpu.memory_space<vmem>>, vector<1x1x8x256xbf16>
    %74 = vector.shape_cast %73 : vector<1x1x8x256xbf16> to vector<8x256xbf16>
    %cst_60 = arith.constant dense<0.000000e+00> : vector<32x256xf32>
    %75 = tpu.matmul %0, %74, %cst_60 {dimension_numbers = #tpu.dot_dimension_numbers<[1], [0], [0], [1], [0, 0, 1, 1], [], []>} : vector<32x8xbf16>, vector<8x256xbf16>, vector<32x256xf32> -> vector<32x256xf32>
    %cst_61 = arith.constant 0.000000e+00 : f32
    %76 = vector.broadcast %cst_61 : f32 to vector<32x256xf32>
    %77 = arith.maximumf %75, %76 : vector<32x256xf32>
    %78 = arith.truncf %77 : vector<32x256xf32> to vector<32x256xbf16>
    %cst_62 = arith.constant dense<0.000000e+00> : vector<64x256xf32>
    %79 = tpu.matmul %1, %78, %cst_62 {dimension_numbers = #tpu.dot_dimension_numbers<[1], [0], [0], [1], [0, 0, 1, 1], [], []>} : vector<64x32xbf16>, vector<32x256xbf16>, vector<64x256xf32> -> vector<64x256xf32>
    %80 = arith.maximumf %72, %79 : vector<64x256xf32>
    %c0_63 = arith.constant 0 : index
    %c10 = arith.constant 10 : index
    %c0_64 = arith.constant 0 : index
    %c0_65 = arith.constant 0 : index
    %81 = vector.load %arg2[%c0_63, %c10, %c0_64, %c0_65] : memref<1x16x8x256xbf16, #tpu.memory_space<vmem>>, vector<1x1x8x256xbf16>
    %82 = vector.shape_cast %81 : vector<1x1x8x256xbf16> to vector<8x256xbf16>
    %cst_66 = arith.constant dense<0.000000e+00> : vector<32x256xf32>
    %83 = tpu.matmul %0, %82, %cst_66 {dimension_numbers = #tpu.dot_dimension_numbers<[1], [0], [0], [1], [0, 0, 1, 1], [], []>} : vector<32x8xbf16>, vector<8x256xbf16>, vector<32x256xf32> -> vector<32x256xf32>
    %cst_67 = arith.constant 0.000000e+00 : f32
    %84 = vector.broadcast %cst_67 : f32 to vector<32x256xf32>
    %85 = arith.maximumf %83, %84 : vector<32x256xf32>
    %86 = arith.truncf %85 : vector<32x256xf32> to vector<32x256xbf16>
    %cst_68 = arith.constant dense<0.000000e+00> : vector<64x256xf32>
    %87 = tpu.matmul %1, %86, %cst_68 {dimension_numbers = #tpu.dot_dimension_numbers<[1], [0], [0], [1], [0, 0, 1, 1], [], []>} : vector<64x32xbf16>, vector<32x256xbf16>, vector<64x256xf32> -> vector<64x256xf32>
    %88 = arith.maximumf %80, %87 : vector<64x256xf32>
    %c0_69 = arith.constant 0 : index
    %c11 = arith.constant 11 : index
    %c0_70 = arith.constant 0 : index
    %c0_71 = arith.constant 0 : index
    %89 = vector.load %arg2[%c0_69, %c11, %c0_70, %c0_71] : memref<1x16x8x256xbf16, #tpu.memory_space<vmem>>, vector<1x1x8x256xbf16>
    %90 = vector.shape_cast %89 : vector<1x1x8x256xbf16> to vector<8x256xbf16>
    %cst_72 = arith.constant dense<0.000000e+00> : vector<32x256xf32>
    %91 = tpu.matmul %0, %90, %cst_72 {dimension_numbers = #tpu.dot_dimension_numbers<[1], [0], [0], [1], [0, 0, 1, 1], [], []>} : vector<32x8xbf16>, vector<8x256xbf16>, vector<32x256xf32> -> vector<32x256xf32>
    %cst_73 = arith.constant 0.000000e+00 : f32
    %92 = vector.broadcast %cst_73 : f32 to vector<32x256xf32>
    %93 = arith.maximumf %91, %92 : vector<32x256xf32>
    %94 = arith.truncf %93 : vector<32x256xf32> to vector<32x256xbf16>
    %cst_74 = arith.constant dense<0.000000e+00> : vector<64x256xf32>
    %95 = tpu.matmul %1, %94, %cst_74 {dimension_numbers = #tpu.dot_dimension_numbers<[1], [0], [0], [1], [0, 0, 1, 1], [], []>} : vector<64x32xbf16>, vector<32x256xbf16>, vector<64x256xf32> -> vector<64x256xf32>
    %96 = arith.maximumf %88, %95 : vector<64x256xf32>
    %c0_75 = arith.constant 0 : index
    %c12 = arith.constant 12 : index
    %c0_76 = arith.constant 0 : index
    %c0_77 = arith.constant 0 : index
    %97 = vector.load %arg2[%c0_75, %c12, %c0_76, %c0_77] : memref<1x16x8x256xbf16, #tpu.memory_space<vmem>>, vector<1x1x8x256xbf16>
    %98 = vector.shape_cast %97 : vector<1x1x8x256xbf16> to vector<8x256xbf16>
    %cst_78 = arith.constant dense<0.000000e+00> : vector<32x256xf32>
    %99 = tpu.matmul %0, %98, %cst_78 {dimension_numbers = #tpu.dot_dimension_numbers<[1], [0], [0], [1], [0, 0, 1, 1], [], []>} : vector<32x8xbf16>, vector<8x256xbf16>, vector<32x256xf32> -> vector<32x256xf32>
    %cst_79 = arith.constant 0.000000e+00 : f32
    %100 = vector.broadcast %cst_79 : f32 to vector<32x256xf32>
    %101 = arith.maximumf %99, %100 : vector<32x256xf32>
    %102 = arith.truncf %101 : vector<32x256xf32> to vector<32x256xbf16>
    %cst_80 = arith.constant dense<0.000000e+00> : vector<64x256xf32>
    %103 = tpu.matmul %1, %102, %cst_80 {dimension_numbers = #tpu.dot_dimension_numbers<[1], [0], [0], [1], [0, 0, 1, 1], [], []>} : vector<64x32xbf16>, vector<32x256xbf16>, vector<64x256xf32> -> vector<64x256xf32>
    %104 = arith.maximumf %96, %103 : vector<64x256xf32>
    %c0_81 = arith.constant 0 : index
    %c13 = arith.constant 13 : index
    %c0_82 = arith.constant 0 : index
    %c0_83 = arith.constant 0 : index
    %105 = vector.load %arg2[%c0_81, %c13, %c0_82, %c0_83] : memref<1x16x8x256xbf16, #tpu.memory_space<vmem>>, vector<1x1x8x256xbf16>
    %106 = vector.shape_cast %105 : vector<1x1x8x256xbf16> to vector<8x256xbf16>
    %cst_84 = arith.constant dense<0.000000e+00> : vector<32x256xf32>
    %107 = tpu.matmul %0, %106, %cst_84 {dimension_numbers = #tpu.dot_dimension_numbers<[1], [0], [0], [1], [0, 0, 1, 1], [], []>} : vector<32x8xbf16>, vector<8x256xbf16>, vector<32x256xf32> -> vector<32x256xf32>
    %cst_85 = arith.constant 0.000000e+00 : f32
    %108 = vector.broadcast %cst_85 : f32 to vector<32x256xf32>
    %109 = arith.maximumf %107, %108 : vector<32x256xf32>
    %110 = arith.truncf %109 : vector<32x256xf32> to vector<32x256xbf16>
    %cst_86 = arith.constant dense<0.000000e+00> : vector<64x256xf32>
    %111 = tpu.matmul %1, %110, %cst_86 {dimension_numbers = #tpu.dot_dimension_numbers<[1], [0], [0], [1], [0, 0, 1, 1], [], []>} : vector<64x32xbf16>, vector<32x256xbf16>, vector<64x256xf32> -> vector<64x256xf32>
    %112 = arith.maximumf %104, %111 : vector<64x256xf32>
    %c0_87 = arith.constant 0 : index
    %c14 = arith.constant 14 : index
    %c0_88 = arith.constant 0 : index
    %c0_89 = arith.constant 0 : index
    %113 = vector.load %arg2[%c0_87, %c14, %c0_88, %c0_89] : memref<1x16x8x256xbf16, #tpu.memory_space<vmem>>, vector<1x1x8x256xbf16>
    %114 = vector.shape_cast %113 : vector<1x1x8x256xbf16> to vector<8x256xbf16>
    %cst_90 = arith.constant dense<0.000000e+00> : vector<32x256xf32>
    %115 = tpu.matmul %0, %114, %cst_90 {dimension_numbers = #tpu.dot_dimension_numbers<[1], [0], [0], [1], [0, 0, 1, 1], [], []>} : vector<32x8xbf16>, vector<8x256xbf16>, vector<32x256xf32> -> vector<32x256xf32>
    %cst_91 = arith.constant 0.000000e+00 : f32
    %116 = vector.broadcast %cst_91 : f32 to vector<32x256xf32>
    %117 = arith.maximumf %115, %116 : vector<32x256xf32>
    %118 = arith.truncf %117 : vector<32x256xf32> to vector<32x256xbf16>
    %cst_92 = arith.constant dense<0.000000e+00> : vector<64x256xf32>
    %119 = tpu.matmul %1, %118, %cst_92 {dimension_numbers = #tpu.dot_dimension_numbers<[1], [0], [0], [1], [0, 0, 1, 1], [], []>} : vector<64x32xbf16>, vector<32x256xbf16>, vector<64x256xf32> -> vector<64x256xf32>
    %120 = arith.maximumf %112, %119 : vector<64x256xf32>
    %c0_93 = arith.constant 0 : index
    %c15 = arith.constant 15 : index
    %c0_94 = arith.constant 0 : index
    %c0_95 = arith.constant 0 : index
    %121 = vector.load %arg2[%c0_93, %c15, %c0_94, %c0_95] : memref<1x16x8x256xbf16, #tpu.memory_space<vmem>>, vector<1x1x8x256xbf16>
    %122 = vector.shape_cast %121 : vector<1x1x8x256xbf16> to vector<8x256xbf16>
    %cst_96 = arith.constant dense<0.000000e+00> : vector<32x256xf32>
    %123 = tpu.matmul %0, %122, %cst_96 {dimension_numbers = #tpu.dot_dimension_numbers<[1], [0], [0], [1], [0, 0, 1, 1], [], []>} : vector<32x8xbf16>, vector<8x256xbf16>, vector<32x256xf32> -> vector<32x256xf32>
    %cst_97 = arith.constant 0.000000e+00 : f32
    %124 = vector.broadcast %cst_97 : f32 to vector<32x256xf32>
    %125 = arith.maximumf %123, %124 : vector<32x256xf32>
    %126 = arith.truncf %125 : vector<32x256xf32> to vector<32x256xbf16>
    %cst_98 = arith.constant dense<0.000000e+00> : vector<64x256xf32>
    %127 = tpu.matmul %1, %126, %cst_98 {dimension_numbers = #tpu.dot_dimension_numbers<[1], [0], [0], [1], [0, 0, 1, 1], [], []>} : vector<64x32xbf16>, vector<32x256xbf16>, vector<64x256xf32> -> vector<64x256xf32>
    %128 = arith.maximumf %120, %127 : vector<64x256xf32>
    %c0_99 = arith.constant 0 : index
    %c0_100 = arith.constant 0 : index
    %129 = vector.load %arg5[%c0_99, %c0_100] : memref<64x1xf32, #tpu.memory_space<vmem>>, vector<64x1xf32>
    %130 = vector.broadcast %129 : vector<64x1xf32> to vector<64x256xf32>
    %131 = arith.addf %128, %130 : vector<64x256xf32>
    %cst_101 = arith.constant 0.000000e+00 : f32
    %132 = vector.broadcast %cst_101 : f32 to vector<64x256xf32>
    %133 = arith.maximumf %131, %132 : vector<64x256xf32>
    %c0_102 = arith.constant 0 : index
    %c0_103 = arith.constant 0 : index
    %c0_104 = arith.constant 0 : index
    %134 = vector.load %arg6[%c0_102, %c0_103, %c0_104] : memref<1x64x256xf32, #tpu.memory_space<vmem>>, vector<1x64x256xf32>
    %135 = vector.shape_cast %134 : vector<1x64x256xf32> to vector<64x256xf32>
    %136 = vector.shape_cast %133 : vector<64x256xf32> to vector<1x64x256xf32>
    tpu.vector_store %arg6[%c0_102, %c0_103, %c0_104], %136 {strides = array<i32>} : memref<1x64x256xf32, #tpu.memory_space<vmem>>, vector<1x64x256xf32>,
    return
  }
  func.func @transform_0(%arg0: i32, %arg1: i32) -> (i32, i32, i32, i32) {
    %c0_i32 = arith.constant 0 : i32
    %c0_i32_0 = arith.constant 0 : i32
    %c0_i32_1 = arith.constant 0 : i32
    return %arg0, %c0_i32, %c0_i32_0, %arg1 : i32, i32, i32, i32
  }
  func.func @transform_1(%arg0: i32, %arg1: i32) -> (i32, i32) {
    %c0_i32 = arith.constant 0 : i32
    %c0_i32_0 = arith.constant 0 : i32
    %c0_i32_1 = arith.constant 0 : i32
    return %c0_i32, %c0_i32_0 : i32, i32
  }
  func.func @transform_2(%arg0: i32, %arg1: i32) -> (i32, i32) {
    %c0_i32 = arith.constant 0 : i32
    %c0_i32_0 = arith.constant 0 : i32
    %c0_i32_1 = arith.constant 0 : i32
    return %c0_i32, %c0_i32_0 : i32, i32
  }
  func.func @transform_3(%arg0: i32, %arg1: i32) -> (i32, i32) {
    %c0_i32 = arith.constant 0 : i32
    %c0_i32_0 = arith.constant 0 : i32
    %c0_i32_1 = arith.constant 0 : i32
    return %c0_i32, %c0_i32_0 : i32, i32
  }
  func.func @transform_4(%arg0: i32, %arg1: i32) -> (i32, i32, i32) {
    %c0_i32 = arith.constant 0 : i32
    %c0_i32_0 = arith.constant 0 : i32
    return %arg0, %c0_i32, %arg1 : i32, i32, i32
  }
}

</mosaic_0001>

<bundles_post_ra>
// kernel: custom-call.12
= control target key start
LH: loop header
LB: loop body
LE: loop exit
PB: predicated region body
PF: predicated region fallthrough
CT: control target
= control target key end

     0   :  { %s6_s0 = inlined_call_operand.vmem [shape: f32[2,512], index: 0, kind: output, shape index: {}]  }

// kernel: _lambda_.3
= control target key start
LH: loop header
LB: loop body
LE: loop exit
PB: predicated region body
PF: predicated region fallthrough
CT: control target
= control target key end

     0   :  { %s1460_s15 = smov 0   ;;  %s1462_s16 = smov 0   ;;  %s1738_s0 = inlined_call_operand.vmem [shape: bf16[2,8,8,256], index: 0, kind: input, shape index: {}]   ;;  %s1739_s1 = inlined_call_operand.vmem [shape: bf16[32,8], index: 1, kind: input, shape index: {}]   ;;  %s1740_s2 = inlined_call_operand.vmem [shape: bf16[32,32], index: 2, kind: input, shape index: {}]   ;;  %s1741_s3 = inlined_call_operand.vmem [shape: f32[32,1], index: 3, kind: input, shape index: {}]   ;;  %s1742_s4 = inlined_call_operand.vmem [shape: f32[2,32,256], index: 4, kind: output, shape index: {}]  }
   0x1   :  { %s1464_s17 = smov 0  }
   0x2 LB: > { %s26_s18 = sadd.s32 1, %s1428_s16  ;;  %p1283_p0 = scmp.ge.s32.totalorder %s1432_s17, 1  ;;  %s1432_s17 = sphi %s1464_s17, %s14_s17   ;;  %s1428_s16 = sphi %s1462_s16, %s1744_s16   ;;  %s1424_s15 = sphi %s1460_s15, %s1743_s15  }
   0x3   : > { %p28_p1 = scmp.ge.s32.totalorder %s26_s18, 2  ;;  %p183_p2 = scmp.lt.s32.totalorder %s1432_s17, 3 }
   0x5   : > { %s1746_s18 = smov (%p28_p1, %s26_s18), 0  ;;  %p184_p3 = pnand %p1283_p0, %p183_p2 }
   0x6   : > { %p218_p4 = scmp.lt.s32.totalorder (!%p184_p3), %s1424_s15, 1 }
   0x7   : > { %187 = sbr.rel (%p184_p3) target bundleno = 573 (0x23d), region = 36 }
   0xc   : > { %s1748_s15 = smov (!%p218_p4, %s1424_s15), 1  ;;  %vm269_vm0 = vcmask 1043456   ;;  %v1495_v12 = vld [vmem:[%s1739_s1] sm:$0xff]  ;;  %vm262_vm1 = vcmask 64512   ;;  %v1506_v15 = vld [vmem:[%s1739_s1 + $0x8] sm:$0xff]  ;;  %vm336_vm2 = vcmask 261120  }
   0xd   : > { %s1377_s19 = sshll.u32 %s1748_s15, 6 }
   0xe   : > { %s1486_s22 = scalar_lea.vmem %s1738_s0, %s1377_s19  ;;  %s1717_s20 = scalar_lea.vmem %s1742_s4, %s1377_s19 }
   0xf   : > { %v246_v0 = vld [vmem:[%s1486_s22] sm:$0xff]  ;;  %v1312_v1 = vld [vmem:[%s1486_s22 + $0x8] sm:$0xff]  ;;  %v1321_v16 = vld [vmem:[%s1486_s22 + $0x10] sm:$0xff] }
  0x10   : > { %v258_v2 = vunpack.c.l.b16 %v246_v0  ;;  %v259_v3 = vunpack.c.h.b16 %v246_v0  ;;  %v384_v4 = vunpack.c.l.b16 %v1312_v1  ;;  %v385_v5 = vunpack.c.h.b16 %v1312_v1  ;;  %v1330_v23 = vld [vmem:[%s1486_s22 + $0x18] sm:$0xff]  ;;  %v1339_v30 = vld [vmem:[%s1486_s22 + $0x20] sm:$0xff]  ;;  %v1348_v37 = vld [vmem:[%s1486_s22 + $0x28] sm:$0xff] }
  0x11   : > { %v493_v17 = vunpack.c.l.b16 %v1321_v16  ;;  %v494_v18 = vunpack.c.h.b16 %v1321_v16  ;;  %v602_v24 = vunpack.c.l.b16 %v1330_v23  ;;  %v603_v25 = vunpack.c.h.b16 %v1330_v23  ;;  %v1357_v56 = vld [vmem:[%s1486_s22 + $0x30] sm:$0xff]  ;;  %v1575_v16 = vld [vmem:[%s1740_s2 + $0x8] sm:$0xff] }
  0x12   : > { %v260_v6 = vpack.c.b16 %v258_v2, %v258_v2  ;;  %v261_v7 = vpack.c.b16 %v259_v3, %v259_v3  ;;  %v386_v8 = vpack.c.b16 %v384_v4, %v384_v4  ;;  %v387_v9 = vpack.c.b16 %v385_v5, %v385_v5 }
  0x13   : > { %v495_v19 = vpack.c.b16 %v493_v17, %v493_v17  ;;  %v496_v20 = vpack.c.b16 %v494_v18, %v494_v18  ;;  %v604_v26 = vpack.c.b16 %v602_v24, %v602_v24  ;;  %v605_v27 = vpack.c.b16 %v603_v25, %v603_v25  ;;  %v1366_v25 = vld [vmem:[%s1486_s22 + $0x38] sm:$0xff] }
  0x14   : > { %v271_v10 = vsel %vm269_vm0, %v260_v6, 0  ;;  %v274_v11 = vsel %vm269_vm0, %v261_v7, 0  ;;  %v389_v13 = vsel %vm269_vm0, %v386_v8, 0  ;;  %v392_v14 = vsel %vm269_vm0, %v387_v9, 0  ;;  %v1562_v9 = vld [vmem:[%s1740_s2] sm:$0xff] }
  0x15   : > { %283 = vmatpush.bf16.msra.mxu0 %v271_v10  ;;  %302 = vmatpush.bf16.msra.mxu1 %v274_v11  ;;  %v498_v21 = vsel %vm269_vm0, %v495_v19, 0  ;;  %v501_v22 = vsel %vm269_vm0, %v496_v20, 0  ;;  %v607_v28 = vsel %vm269_vm0, %v604_v26, 0  ;;  %v610_v29 = vsel %vm269_vm0, %v605_v27, 0 }
  0x16   : > { %v711_v31 = vunpack.c.l.b16 %v1339_v30  ;;  %v712_v32 = vunpack.c.h.b16 %v1339_v30  ;;  %v820_v38 = vunpack.c.l.b16 %v1348_v37  ;;  %v821_v39 = vunpack.c.h.b16 %v1348_v37 }
  0x17   : > { %v929_v57 = vunpack.c.l.b16 %v1357_v56  ;;  %v930_v58 = vunpack.c.h.b16 %v1357_v56 }
  0x18   : > { %1296 = vmatmul.msk.bf16.vlgmr.msra.gmra.mxu0 %vm262_vm1, %v1495_v12  ;;  %1298 = vmatmul.msk.bf16.vlgmr.msra.gmra.mxu1 %vm262_vm1, %v1495_v12  ;;  %v713_v33 = vpack.c.b16 %v711_v31, %v711_v31  ;;  %v714_v34 = vpack.c.b16 %v712_v32, %v712_v32  ;;  %v822_v40 = vpack.c.b16 %v820_v38, %v820_v38 }
  0x19   : > { %401 = vmatpush.bf16.msrb.mxu0 %v389_v13  ;;  %420 = vmatpush.bf16.msrb.mxu1 %v392_v14  ;;  %v823_v41 = vpack.c.b16 %v821_v39, %v821_v39  ;;  %v931_v63 = vpack.c.b16 %v929_v57, %v929_v57  ;;  %v932_v0 = vpack.c.b16 %v930_v58, %v930_v58 }
  0x1a   : > { %v716_v35 = vsel %vm269_vm0, %v713_v33, 0  ;;  %v719_v36 = vsel %vm269_vm0, %v714_v34, 0  ;;  %v825_v42 = vsel %vm269_vm0, %v822_v40, 0 }
  0x1b   : > { %v828_v43 = vsel %vm269_vm0, %v823_v41, 0  ;;  %v934_v3 = vsel %vm269_vm0, %v931_v63, 0  ;;  %v937_v4 = vsel %vm269_vm0, %v932_v0, 0 }
  0x1d   : > { %510 = vmatpush.bf16.msra.mxu0 %v498_v21  ;;  %529 = vmatpush.bf16.msra.mxu1 %v501_v22 }
  0x28   : > { %1297 = vmatmul.msk.bf16.gmra.mxu0 %vm262_vm1, %v1506_v15  ;;  %1299 = vmatmul.msk.bf16.gmra.mxu1 %vm262_vm1, %v1506_v15 }
  0x38   : > { %1313 = vmatmul.msk.bf16.vlgmr.msrb.gmra.mxu0 %vm262_vm1, %v1495_v12  ;;  %1315 = vmatmul.msk.bf16.vlgmr.msrb.gmra.mxu1 %vm262_vm1, %v1495_v12 }
  0x39   : > { %619 = vmatpush.bf16.msrb.mxu0 %v607_v28  ;;  %638 = vmatpush.bf16.msrb.mxu1 %v610_v29  ;;  %v1038_v28 = vunpack.c.l.b16 %v1366_v25  ;;  %v1039_v29 = vunpack.c.h.b16 %v1366_v25 }
  0x3b   : > { %v1040_v32 = vpack.c.b16 %v1038_v28, %v1038_v28  ;;  %v1041_v33 = vpack.c.b16 %v1039_v29, %v1039_v29 }
  0x3d   : > { %v1046_v37 = vsel %vm269_vm0, %v1041_v33, 0 }
  0x48   : > { %1314 = vmatmul.msk.bf16.gmra.mxu0 %vm262_vm1, %v1506_v15  ;;  %1316 = vmatmul.msk.bf16.gmra.mxu1 %vm262_vm1, %v1506_v15 }
  0x58   : > { %1322 = vmatmul.msk.bf16.vlgmr.msra.gmra.mxu0 %vm262_vm1, %v1495_v12  ;;  %1324 = vmatmul.msk.bf16.vlgmr.msra.gmra.mxu1 %vm262_vm1, %v1495_v12 }
  0x59   : > { %728 = vmatpush.bf16.msra.mxu0 %v716_v35  ;;  %747 = vmatpush.bf16.msra.mxu1 %v719_v36  ;;  %v1043_v36 = vsel %vm269_vm0, %v1040_v32, 0 }
  0x68   : > { %1323 = vmatmul.msk.bf16.gmra.mxu0 %vm262_vm1, %v1506_v15  ;;  %1325 = vmatmul.msk.bf16.gmra.mxu1 %vm262_vm1, %v1506_v15 }
  0x78   : > { %1331 = vmatmul.msk.bf16.vlgmr.msrb.gmra.mxu0 %vm262_vm1, %v1495_v12  ;;  %1333 = vmatmul.msk.bf16.vlgmr.msrb.gmra.mxu1 %vm262_vm1, %v1495_v12 }
  0x79   : > { %837 = vmatpush.bf16.msrb.mxu0 %v825_v42  ;;  %856 = vmatpush.bf16.msrb.mxu1 %v828_v43 }
  0x88   : > { %1332 = vmatmul.msk.bf16.gmra.mxu0 %vm262_vm1, %v1506_v15  ;;  %1334 = vmatmul.msk.bf16.gmra.mxu1 %vm262_vm1, %v1506_v15 }
  0x95   : > { %v285_v44 = vpop.f32.mrf.mxu0  ;;  %v304_v45 = vpop.f32.mrf.mxu1 }
  0x96   : > { %v314_v1 = vmax.f32 %v285_v44, 0.0  ;;  %v315_v2 = vmax.f32 %v304_v45, 0.0 }
  0x98   : > { %1340 = vmatmul.msk.bf16.vlgmr.msra.gmra.mxu0 %vm262_vm1, %v1495_v12  ;;  %1342 = vmatmul.msk.bf16.vlgmr.msra.gmra.mxu1 %vm262_vm1, %v1495_v12 }
  0x99   : > { %946 = vmatpush.bf16.msra.mxu0 %v934_v3  ;;  %965 = vmatpush.bf16.msra.mxu1 %v937_v4 }
  0x9d   : > { %v287_v46 = vpop.f32.mrf.mxu0  ;;  %v306_v47 = vpop.f32.mrf.mxu1 }
  0x9e   : > { %v316_v59 = vmax.f32 %v287_v46, 0.0  ;;  %v317_v60 = vmax.f32 %v306_v47, 0.0 }
  0xa0   : > { %v322_v5 = vpack.c.bf16 %v316_v59, %v314_v1  ;;  %v323_v6 = vpack.c.bf16 %v317_v60, %v315_v2 }
  0xa5   : > { %v290_v48 = vpop.f32.mrf.mxu0  ;;  %v309_v49 = vpop.f32.mrf.mxu1 }
  0xa6   : > { %v318_v52 = vmax.f32 %v290_v48, 0.0  ;;  %v319_v53 = vmax.f32 %v309_v49, 0.0 }
  0xa8   : > { %1341 = vmatmul.msk.bf16.gmra.mxu0 %vm262_vm1, %v1506_v15  ;;  %1343 = vmatmul.msk.bf16.gmra.mxu1 %vm262_vm1, %v1506_v15 }
  0xad   : > { %v292_v50 = vpop.f32.mrf.mxu0  ;;  %v311_v51 = vpop.f32.mrf.mxu1 }
  0xae   : > { %v320_v54 = vmax.f32 %v292_v50, 0.0  ;;  %v321_v55 = vmax.f32 %v311_v51, 0.0 }
  0xb0   : > { %v324_v61 = vpack.c.bf16 %v320_v54, %v318_v52  ;;  %v325_v62 = vpack.c.bf16 %v321_v55, %v319_v53 }
  0xb2   : > { %349 = vmatpush.bf16.msra.mxu2 %v324_v61  ;;  %368 = vmatpush.bf16.msra.mxu3 %v325_v62 }
  0xb5   : > { %v403_v7 = vpop.f32.mrf.mxu0  ;;  %v422_v8 = vpop.f32.mrf.mxu1 }
  0xb6   : > { %350 = vmatpush.bf16.msra.mxu2 %v322_v5  ;;  %369 = vmatpush.bf16.msra.mxu3 %v323_v6  ;;  %v432_v30 = vmax.f32 %v403_v7, 0.0  ;;  %v433_v31 = vmax.f32 %v422_v8, 0.0 }
  0xb8   : > { %1349 = vmatmul.msk.bf16.vlgmr.msrb.gmra.mxu0 %vm262_vm1, %v1495_v12  ;;  %1351 = vmatmul.msk.bf16.vlgmr.msrb.gmra.mxu1 %vm262_vm1, %v1495_v12 }
  0xb9   : > { %1308 = vmatmul.msk.bf16.vlgmr.msra.gmra.mxu2 %vm336_vm2, %v1562_v9  ;;  %1310 = vmatmul.msk.bf16.vlgmr.msra.gmra.mxu3 %vm336_vm2, %v1562_v9 }
  0xba   : > { %1055 = vmatpush.bf16.msrb.mxu0 %v1043_v36  ;;  %1074 = vmatpush.bf16.msrb.mxu1 %v1046_v37 }
  0xbd   : > { %v405_v10 = vpop.f32.mrf.mxu0  ;;  %v424_v11 = vpop.f32.mrf.mxu1 }
  0xbe   : > { %v434_v23 = vmax.f32 %v405_v10, 0.0  ;;  %v435_v24 = vmax.f32 %v424_v11, 0.0 }
  0xc0   : > { %v440_v34 = vpack.c.bf16 %v434_v23, %v432_v30  ;;  %v441_v35 = vpack.c.bf16 %v435_v24, %v433_v31 }
  0xc5   : > { %v408_v13 = vpop.f32.mrf.mxu0  ;;  %v427_v14 = vpop.f32.mrf.mxu1 }
  0xc6   : > { %v436_v19 = vmax.f32 %v408_v13, 0.0  ;;  %v437_v20 = vmax.f32 %v427_v14, 0.0 }
  0xc8   : > { %1350 = vmatmul.msk.bf16.gmra.mxu0 %vm262_vm1, %v1506_v15  ;;  %1352 = vmatmul.msk.bf16.gmra.mxu1 %vm262_vm1, %v1506_v15 }
  0xc9   : > { %1309 = vmatmul.msk.bf16.gmra.mxu2 %vm336_vm2, %v1575_v16  ;;  %1311 = vmatmul.msk.bf16.gmra.mxu3 %vm336_vm2, %v1575_v16 }
  0xcd   : > { %v410_v17 = vpop.f32.mrf.mxu0  ;;  %v429_v18 = vpop.f32.mrf.mxu1 }
  0xce   : > { %v438_v21 = vmax.f32 %v410_v17, 0.0  ;;  %v439_v22 = vmax.f32 %v429_v18, 0.0 }
  0xd0   : > { %v442_v26 = vpack.c.bf16 %v438_v21, %v436_v19  ;;  %v443_v27 = vpack.c.bf16 %v439_v22, %v437_v20 }
  0xd2   : > { %450 = vmatpush.bf16.msrb.mxu2 %v442_v26  ;;  %469 = vmatpush.bf16.msrb.mxu3 %v443_v27 }
  0xd5   : > { %v512_v38 = vpop.f32.mrf.mxu0  ;;  %v531_v39 = vpop.f32.mrf.mxu1 }
  0xd6   : > { %451 = vmatpush.bf16.msrb.mxu2 %v440_v34  ;;  %470 = vmatpush.bf16.msrb.mxu3 %v441_v35  ;;  %v541_v54 = vmax.f32 %v512_v38, 0.0  ;;  %v542_v55 = vmax.f32 %v531_v39, 0.0 }
  0xd8   : > { %1358 = vmatmul.msk.bf16.vlgmr.msra.gmra.mxu0 %vm262_vm1, %v1495_v12  ;;  %1360 = vmatmul.msk.bf16.vlgmr.msra.gmra.mxu1 %vm262_vm1, %v1495_v12 }
  0xd9   : > { %1317 = vmatmul.msk.bf16.vlgmr.msrb.gmra.mxu2 %vm336_vm2, %v1562_v9  ;;  %1319 = vmatmul.msk.bf16.vlgmr.msrb.gmra.mxu3 %vm336_vm2, %v1562_v9 }
  0xdd   : > { %v514_v40 = vpop.f32.mrf.mxu0  ;;  %v533_v41 = vpop.f32.mrf.mxu1 }
  0xde   : > { %v543_v50 = vmax.f32 %v514_v40, 0.0  ;;  %v544_v51 = vmax.f32 %v533_v41, 0.0 }
  0xe0   : > { %v549_v56 = vpack.c.bf16 %v543_v50, %v541_v54  ;;  %v550_v57 = vpack.c.bf16 %v544_v51, %v542_v55 }
  0xe5   : > { %v517_v42 = vpop.f32.mrf.mxu0  ;;  %v536_v43 = vpop.f32.mrf.mxu1 }
  0xe6   : > { %v545_v46 = vmax.f32 %v517_v42, 0.0  ;;  %v546_v47 = vmax.f32 %v536_v43, 0.0 }
  0xe8   : > { %1359 = vmatmul.msk.bf16.gmra.mxu0 %vm262_vm1, %v1506_v15  ;;  %1361 = vmatmul.msk.bf16.gmra.mxu1 %vm262_vm1, %v1506_v15 }
  0xe9   : > { %1318 = vmatmul.msk.bf16.gmra.mxu2 %vm336_vm2, %v1575_v16  ;;  %1320 = vmatmul.msk.bf16.gmra.mxu3 %vm336_vm2, %v1575_v16 }
  0xed   : > { %v519_v44 = vpop.f32.mrf.mxu0  ;;  %v538_v45 = vpop.f32.mrf.mxu1 }
  0xee   : > { %v547_v48 = vmax.f32 %v519_v44, 0.0  ;;  %v548_v49 = vmax.f32 %v538_v45, 0.0 }
  0xf0   : > { %v551_v52 = vpack.c.bf16 %v547_v48, %v545_v46  ;;  %v552_v53 = vpack.c.bf16 %v548_v49, %v546_v47 }
  0xf2   : > { %559 = vmatpush.bf16.msra.mxu2 %v551_v52  ;;  %578 = vmatpush.bf16.msra.mxu3 %v552_v53 }
  0xf5   : > { %v621_v58 = vpop.f32.mrf.mxu0  ;;  %v640_v59 = vpop.f32.mrf.mxu1 }
  0xf6   : > { %560 = vmatpush.bf16.msra.mxu2 %v549_v56  ;;  %579 = vmatpush.bf16.msra.mxu3 %v550_v57  ;;  %v650_v10 = vmax.f32 %v621_v58, 0.0  ;;  %v651_v11 = vmax.f32 %v640_v59, 0.0 }
  0xf8   : > { %1367 = vmatmul.msk.bf16.vlgmr.msrb.gmra.mxu0 %vm262_vm1, %v1495_v12  ;;  %1369 = vmatmul.msk.bf16.vlgmr.msrb.gmra.mxu1 %vm262_vm1, %v1495_v12 }
  0xf9   : > { %1326 = vmatmul.msk.bf16.vlgmr.msra.gmra.mxu2 %vm336_vm2, %v1562_v9  ;;  %1328 = vmatmul.msk.bf16.vlgmr.msra.gmra.mxu3 %vm336_vm2, %v1562_v9 }
  0xfd   : > { %v623_v60 = vpop.f32.mrf.mxu0  ;;  %v642_v61 = vpop.f32.mrf.mxu1 }
  0xfe   : > { %v652_v5 = vmax.f32 %v623_v60, 0.0  ;;  %v653_v6 = vmax.f32 %v642_v61, 0.0 }
 0x100   : > { %v659_v13 = vpack.c.bf16 %v653_v6, %v651_v11 }
 0x105   : > { %v626_v62 = vpop.f32.mrf.mxu0  ;;  %v645_v63 = vpop.f32.mrf.mxu1 }
 0x106   : > { %v654_v1 = vmax.f32 %v626_v62, 0.0  ;;  %v655_v2 = vmax.f32 %v645_v63, 0.0 }
 0x108   : > { %1368 = vmatmul.msk.bf16.gmra.mxu0 %vm262_vm1, %v1506_v15  ;;  %1370 = vmatmul.msk.bf16.gmra.mxu1 %vm262_vm1, %v1506_v15  ;;  %v658_v15 = vpack.c.bf16 %v652_v5, %v650_v10 }
 0x109   : > { %1327 = vmatmul.msk.bf16.gmra.mxu2 %vm336_vm2, %v1575_v16  ;;  %1329 = vmatmul.msk.bf16.gmra.mxu3 %vm336_vm2, %v1575_v16 }
 0x10d   : > { %v628_v12 = vpop.f32.mrf.mxu0  ;;  %v647_v0 = vpop.f32.mrf.mxu1 }
 0x10e   : > { %v656_v3 = vmax.f32 %v628_v12, 0.0  ;;  %v657_v4 = vmax.f32 %v647_v0, 0.0 }
 0x110   : > { %v660_v7 = vpack.c.bf16 %v656_v3, %v654_v1  ;;  %v661_v8 = vpack.c.bf16 %v657_v4, %v655_v2 }
 0x112   : > { %668 = vmatpush.bf16.msrb.mxu2 %v660_v7  ;;  %687 = vmatpush.bf16.msrb.mxu3 %v661_v8 }
 0x115   : > { %v730_v14 = vpop.f32.mrf.mxu0  ;;  %v749_v17 = vpop.f32.mrf.mxu1 }
 0x116   : > { %669 = vmatpush.bf16.msrb.mxu2 %v658_v15  ;;  %688 = vmatpush.bf16.msrb.mxu3 %v659_v13  ;;  %v759_v32 = vmax.f32 %v730_v14, 0.0  ;;  %v760_v33 = vmax.f32 %v749_v17, 0.0 }
 0x119   : > { %1335 = vmatmul.msk.bf16.vlgmr.msrb.gmra.mxu2 %vm336_vm2, %v1562_v9  ;;  %1337 = vmatmul.msk.bf16.vlgmr.msrb.gmra.mxu3 %vm336_vm2, %v1562_v9 }
 0x11d   : > { %v732_v18 = vpop.f32.mrf.mxu0  ;;  %v751_v19 = vpop.f32.mrf.mxu1 }
 0x11e   : > { %v761_v28 = vmax.f32 %v732_v18, 0.0  ;;  %v762_v29 = vmax.f32 %v751_v19, 0.0 }
 0x120   : > { %v767_v34 = vpack.c.bf16 %v761_v28, %v759_v32  ;;  %v768_v35 = vpack.c.bf16 %v762_v29, %v760_v33 }
 0x125   : > { %v735_v20 = vpop.f32.mrf.mxu0  ;;  %v754_v21 = vpop.f32.mrf.mxu1 }
 0x126   : > { %v763_v24 = vmax.f32 %v735_v20, 0.0  ;;  %v764_v25 = vmax.f32 %v754_v21, 0.0 }
 0x129   : > { %1336 = vmatmul.msk.bf16.gmra.mxu2 %vm336_vm2, %v1575_v16  ;;  %1338 = vmatmul.msk.bf16.gmra.mxu3 %vm336_vm2, %v1575_v16 }
 0x12d   : > { %v737_v22 = vpop.f32.mrf.mxu0  ;;  %v756_v23 = vpop.f32.mrf.mxu1 }
 0x12e   : > { %v765_v26 = vmax.f32 %v737_v22, 0.0  ;;  %v766_v27 = vmax.f32 %v756_v23, 0.0 }
 0x130   : > { %v769_v30 = vpack.c.bf16 %v765_v26, %v763_v24  ;;  %v770_v31 = vpack.c.bf16 %v766_v27, %v764_v25 }
 0x132   : > { %777 = vmatpush.bf16.msra.mxu2 %v769_v30  ;;  %796 = vmatpush.bf16.msra.mxu3 %v770_v31 }
 0x135   : > { %v839_v36 = vpop.f32.mrf.mxu0  ;;  %v858_v37 = vpop.f32.mrf.mxu1 }
 0x136   : > { %778 = vmatpush.bf16.msra.mxu2 %v767_v34  ;;  %797 = vmatpush.bf16.msra.mxu3 %v768_v35  ;;  %v868_v58 = vmax.f32 %v839_v36, 0.0  ;;  %v869_v59 = vmax.f32 %v858_v37, 0.0 }
 0x139   : > { %1344 = vmatmul.msk.bf16.vlgmr.msra.gmra.mxu2 %vm336_vm2, %v1562_v9  ;;  %1346 = vmatmul.msk.bf16.vlgmr.msra.gmra.mxu3 %vm336_vm2, %v1562_v9 }
 0x13c   : > { %v1632_v38 = vpop.f32.mrf.mxu2  ;;  %v1634_v39 = vpop.f32.mrf.mxu3 }
 0x13d   : > { %v841_v40 = vpop.f32.mrf.mxu0  ;;  %v860_v41 = vpop.f32.mrf.mxu1 }
 0x13e   : > { %v870_v54 = vmax.f32 %v841_v40, 0.0  ;;  %v871_v55 = vmax.f32 %v860_v41, 0.0 }
 0x140   : > { %v876_v60 = vpack.c.bf16 %v870_v54, %v868_v58  ;;  %v877_v61 = vpack.c.bf16 %v871_v55, %v869_v59 }
 0x144   : > { %v1636_v42 = vpop.f32.mrf.mxu2  ;;  %v1638_v43 = vpop.f32.mrf.mxu3 }
 0x145   : > { %v844_v44 = vpop.f32.mrf.mxu0  ;;  %v863_v45 = vpop.f32.mrf.mxu1 }
 0x146   : > { %v872_v50 = vmax.f32 %v844_v44, 0.0  ;;  %v873_v51 = vmax.f32 %v863_v45, 0.0 }
 0x149   : > { %1345 = vmatmul.msk.bf16.gmra.mxu2 %vm336_vm2, %v1575_v16  ;;  %1347 = vmatmul.msk.bf16.gmra.mxu3 %vm336_vm2, %v1575_v16 }
 0x14c   : > { %v1644_v46 = vpop.f32.mrf.mxu2  ;;  %v1646_v47 = vpop.f32.mrf.mxu3 }
 0x14d   : > { %v846_v48 = vpop.f32.mrf.mxu0  ;;  %v865_v49 = vpop.f32.mrf.mxu1 }
 0x14e   : > { %v874_v52 = vmax.f32 %v846_v48, 0.0  ;;  %v875_v53 = vmax.f32 %v865_v49, 0.0 }
 0x150   : > { %v878_v56 = vpack.c.bf16 %v874_v52, %v872_v50  ;;  %v879_v57 = vpack.c.bf16 %v875_v53, %v873_v51  ;;  %v1144_v52 = vld [vmem:[%s1741_s3] sm:$0xff]  ;;  %v1434_v53 = vmov 0  }
 0x151   : > { %1408 = vset.pattern.permute.xlu0 %v1434_v53  ;;  %1409 = vset.pattern.permute.xlu1 %v1434_v53 }
 0x152   : > { %886 = vmatpush.bf16.msrb.mxu2 %v878_v56  ;;  %905 = vmatpush.bf16.msrb.mxu3 %v879_v57 }
 0x153   : > { %1150 = vperm.xlu0 %1408, %v1144_v52  }
 0x154   : > { %v1648_v62 = vpop.f32.mrf.mxu2  ;;  %v1650_v63 = vpop.f32.mrf.mxu3 }
 0x155   : > { %v948_v12 = vpop.f32.mrf.mxu0  ;;  %v967_v0 = vpop.f32.mrf.mxu1 }
 0x156   : > { %887 = vmatpush.bf16.msrb.mxu2 %v876_v60  ;;  %906 = vmatpush.bf16.msrb.mxu3 %v877_v61  ;;  %v977_v30 = vmax.f32 %v948_v12, 0.0  ;;  %v978_v31 = vmax.f32 %v967_v0, 0.0 }
 0x159   : > { %1353 = vmatmul.msk.bf16.vlgmr.msrb.gmra.mxu2 %vm336_vm2, %v1562_v9  ;;  %1355 = vmatmul.msk.bf16.vlgmr.msrb.gmra.mxu3 %vm336_vm2, %v1562_v9 }
 0x15c   : > { %v453_v1 = vpop.f32.mrf.mxu2  ;;  %v472_v2 = vpop.f32.mrf.mxu3 }
 0x15d   : > { %v482_v3 = vmax.f32 %v1632_v38, %v453_v1  ;;  %v483_v4 = vmax.f32 %v1634_v39, %v472_v2  ;;  %v950_v5 = vpop.f32.mrf.mxu0  ;;  %v969_v6 = vpop.f32.mrf.mxu1 }
 0x15e   : > { %v979_v26 = vmax.f32 %v950_v5, 0.0  ;;  %v980_v27 = vmax.f32 %v969_v6, 0.0  ;;  %v1146_v6 = vld [vmem:[%s1741_s3 + $0x10] sm:$0xff] }
 0x15f   : > { %1160 = vperm.xlu1 %1409, %v1146_v6  }
 0x160   : > { %v985_v32 = vpack.c.bf16 %v979_v26, %v977_v30  ;;  %v986_v33 = vpack.c.bf16 %v980_v27, %v978_v31 }
 0x164   : > { %v455_v7 = vpop.f32.mrf.mxu2  ;;  %v474_v8 = vpop.f32.mrf.mxu3 }
 0x165   : > { %v484_v10 = vmax.f32 %v1636_v42, %v455_v7  ;;  %v485_v11 = vmax.f32 %v1638_v43, %v474_v8  ;;  %v953_v15 = vpop.f32.mrf.mxu0  ;;  %v972_v13 = vpop.f32.mrf.mxu1 }
 0x166   : > { %v981_v22 = vmax.f32 %v953_v15, 0.0  ;;  %v982_v23 = vmax.f32 %v972_v13, 0.0 }
 0x169   : > { %1354 = vmatmul.msk.bf16.gmra.mxu2 %vm336_vm2, %v1575_v16  ;;  %1356 = vmatmul.msk.bf16.gmra.mxu3 %vm336_vm2, %v1575_v16 }
 0x16c   : > { %v458_v14 = vpop.f32.mrf.mxu2  ;;  %v477_v17 = vpop.f32.mrf.mxu3 }
 0x16d   : > { %v486_v18 = vmax.f32 %v1644_v46, %v458_v14  ;;  %v487_v19 = vmax.f32 %v1646_v47, %v477_v17  ;;  %v955_v20 = vpop.f32.mrf.mxu0  ;;  %v974_v21 = vpop.f32.mrf.mxu1  ;;  %v1147_v14 = vld [vmem:[%s1741_s3 + $0x18] sm:$0xff] }
 0x16e   : > { %v983_v24 = vmax.f32 %v955_v20, 0.0  ;;  %v984_v25 = vmax.f32 %v974_v21, 0.0  ;;  %1165 = vperm.xlu1 %1409, %v1147_v14  }
 0x170   : > { %v987_v28 = vpack.c.bf16 %v983_v24, %v981_v22  ;;  %v988_v29 = vpack.c.bf16 %v984_v25, %v982_v23 }
 0x172   : > { %995 = vmatpush.bf16.msra.mxu2 %v987_v28  ;;  %1014 = vmatpush.bf16.msra.mxu3 %v988_v29 }
 0x174   : > { %v460_v34 = vpop.f32.mrf.mxu2  ;;  %v479_v35 = vpop.f32.mrf.mxu3 }
 0x175   : > { %v488_v36 = vmax.f32 %v1648_v62, %v460_v34  ;;  %v489_v37 = vmax.f32 %v1650_v63, %v479_v35  ;;  %v1057_v38 = vpop.f32.mrf.mxu0  ;;  %v1076_v39 = vpop.f32.mrf.mxu1 }
 0x176   : > { %996 = vmatpush.bf16.msra.mxu2 %v985_v32  ;;  %1015 = vmatpush.bf16.msra.mxu3 %v986_v33  ;;  %v1087_v5 = vmax.f32 %v1076_v39, 0.0 }
 0x179   : > { %1362 = vmatmul.msk.bf16.vlgmr.msra.gmra.mxu2 %vm336_vm2, %v1562_v9  ;;  %1364 = vmatmul.msk.bf16.vlgmr.msra.gmra.mxu3 %vm336_vm2, %v1562_v9 }
 0x17c   : > { %v562_v40 = vpop.f32.mrf.mxu2  ;;  %v581_v41 = vpop.f32.mrf.mxu3 }
 0x17d   : > { %v1672_v42 = vmax.f32 %v482_v3, %v562_v40  ;;  %v1674_v43 = vmax.f32 %v483_v4, %v581_v41  ;;  %v1059_v44 = vpop.f32.mrf.mxu0  ;;  %v1078_v45 = vpop.f32.mrf.mxu1  ;;  %v1145_v3 = vld [vmem:[%s1741_s3 + $0x8] sm:$0xff]  ;;  %v1086_v4 = vmax.f32 %v1057_v38, 0.0 }
 0x17e   : > { %v1088_v12 = vmax.f32 %v1059_v44, 0.0  ;;  %v1089_v0 = vmax.f32 %v1078_v45, 0.0  ;;  %1155 = vperm.xlu0 %1408, %v1145_v3  }
 0x180   : > { %v1094_v7 = vpack.c.bf16 %v1088_v12, %v1086_v4  ;;  %v1095_v8 = vpack.c.bf16 %v1089_v0, %v1087_v5 }
 0x184   : > { %v564_v46 = vpop.f32.mrf.mxu2  ;;  %v583_v47 = vpop.f32.mrf.mxu3 }
 0x185   : > { %v1676_v48 = vmax.f32 %v484_v10, %v564_v46  ;;  %v1678_v49 = vmax.f32 %v485_v11, %v583_v47  ;;  %v1062_v50 = vpop.f32.mrf.mxu0  ;;  %v1081_v51 = vpop.f32.mrf.mxu1 }
 0x186   : > { %v1090_v60 = vmax.f32 %v1062_v50, 0.0  ;;  %v1091_v61 = vmax.f32 %v1081_v51, 0.0 }
 0x189   : > { %1363 = vmatmul.msk.bf16.gmra.mxu2 %vm336_vm2, %v1575_v16  ;;  %1365 = vmatmul.msk.bf16.gmra.mxu3 %vm336_vm2, %v1575_v16 }
 0x18c   : > { %v567_v54 = vpop.f32.mrf.mxu2  ;;  %v586_v55 = vpop.f32.mrf.mxu3 }
 0x18d   : > { %v595_v56 = vmax.f32 %v486_v18, %v567_v54  ;;  %v596_v57 = vmax.f32 %v487_v19, %v586_v55  ;;  %v1064_v58 = vpop.f32.mrf.mxu0  ;;  %v1083_v59 = vpop.f32.mrf.mxu1 }
 0x18e   : > { %v1092_v62 = vmax.f32 %v1064_v58, 0.0  ;;  %v1093_v63 = vmax.f32 %v1083_v59, 0.0 }
 0x190   : > { %v1096_v1 = vpack.c.bf16 %v1092_v62, %v1090_v60  ;;  %v1097_v2 = vpack.c.bf16 %v1093_v63, %v1091_v61 }
 0x192   : > { %1104 = vmatpush.bf16.msrb.mxu2 %v1096_v1  ;;  %1123 = vmatpush.bf16.msrb.mxu3 %v1097_v2 }
 0x194   : > { %v569_v10 = vpop.f32.mrf.mxu2  ;;  %v588_v11 = vpop.f32.mrf.mxu3 }
 0x195   : > { %v597_v15 = vmax.f32 %v488_v36, %v569_v10  ;;  %v598_v13 = vmax.f32 %v489_v37, %v588_v11 }
 0x196   : > { %1105 = vmatpush.bf16.msrb.mxu2 %v1094_v7  ;;  %1124 = vmatpush.bf16.msrb.mxu3 %v1095_v8 }
 0x199   : > { %1371 = vmatmul.msk.bf16.vlgmr.msrb.gmra.mxu2 %vm336_vm2, %v1562_v9  ;;  %1373 = vmatmul.msk.bf16.vlgmr.msrb.gmra.mxu3 %vm336_vm2, %v1562_v9 }
 0x19c   : > { %v671_v17 = vpop.f32.mrf.mxu2  ;;  %v690_v18 = vpop.f32.mrf.mxu3 }
 0x19d   : > { %v700_v19 = vmax.f32 %v1672_v42, %v671_v17  ;;  %v701_v20 = vmax.f32 %v1674_v43, %v690_v18 }
 0x1a4   : > { %v673_v21 = vpop.f32.mrf.mxu2  ;;  %v692_v22 = vpop.f32.mrf.mxu3 }
 0x1a5   : > { %v702_v23 = vmax.f32 %v1676_v48, %v673_v21  ;;  %v703_v24 = vmax.f32 %v1678_v49, %v692_v22 }
 0x1a9   : > { %1372 = vmatmul.msk.bf16.gmra.mxu2 %vm336_vm2, %v1575_v16  ;;  %1374 = vmatmul.msk.bf16.gmra.mxu3 %vm336_vm2, %v1575_v16 }
 0x1ac   : > { %v676_v9 = vpop.f32.mrf.mxu2  ;;  %v695_v25 = vpop.f32.mrf.mxu3 }
 0x1ad   : > { %v704_v26 = vmax.f32 %v595_v56, %v676_v9  ;;  %v705_v27 = vmax.f32 %v596_v57, %v695_v25 }
 0x1b4   : > { %v678_v28 = vpop.f32.mrf.mxu2  ;;  %v697_v29 = vpop.f32.mrf.mxu3 }
 0x1b5   : > { %v706_v30 = vmax.f32 %v597_v15, %v678_v28  ;;  %v707_v31 = vmax.f32 %v598_v13, %v697_v29 }
 0x1bc   : > { %v780_v32 = vpop.f32.mrf.mxu2  ;;  %v799_v33 = vpop.f32.mrf.mxu3 }
 0x1bd   : > { %v809_v34 = vmax.f32 %v700_v19, %v780_v32  ;;  %v810_v35 = vmax.f32 %v701_v20, %v799_v33 }
 0x1c4   : > { %v782_v36 = vpop.f32.mrf.mxu2  ;;  %v801_v37 = vpop.f32.mrf.mxu3 }
 0x1c5   : > { %v811_v38 = vmax.f32 %v702_v23, %v782_v36  ;;  %v812_v39 = vmax.f32 %v703_v24, %v801_v37  ;;  %v1151_v0 = vpop.permute.xlu0 %1150 }
 0x1cc   : > { %v785_v40 = vpop.f32.mrf.mxu2  ;;  %v804_v41 = vpop.f32.mrf.mxu3 }
 0x1cd   : > { %v813_v42 = vmax.f32 %v704_v26, %v785_v40  ;;  %v814_v16 = vmax.f32 %v705_v27, %v804_v41 }
 0x1d4   : > { %v787_v43 = vpop.f32.mrf.mxu2  ;;  %v806_v44 = vpop.f32.mrf.mxu3 }
 0x1d5   : > { %v1708_v45 = vmax.f32 %v706_v30, %v787_v43  ;;  %v1710_v46 = vmax.f32 %v707_v31, %v806_v44  ;;  %v1161_v30 = vpop.permute.xlu1 %1160 }
 0x1dc   : > { %v889_v47 = vpop.f32.mrf.mxu2  ;;  %v908_v48 = vpop.f32.mrf.mxu3 }
 0x1dd   : > { %v918_v63 = vmax.f32 %v809_v34, %v889_v47  ;;  %v919_v12 = vmax.f32 %v810_v35, %v908_v48 }
 0x1e0   : > { %v1166_v48 = vpop.permute.xlu1 %1165 }
 0x1e4   : > { %v891_v49 = vpop.f32.mrf.mxu2  ;;  %v910_v50 = vpop.f32.mrf.mxu3 }
 0x1e5   : > { %v920_v10 = vmax.f32 %v811_v38, %v891_v49  ;;  %v921_v11 = vmax.f32 %v812_v39, %v910_v50 }
 0x1ec   : > { %v894_v51 = vpop.f32.mrf.mxu2  ;;  %v913_v52 = vpop.f32.mrf.mxu3 }
 0x1ed   : > { %v922_v9 = vmax.f32 %v813_v42, %v894_v51  ;;  %v923_v25 = vmax.f32 %v814_v16, %v913_v52 }
 0x1f0   : > { %v1156_v18 = vpop.permute.xlu0 %1155 }
 0x1f4   : > { %v896_v53 = vpop.f32.mrf.mxu2  ;;  %v915_v54 = vpop.f32.mrf.mxu3 }
 0x1f5   : > { %v924_v37 = vmax.f32 %v1708_v45, %v896_v53  ;;  %v925_v38 = vmax.f32 %v1710_v46, %v915_v54 }
 0x1fc   : > { %v998_v55 = vpop.f32.mrf.mxu2  ;;  %v1017_v56 = vpop.f32.mrf.mxu3 }
 0x1fd   : > { %v1027_v1 = vmax.f32 %v918_v63, %v998_v55  ;;  %v1028_v2 = vmax.f32 %v919_v12, %v1017_v56 }
 0x204   : > { %v1000_v57 = vpop.f32.mrf.mxu2  ;;  %v1019_v58 = vpop.f32.mrf.mxu3 }
 0x205   : > { %v1029_v14 = vmax.f32 %v920_v10, %v1000_v57  ;;  %v1030_v17 = vmax.f32 %v921_v11, %v1019_v58 }
 0x20c   : > { %v1003_v59 = vpop.f32.mrf.mxu2  ;;  %v1022_v60 = vpop.f32.mrf.mxu3 }
 0x20d   : > { %v1031_v28 = vmax.f32 %v922_v9, %v1003_v59  ;;  %v1032_v29 = vmax.f32 %v923_v25, %v1022_v60 }
 0x214   : > { %v1005_v61 = vpop.f32.mrf.mxu2  ;;  %v1024_v62 = vpop.f32.mrf.mxu3 }
 0x215   : > { %v1033_v41 = vmax.f32 %v924_v37, %v1005_v61  ;;  %v1034_v42 = vmax.f32 %v925_v38, %v1024_v62 }
 0x21c   : > { %v1107_v3 = vpop.f32.mrf.mxu2  ;;  %v1126_v4 = vpop.f32.mrf.mxu3 }
 0x21d   : > { %v1136_v5 = vmax.f32 %v1027_v1, %v1107_v3  ;;  %v1137_v6 = vmax.f32 %v1028_v2, %v1126_v4 }
 0x21f   : > { %v1168_v7 = vadd.f32 %v1151_v0, %v1136_v5  ;;  %v1169_v8 = vadd.f32 %v1151_v0, %v1137_v6 }
 0x221   : > { %v1176_v15 = vmax.f32 %v1168_v7, 0.0  ;;  %v1177_v13 = vmax.f32 %v1169_v8, 0.0 }
 0x223   : > { %1184 = vst [vmem:[%s1717_s20] sm:$0xff] %v1176_v15 }
 0x224   : > { %1185 = vst [vmem:[%s1717_s20 + $0x8] sm:$0xff] %v1177_v13  ;;  %v1109_v19 = vpop.f32.mrf.mxu2  ;;  %v1128_v20 = vpop.f32.mrf.mxu3 }
 0x225   : > { %v1138_v21 = vmax.f32 %v1029_v14, %v1109_v19  ;;  %v1139_v22 = vmax.f32 %v1030_v17, %v1128_v20 }
 0x227   : > { %v1170_v23 = vadd.f32 %v1156_v18, %v1138_v21  ;;  %v1171_v24 = vadd.f32 %v1156_v18, %v1139_v22 }
 0x229   : > { %v1178_v26 = vmax.f32 %v1170_v23, 0.0  ;;  %v1179_v27 = vmax.f32 %v1171_v24, 0.0 }
 0x22b   : > { %1186 = vst [vmem:[%s1717_s20 + $0x10] sm:$0xff] %v1178_v26 }
 0x22c   : > { %1187 = vst [vmem:[%s1717_s20 + $0x18] sm:$0xff] %v1179_v27  ;;  %v1112_v31 = vpop.f32.mrf.mxu2  ;;  %v1131_v32 = vpop.f32.mrf.mxu3 }
 0x22d   : > { %v1140_v33 = vmax.f32 %v1031_v28, %v1112_v31  ;;  %v1141_v34 = vmax.f32 %v1032_v29, %v1131_v32 }
 0x22f   : > { %v1172_v35 = vadd.f32 %v1161_v30, %v1140_v33  ;;  %v1173_v36 = vadd.f32 %v1161_v30, %v1141_v34 }
 0x231   : > { %v1180_v39 = vmax.f32 %v1172_v35, 0.0  ;;  %v1181_v40 = vmax.f32 %v1173_v36, 0.0 }
 0x233   : > { %1188 = vst [vmem:[%s1717_s20 + $0x20] sm:$0xff] %v1180_v39 }
 0x234   : > { %1189 = vst [vmem:[%s1717_s20 + $0x28] sm:$0xff] %v1181_v40  ;;  %v1114_v16 = vpop.f32.mrf.mxu2  ;;  %v1133_v43 = vpop.f32.mrf.mxu3 }
 0x235   : > { %v1142_v44 = vmax.f32 %v1033_v41, %v1114_v16  ;;  %v1143_v47 = vmax.f32 %v1034_v42, %v1133_v43 }
 0x237   : > { %v1174_v49 = vadd.f32 %v1166_v48, %v1142_v44  ;;  %v1175_v50 = vadd.f32 %v1166_v48, %v1143_v47 }
 0x239   : > { %v1182_v51 = vmax.f32 %v1174_v49, 0.0  ;;  %v1183_v52 = vmax.f32 %v1175_v50, 0.0 }
 0x23b   : > { %1190 = vst [vmem:[%s1717_s20 + $0x30] sm:$0xff] %v1182_v51 }
 0x23c   : > { %1191 = vst [vmem:[%s1717_s20 + $0x38] sm:$0xff] %v1183_v52 }
 0x23d PF: > { %s14_s17 = sadd.s32 1, %s1432_s17   ;;  %s1743_s15 = smov %s1428_s16 }
 0x23e   : > { %p11_p5 = scmp.ge.s32.totalorder %s14_s17, 4   ;;  %s1744_s16 = smov %s1746_s18 }
 0x240   :  { %13 = sbr.rel (!%p11_p5) target bundleno = 2 (0x2), region = 73 }

// kernel: _lambda_.2
= control target key start
LH: loop header
LB: loop body
LE: loop exit
PB: predicated region body
PF: predicated region fallthrough
CT: control target
= control target key end

     0   :  { %s2997_s15 = smov 0   ;;  %s2999_s16 = smov 0   ;;  %s4444_s0 = inlined_call_operand.vmem [shape: bf16[2,16,8,256], index: 0, kind: input, shape index: {}]   ;;  %s4445_s1 = inlined_call_operand.vmem [shape: bf16[32,8], index: 1, kind: input, shape index: {}]   ;;  %s4446_s2 = inlined_call_operand.vmem [shape: bf16[64,32], index: 2, kind: input, shape index: {}]   ;;  %s4447_s3 = inlined_call_operand.vmem [shape: f32[64,1], index: 3, kind: input, shape index: {}]   ;;  %s4448_s4 = inlined_call_operand.vmem [shape: f32[2,64,256], index: 4, kind: output, shape index: {}]  }
   0x1   :  { %s3001_s17 = smov 0  }
   0x2 LB: > { %s26_s18 = sadd.s32 1, %s2965_s16  ;;  %p2663_p0 = scmp.ge.s32.totalorder %s2969_s17, 1  ;;  %s2969_s17 = sphi %s3001_s17, %s14_s17   ;;  %s2965_s16 = sphi %s2999_s16, %s4667_s16   ;;  %s2961_s15 = sphi %s2997_s15, %s4666_s15  }
   0x3   : > { %p28_p1 = scmp.ge.s32.totalorder %s26_s18, 2  ;;  %p183_p2 = scmp.lt.s32.totalorder %s2969_s17, 3 }
   0x5   : > { %s4669_s18 = smov (%p28_p1, %s26_s18), 0  ;;  %p184_p3 = pnand %p2663_p0, %p183_p2 }
   0x7   : > { %187 = sbr.rel (%p184_p3) target bundleno = 2008 (0x7d8), region = 36 }
   0xc   : > { %p218_p4 = scmp.lt.s32.totalorder %s2961_s15, 1  ;;  %vm273_vm0 = vcmask 1043456   ;;  %v3032_v12 = vld [vmem:[%s4445_s1] sm:$0xff]  ;;  %vm266_vm1 = vcmask 64512   ;;  %v3047_v15 = vld [vmem:[%s4445_s1 + $0x8] sm:$0xff]  ;;  %vm350_vm2 = vcmask 261120  }
   0xd   : > { %v3061_v59 = vld [vmem:[%s4446_s2] sm:$0xff] }
   0xe   : > { %s4671_s15 = smov (!%p218_p4, %s2961_s15), 1 }
   0xf   : > { %s2901_s19 = sshll.u32 %s4671_s15, 7 }
  0x10   : > { %s3023_s22 = scalar_lea.vmem %s4444_s0, %s2901_s19  ;;  %s4375_s5 = scalar_lea.vmem %s4448_s4, %s2901_s19 }
  0x11   : > { %v250_v0 = vld [vmem:[%s3023_s22] sm:$0xff]  ;;  %v2704_v1 = vld [vmem:[%s3023_s22 + $0x8] sm:$0xff]  ;;  %v2717_v38 = vld [vmem:[%s3023_s22 + $0x10] sm:$0xff] }
  0x12   : > { %v262_v2 = vunpack.c.l.b16 %v250_v0  ;;  %v263_v3 = vunpack.c.h.b16 %v250_v0  ;;  %v424_v4 = vunpack.c.l.b16 %v2704_v1  ;;  %v425_v5 = vunpack.c.h.b16 %v2704_v1  ;;  %v3076_v0 = vld [vmem:[%s4446_s2 + $0x8] sm:$0xff]  ;;  %v3089_v1 = vld [vmem:[%s4446_s2 + $0x10] sm:$0xff] }
  0x13   : > { %v561_v41 = vunpack.c.l.b16 %v2717_v38  ;;  %v562_v42 = vunpack.c.h.b16 %v2717_v38 }
  0x14   : > { %v264_v6 = vpack.c.b16 %v262_v2, %v262_v2  ;;  %v265_v7 = vpack.c.b16 %v263_v3, %v263_v3  ;;  %v426_v8 = vpack.c.b16 %v424_v4, %v424_v4  ;;  %v427_v9 = vpack.c.b16 %v425_v5, %v425_v5  ;;  %v2730_v2 = vld [vmem:[%s3023_s22 + $0x18] sm:$0xff] }
  0x15   : > { %v563_v55 = vpack.c.b16 %v561_v41, %v561_v41  ;;  %v564_v56 = vpack.c.b16 %v562_v42, %v562_v42  ;;  %v698_v3 = vunpack.c.l.b16 %v2730_v2  ;;  %v699_v4 = vunpack.c.h.b16 %v2730_v2 }
  0x16   : > { %v275_v10 = vsel %vm273_vm0, %v264_v6, 0  ;;  %v278_v11 = vsel %vm273_vm0, %v265_v7, 0  ;;  %v429_v13 = vsel %vm273_vm0, %v426_v8, 0  ;;  %v432_v14 = vsel %vm273_vm0, %v427_v9, 0  ;;  %v3105_v9 = vld [vmem:[%s4446_s2 + $0x18] sm:$0xff] }
  0x17   : > { %287 = vmatpush.bf16.msra.mxu2 %v275_v10  ;;  %306 = vmatpush.bf16.msra.mxu3 %v278_v11  ;;  %v566_v62 = vsel %vm273_vm0, %v563_v55, 0  ;;  %v569_v63 = vsel %vm273_vm0, %v564_v56, 0  ;;  %v700_v5 = vpack.c.b16 %v698_v3, %v698_v3  ;;  %v701_v6 = vpack.c.b16 %v699_v4, %v699_v4 }
  0x18   : > { %441 = vmatpush.bf16.msra.mxu0 %v429_v13  ;;  %460 = vmatpush.bf16.msra.mxu1 %v432_v14 }
  0x19   : > { %v703_v7 = vsel %vm273_vm0, %v700_v5, 0  ;;  %v706_v8 = vsel %vm273_vm0, %v701_v6, 0 }
  0x1a   : > { %2676 = vmatmul.msk.bf16.vlgmr.msra.gmra.mxu2 %vm266_vm1, %v3032_v12  ;;  %2678 = vmatmul.msk.bf16.vlgmr.msra.gmra.mxu3 %vm266_vm1, %v3032_v12 }
  0x1b   : > { %2705 = vmatmul.msk.bf16.vlgmr.msra.gmra.mxu0 %vm266_vm1, %v3032_v12  ;;  %2707 = vmatmul.msk.bf16.vlgmr.msra.gmra.mxu1 %vm266_vm1, %v3032_v12 }
  0x2a   : > { %2677 = vmatmul.msk.bf16.gmra.mxu2 %vm266_vm1, %v3047_v15  ;;  %2679 = vmatmul.msk.bf16.gmra.mxu3 %vm266_vm1, %v3047_v15 }
  0x2b   : > { %2706 = vmatmul.msk.bf16.gmra.mxu0 %vm266_vm1, %v3047_v15  ;;  %2708 = vmatmul.msk.bf16.gmra.mxu1 %vm266_vm1, %v3047_v15 }
  0x98   : > { %v443_v16 = vpop.f32.mrf.mxu0  ;;  %v462_v17 = vpop.f32.mrf.mxu1 }
  0x99   : > { %v472_v30 = vmax.f32 %v443_v16, 0.0  ;;  %v473_v31 = vmax.f32 %v462_v17, 0.0 }
  0x9d   : > { %v289_v18 = vpop.f32.mrf.mxu2  ;;  %v308_v19 = vpop.f32.mrf.mxu3 }
  0x9e   : > { %v318_v57 = vmax.f32 %v289_v18, 0.0  ;;  %v319_v58 = vmax.f32 %v308_v19, 0.0 }
  0xa0   : > { %v445_v20 = vpop.f32.mrf.mxu0  ;;  %v464_v21 = vpop.f32.mrf.mxu1 }
  0xa1   : > { %v474_v34 = vmax.f32 %v445_v20, 0.0  ;;  %v475_v35 = vmax.f32 %v464_v21, 0.0 }
  0xa3   : > { %v480_v45 = vpack.c.bf16 %v474_v34, %v472_v30  ;;  %v481_v46 = vpack.c.bf16 %v475_v35, %v473_v31 }
  0xa5   : > { %v291_v22 = vpop.f32.mrf.mxu2  ;;  %v310_v23 = vpop.f32.mrf.mxu3 }
  0xa6   : > { %v320_v51 = vmax.f32 %v291_v22, 0.0  ;;  %v321_v52 = vmax.f32 %v310_v23, 0.0 }
  0xa8   : > { %v448_v24 = vpop.f32.mrf.mxu0  ;;  %v467_v25 = vpop.f32.mrf.mxu1  ;;  %v326_v60 = vpack.c.bf16 %v320_v51, %v318_v57  ;;  %v327_v61 = vpack.c.bf16 %v321_v52, %v319_v58 }
  0xa9   : > { %v476_v28 = vmax.f32 %v448_v24, 0.0  ;;  %v477_v29 = vmax.f32 %v467_v25, 0.0 }
  0xad   : > { %v294_v26 = vpop.f32.mrf.mxu2  ;;  %v313_v27 = vpop.f32.mrf.mxu3 }
  0xae   : > { %v322_v47 = vmax.f32 %v294_v26, 0.0  ;;  %v323_v48 = vmax.f32 %v313_v27, 0.0 }
  0xb0   : > { %v450_v32 = vpop.f32.mrf.mxu0  ;;  %v469_v33 = vpop.f32.mrf.mxu1 }
  0xb1   : > { %v478_v36 = vmax.f32 %v450_v32, 0.0  ;;  %v479_v37 = vmax.f32 %v469_v33, 0.0 }
  0xb3   : > { %v482_v39 = vpack.c.bf16 %v478_v36, %v476_v28  ;;  %v483_v40 = vpack.c.bf16 %v479_v37, %v477_v29 }
  0xb5   : > { %v296_v43 = vpop.f32.mrf.mxu2  ;;  %v315_v44 = vpop.f32.mrf.mxu3  ;;  %490 = vmatpush.bf16.msrb.mxu0 %v482_v39  ;;  %519 = vmatpush.bf16.msrb.mxu1 %v483_v40 }
  0xb6   : > { %v324_v49 = vmax.f32 %v296_v43, 0.0  ;;  %v325_v50 = vmax.f32 %v315_v44, 0.0 }
  0xb8   : > { %v328_v53 = vpack.c.bf16 %v324_v49, %v322_v47  ;;  %v329_v54 = vpack.c.bf16 %v325_v50, %v323_v48 }
  0xb9   : > { %491 = vmatpush.bf16.msrb.mxu0 %v480_v45  ;;  %520 = vmatpush.bf16.msrb.mxu1 %v481_v46 }
  0xba   : > { %369 = vmatpush.bf16.msrb.mxu2 %v328_v53  ;;  %398 = vmatpush.bf16.msrb.mxu3 %v329_v54 }
  0xbc   : > { %2709 = vmatmul.msk.bf16.vlgmr.msrb.gmra.mxu0 %vm350_vm2, %v3061_v59  ;;  %2713 = vmatmul.msk.bf16.vlgmr.msrb.gmra.mxu1 %vm350_vm2, %v3061_v59 }
  0xbd   : > { %715 = vmatpush.bf16.msra.mxu0 %v703_v7  ;;  %734 = vmatpush.bf16.msra.mxu1 %v706_v8 }
  0xbe   : > { %370 = vmatpush.bf16.msrb.mxu2 %v326_v60  ;;  %399 = vmatpush.bf16.msrb.mxu3 %v327_v61 }
  0xc1   : > { %2696 = vmatmul.msk.bf16.vlgmr.msrb.gmra.mxu2 %vm350_vm2, %v3061_v59  ;;  %2700 = vmatmul.msk.bf16.vlgmr.msrb.gmra.mxu3 %vm350_vm2, %v3061_v59 }
  0xc2   : > { %578 = vmatpush.bf16.msra.mxu2 %v566_v62  ;;  %597 = vmatpush.bf16.msra.mxu3 %v569_v63 }
  0xcc   : > { %2710 = vmatmul.msk.bf16.gmra.mxu0 %vm350_vm2, %v3076_v0  ;;  %2714 = vmatmul.msk.bf16.gmra.mxu1 %vm350_vm2, %v3076_v0 }
  0xd1   : > { %2697 = vmatmul.msk.bf16.gmra.mxu2 %vm350_vm2, %v3076_v0  ;;  %2701 = vmatmul.msk.bf16.gmra.mxu3 %vm350_vm2, %v3076_v0 }
  0xdc   : > { %2711 = vmatmul.msk.bf16.gmra.mxu0 %vm350_vm2, %v3089_v1  ;;  %2715 = vmatmul.msk.bf16.gmra.mxu1 %vm350_vm2, %v3089_v1 }
  0xe1   : > { %2698 = vmatmul.msk.bf16.gmra.mxu2 %vm350_vm2, %v3089_v1  ;;  %2702 = vmatmul.msk.bf16.gmra.mxu3 %vm350_vm2, %v3089_v1 }
  0xec   : > { %2712 = vmatmul.msk.bf16.gmra.mxu0 %vm350_vm2, %v3105_v9  ;;  %2716 = vmatmul.msk.bf16.gmra.mxu1 %vm350_vm2, %v3105_v9 }
  0xf1   : > { %2699 = vmatmul.msk.bf16.gmra.mxu2 %vm350_vm2, %v3105_v9  ;;  %2703 = vmatmul.msk.bf16.gmra.mxu3 %vm350_vm2, %v3105_v9 }
  0xfc   : > { %2731 = vmatmul.msk.bf16.vlgmr.msra.gmra.mxu0 %vm266_vm1, %v3032_v12  ;;  %2733 = vmatmul.msk.bf16.vlgmr.msra.gmra.mxu1 %vm266_vm1, %v3032_v12 }
 0x101   : > { %2718 = vmatmul.msk.bf16.vlgmr.msra.gmra.mxu2 %vm266_vm1, %v3032_v12  ;;  %2720 = vmatmul.msk.bf16.vlgmr.msra.gmra.mxu3 %vm266_vm1, %v3032_v12 }
 0x10c   : > { %2732 = vmatmul.msk.bf16.gmra.mxu0 %vm266_vm1, %v3047_v15  ;;  %2734 = vmatmul.msk.bf16.gmra.mxu1 %vm266_vm1, %v3047_v15 }
 0x111   : > { %2719 = vmatmul.msk.bf16.gmra.mxu2 %vm266_vm1, %v3047_v15  ;;  %2721 = vmatmul.msk.bf16.gmra.mxu3 %vm266_vm1, %v3047_v15 }
 0x139   : > { %v3131_v10 = vpop.f32.mrf.mxu0  ;;  %v3133_v11 = vpop.f32.mrf.mxu1 }
 0x141   : > { %v3135_v13 = vpop.f32.mrf.mxu0  ;;  %v3137_v14 = vpop.f32.mrf.mxu1 }
 0x144   : > { %v3139_v16 = vpop.f32.mrf.mxu2  ;;  %v3141_v17 = vpop.f32.mrf.mxu3 }
 0x149   : > { %v3147_v20 = vpop.f32.mrf.mxu0  ;;  %v3149_v21 = vpop.f32.mrf.mxu1 }
 0x14c   : > { %v3151_v22 = vpop.f32.mrf.mxu2  ;;  %v3153_v23 = vpop.f32.mrf.mxu3 }
 0x151   : > { %v3155_v24 = vpop.f32.mrf.mxu0  ;;  %v3157_v25 = vpop.f32.mrf.mxu1 }
 0x152   : > { %4453 = vst [vmem:[#allocation2_spill] sm:$0xff] %v3157_v25 }
 0x154   : > { %v3159_v26 = vpop.f32.mrf.mxu2  ;;  %v3161_v27 = vpop.f32.mrf.mxu3 }
 0x159   : > { %v3167_v30 = vpop.f32.mrf.mxu0  ;;  %v3169_v31 = vpop.f32.mrf.mxu1 }
 0x15c   : > { %v3171_v32 = vpop.f32.mrf.mxu2  ;;  %v3173_v33 = vpop.f32.mrf.mxu3 }
 0x15d   : > { %4454 = vst [vmem:[#allocation3_spill] sm:$0xff] %v3173_v33 }
 0x161   : > { %v3175_v34 = vpop.f32.mrf.mxu0  ;;  %v3177_v35 = vpop.f32.mrf.mxu1 }
 0x162   : > { %4455 = vst [vmem:[#allocation4_spill] sm:$0xff] %v3175_v34 }
 0x163   : > { %4456 = vst [vmem:[#allocation5_spill] sm:$0xff] %v3177_v35 }
 0x164   : > { %v3179_v36 = vpop.f32.mrf.mxu2  ;;  %v3181_v37 = vpop.f32.mrf.mxu3 }
 0x169   : > { %v3187_v40 = vpop.f32.mrf.mxu0  ;;  %v3189_v41 = vpop.f32.mrf.mxu1 }
 0x16c   : > { %v3191_v42 = vpop.f32.mrf.mxu2  ;;  %v3193_v43 = vpop.f32.mrf.mxu3 }
 0x16d   : > { %4457 = vst [vmem:[#allocation6_spill] sm:$0xff] %v3191_v42 }
 0x16e   : > { %4458 = vst [vmem:[#allocation7_spill] sm:$0xff] %v3193_v43 }
 0x171   : > { %v3195_v44 = vpop.f32.mrf.mxu0  ;;  %v3197_v45 = vpop.f32.mrf.mxu1 }
 0x172   : > { %4459 = vst [vmem:[#allocation8_spill] sm:$0xff] %v3195_v44 }
 0x173   : > { %4460 = vst [vmem:[#allocation9_spill] sm:$0xff] %v3197_v45 }
 0x174   : > { %v3199_v46 = vpop.f32.mrf.mxu2  ;;  %v3201_v47 = vpop.f32.mrf.mxu3 }
 0x179   : > { %v717_v50 = vpop.f32.mrf.mxu0  ;;  %v736_v51 = vpop.f32.mrf.mxu1 }
 0x17a   : > { %v746_v3 = vmax.f32 %v717_v50, 0.0  ;;  %v747_v4 = vmax.f32 %v736_v51, 0.0 }
 0x17c   : > { %v3207_v52 = vpop.f32.mrf.mxu2  ;;  %v3209_v53 = vpop.f32.mrf.mxu3 }
 0x17d   : > { %4461 = vst [vmem:[#allocation10_spill] sm:$0xff] %v3207_v52 }
 0x17e   : > { %4462 = vst [vmem:[#allocation11_spill] sm:$0xff] %v3209_v53  ;;  %v2743_v53 = vld [vmem:[%s3023_s22 + $0x20] sm:$0xff] }
 0x17f   : > { %v835_v50 = vunpack.c.l.b16 %v2743_v53 }
 0x181   : > { %v719_v54 = vpop.f32.mrf.mxu0  ;;  %v738_v55 = vpop.f32.mrf.mxu1 }
 0x182   : > { %v748_v7 = vmax.f32 %v719_v54, 0.0  ;;  %v749_v8 = vmax.f32 %v738_v55, 0.0 }
 0x184   : > { %v580_v56 = vpop.f32.mrf.mxu2  ;;  %v599_v57 = vpop.f32.mrf.mxu3  ;;  %v754_v19 = vpack.c.bf16 %v748_v7, %v746_v3  ;;  %v755_v18 = vpack.c.bf16 %v749_v8, %v747_v4 }
 0x189   : > { %v722_v58 = vpop.f32.mrf.mxu0  ;;  %v741_v60 = vpop.f32.mrf.mxu1 }
 0x18a   : > { %v750_v63 = vmax.f32 %v722_v58, 0.0  ;;  %v751_v2 = vmax.f32 %v741_v60, 0.0  ;;  %v836_v58 = vunpack.c.h.b16 %v2743_v53  ;;  %v610_v53 = vmax.f32 %v599_v57, 0.0 }
 0x18c   : > { %v582_v61 = vpop.f32.mrf.mxu2  ;;  %v601_v62 = vpop.f32.mrf.mxu3 }
 0x191   : > { %v724_v5 = vpop.f32.mrf.mxu0  ;;  %v743_v6 = vpop.f32.mrf.mxu1 }
 0x192   : > { %v752_v49 = vmax.f32 %v724_v5, 0.0  ;;  %v753_v48 = vmax.f32 %v743_v6, 0.0 }
 0x194   : > { %v585_v39 = vpop.f32.mrf.mxu2  ;;  %v604_v38 = vpop.f32.mrf.mxu3  ;;  %v756_v29 = vpack.c.bf16 %v752_v49, %v750_v63  ;;  %v757_v28 = vpack.c.bf16 %v753_v48, %v751_v2  ;;  %v611_v48 = vmax.f32 %v582_v61, 0.0  ;;  %v609_v63 = vmax.f32 %v580_v56, 0.0 }
 0x195   : > { %v613_v45 = vmax.f32 %v585_v39, 0.0  ;;  %v614_v54 = vmax.f32 %v604_v38, 0.0 }
 0x196   : > { %764 = vmatpush.bf16.msrb.mxu0 %v756_v29  ;;  %793 = vmatpush.bf16.msrb.mxu1 %v757_v28  ;;  %v612_v29 = vmax.f32 %v601_v62, 0.0  ;;  %v617_v39 = vpack.c.bf16 %v611_v48, %v609_v63 }
 0x198   : > { %v618_v38 = vpack.c.bf16 %v612_v29, %v610_v53  ;;  %v4464_v29 = vmax.f32 %v3141_v17, %v3133_v11 }
 0x19a   : > { %765 = vmatpush.bf16.msrb.mxu0 %v754_v19  ;;  %794 = vmatpush.bf16.msrb.mxu1 %v755_v18  ;;  %v837_v19 = vpack.c.b16 %v835_v50, %v835_v50  ;;  %v838_v18 = vpack.c.b16 %v836_v58, %v836_v58 }
 0x19c   : > { %v587_v51 = vpop.f32.mrf.mxu2  ;;  %v606_v60 = vpop.f32.mrf.mxu3  ;;  %v840_v2 = vsel %vm273_vm0, %v837_v19, 0  ;;  %v843_v3 = vsel %vm273_vm0, %v838_v18, 0 }
 0x19d   : > { %v615_v55 = vmax.f32 %v587_v51, 0.0  ;;  %v616_v5 = vmax.f32 %v606_v60, 0.0  ;;  %2735 = vmatmul.msk.bf16.vlgmr.msrb.gmra.mxu0 %vm350_vm2, %v3061_v59  ;;  %2739 = vmatmul.msk.bf16.vlgmr.msrb.gmra.mxu1 %vm350_vm2, %v3061_v59 }
 0x19f   : > { %v619_v28 = vpack.c.bf16 %v615_v55, %v613_v45  ;;  %v620_v49 = vpack.c.bf16 %v616_v5, %v614_v54  ;;  %v2756_v45 = vld [vmem:[%s3023_s22 + $0x28] sm:$0xff]  ;;  %v4463_v5 = vmax.f32 %v3139_v16, %v3131_v10 }
 0x1a0   : > { %v972_v56 = vunpack.c.l.b16 %v2756_v45  ;;  %v973_v57 = vunpack.c.h.b16 %v2756_v45 }
 0x1a1   : > { %627 = vmatpush.bf16.msrb.mxu2 %v619_v28  ;;  %656 = vmatpush.bf16.msrb.mxu3 %v620_v49 }
 0x1a2   : > { %v974_v61 = vpack.c.b16 %v972_v56, %v972_v56  ;;  %v975_v62 = vpack.c.b16 %v973_v57, %v973_v57 }
 0x1a4   : > { %v977_v4 = vsel %vm273_vm0, %v974_v61, 0  ;;  %v980_v6 = vsel %vm273_vm0, %v975_v62, 0 }
 0x1a5   : > { %628 = vmatpush.bf16.msrb.mxu2 %v617_v39  ;;  %657 = vmatpush.bf16.msrb.mxu3 %v618_v38  ;;  %v4467_v38 = vmax.f32 %v3159_v26, %v3147_v20 }
 0x1a6   : > { %989 = vmatpush.bf16.msra.mxu0 %v977_v4  ;;  %1008 = vmatpush.bf16.msra.mxu1 %v980_v6 }
 0x1a8   : > { %2722 = vmatmul.msk.bf16.vlgmr.msrb.gmra.mxu2 %vm350_vm2, %v3061_v59  ;;  %2726 = vmatmul.msk.bf16.vlgmr.msrb.gmra.mxu3 %vm350_vm2, %v3061_v59 }
 0x1a9   : > { %852 = vmatpush.bf16.msra.mxu2 %v840_v2  ;;  %871 = vmatpush.bf16.msra.mxu3 %v843_v3  ;;  %v4468_v3 = vmax.f32 %v3161_v27, %v3149_v21 }
 0x1ad   : > { %2736 = vmatmul.msk.bf16.gmra.mxu0 %vm350_vm2, %v3076_v0  ;;  %2740 = vmatmul.msk.bf16.gmra.mxu1 %vm350_vm2, %v3076_v0 }
 0x1b8   : > { %2723 = vmatmul.msk.bf16.gmra.mxu2 %vm350_vm2, %v3076_v0  ;;  %2727 = vmatmul.msk.bf16.gmra.mxu3 %vm350_vm2, %v3076_v0 }
 0x1bd   : > { %2737 = vmatmul.msk.bf16.gmra.mxu0 %vm350_vm2, %v3089_v1  ;;  %2741 = vmatmul.msk.bf16.gmra.mxu1 %vm350_vm2, %v3089_v1 }
 0x1c8   : > { %2724 = vmatmul.msk.bf16.gmra.mxu2 %vm350_vm2, %v3089_v1  ;;  %2728 = vmatmul.msk.bf16.gmra.mxu3 %vm350_vm2, %v3089_v1 }
 0x1cd   : > { %2738 = vmatmul.msk.bf16.gmra.mxu0 %vm350_vm2, %v3105_v9  ;;  %2742 = vmatmul.msk.bf16.gmra.mxu1 %vm350_vm2, %v3105_v9 }
 0x1d8   : > { %2725 = vmatmul.msk.bf16.gmra.mxu2 %vm350_vm2, %v3105_v9  ;;  %2729 = vmatmul.msk.bf16.gmra.mxu3 %vm350_vm2, %v3105_v9 }
 0x1dd   : > { %2757 = vmatmul.msk.bf16.vlgmr.msra.gmra.mxu0 %vm266_vm1, %v3032_v12  ;;  %2759 = vmatmul.msk.bf16.vlgmr.msra.gmra.mxu1 %vm266_vm1, %v3032_v12 }
 0x1e8   : > { %2744 = vmatmul.msk.bf16.vlgmr.msra.gmra.mxu2 %vm266_vm1, %v3032_v12  ;;  %2746 = vmatmul.msk.bf16.vlgmr.msra.gmra.mxu3 %vm266_vm1, %v3032_v12 }
 0x1ed   : > { %2758 = vmatmul.msk.bf16.gmra.mxu0 %vm266_vm1, %v3047_v15  ;;  %2760 = vmatmul.msk.bf16.gmra.mxu1 %vm266_vm1, %v3047_v15 }
 0x1f8   : > { %2745 = vmatmul.msk.bf16.gmra.mxu2 %vm266_vm1, %v3047_v15  ;;  %2747 = vmatmul.msk.bf16.gmra.mxu3 %vm266_vm1, %v3047_v15 }
 0x21a   : > { %v3265_v7 = vpop.f32.mrf.mxu0  ;;  %v3267_v8 = vpop.f32.mrf.mxu1 }
 0x222   : > { %v3269_v50 = vpop.f32.mrf.mxu0  ;;  %v3271_v58 = vpop.f32.mrf.mxu1 }
 0x22a   : > { %v3273_v51 = vpop.f32.mrf.mxu0  ;;  %v3275_v60 = vpop.f32.mrf.mxu1 }
 0x22b   : > { %v630_v54 = vpop.f32.mrf.mxu2  ;;  %v659_v55 = vpop.f32.mrf.mxu3 }
 0x22c   : > { %v3280_v48 = vmax.f32 %v4463_v5, %v630_v54  ;;  %v3285_v28 = vmax.f32 %v4464_v29, %v659_v55  ;;  %v4473_v54 = vmax.f32 %v3179_v36, %v3167_v30  ;;  %v4474_v5 = vmax.f32 %v3181_v37, %v3169_v31 }
 0x22d   : > { %v4479_v37 = vmax.f32 %v3199_v46, %v3187_v40 }
 0x232   : > { %v3291_v18 = vpop.f32.mrf.mxu0  ;;  %v3293_v63 = vpop.f32.mrf.mxu1 }
 0x233   : > { %4465 = vst [vmem:[#allocation12_spill] sm:$0xff] %v3291_v18  ;;  %v3295_v53 = vpop.f32.mrf.mxu2  ;;  %v3297_v10 = vpop.f32.mrf.mxu3 }
 0x234   : > { %4466 = vst [vmem:[#allocation13_spill] sm:$0xff] %v3293_v63 }
 0x23a   : > { %v3299_v16 = vpop.f32.mrf.mxu0  ;;  %v3301_v39 = vpop.f32.mrf.mxu1 }
 0x23b   : > { %v635_v11 = vpop.f32.mrf.mxu2  ;;  %v664_v17 = vpop.f32.mrf.mxu3 }
 0x23c   : > { %v3306_v2 = vmax.f32 %v4467_v38, %v635_v11  ;;  %v3311_v45 = vmax.f32 %v4468_v3, %v664_v17 }
 0x242   : > { %v3317_v61 = vpop.f32.mrf.mxu0  ;;  %v3319_v62 = vpop.f32.mrf.mxu1 }
 0x243   : > { %4469 = vst [vmem:[#allocation14_spill] sm:$0xff] %v3317_v61  ;;  %v3321_v4 = vpop.f32.mrf.mxu2  ;;  %v3323_v20 = vpop.f32.mrf.mxu3 }
 0x244   : > { %4470 = vst [vmem:[#allocation15_spill] sm:$0xff] %v3319_v62 }
 0x245   : > { %4471 = vst [vmem:[#allocation16_spill] sm:$0xff] %v3321_v4 }
 0x246   : > { %4472 = vst [vmem:[#allocation17_spill] sm:$0xff] %v3323_v20 }
 0x24a   : > { %v3325_v26 = vpop.f32.mrf.mxu0  ;;  %v3327_v6 = vpop.f32.mrf.mxu1 }
 0x24b   : > { %v640_v21 = vpop.f32.mrf.mxu2  ;;  %v669_v27 = vpop.f32.mrf.mxu3 }
 0x24c   : > { %v3332_v55 = vmax.f32 %v4473_v54, %v640_v21  ;;  %v3337_v29 = vmax.f32 %v4474_v5, %v669_v27  ;;  %v4480_v5 = vmax.f32 %v3201_v47, %v3189_v41 }
 0x252   : > { %v3343_v38 = vpop.f32.mrf.mxu0  ;;  %v3345_v3 = vpop.f32.mrf.mxu1 }
 0x253   : > { %4475 = vst [vmem:[#allocation18_spill] sm:$0xff] %v3343_v38  ;;  %v3347_v57 = vpop.f32.mrf.mxu2  ;;  %v3349_v30 = vpop.f32.mrf.mxu3 }
 0x254   : > { %4476 = vst [vmem:[#allocation19_spill] sm:$0xff] %v3345_v3 }
 0x255   : > { %4477 = vst [vmem:[#allocation20_spill] sm:$0xff] %v3347_v57 }
 0x256   : > { %4478 = vst [vmem:[#allocation21_spill] sm:$0xff] %v3349_v30 }
 0x25a   : > { %v991_v36 = vpop.f32.mrf.mxu0  ;;  %v1010_v21 = vpop.f32.mrf.mxu1 }
 0x25b   : > { %v645_v54 = vpop.f32.mrf.mxu2  ;;  %v674_v31 = vpop.f32.mrf.mxu3  ;;  %v1020_v47 = vmax.f32 %v991_v36, 0.0 }
 0x25c   : > { %v3354_v27 = vmax.f32 %v4479_v37, %v645_v54  ;;  %v3359_v17 = vmax.f32 %v4480_v5, %v674_v31  ;;  %v1021_v31 = vmax.f32 %v1010_v21, 0.0 }
 0x262   : > { %v993_v19 = vpop.f32.mrf.mxu0  ;;  %v1012_v49 = vpop.f32.mrf.mxu1 }
 0x263   : > { %v3365_v3 = vpop.f32.mrf.mxu2  ;;  %v3367_v38 = vpop.f32.mrf.mxu3  ;;  %v1022_v61 = vmax.f32 %v993_v19, 0.0  ;;  %v1023_v56 = vmax.f32 %v1012_v49, 0.0  ;;  %v2769_v19 = vld [vmem:[%s3023_s22 + $0x30] sm:$0xff] }
 0x264   : > { %4481 = vst [vmem:[#allocation22_spill] sm:$0xff] %v3365_v3  ;;  %v1109_v49 = vunpack.c.l.b16 %v2769_v19  ;;  %v1110_v36 = vunpack.c.h.b16 %v2769_v19 }
 0x265   : > { %4482 = vst [vmem:[#allocation23_spill] sm:$0xff] %v3367_v38  ;;  %v1028_v38 = vpack.c.bf16 %v1022_v61, %v1020_v47  ;;  %v1029_v35 = vpack.c.bf16 %v1023_v56, %v1021_v31 }
 0x26a   : > { %v996_v40 = vpop.f32.mrf.mxu0  ;;  %v1015_v46 = vpop.f32.mrf.mxu1 }
 0x26b   : > { %v854_v54 = vpop.f32.mrf.mxu2  ;;  %v873_v37 = vpop.f32.mrf.mxu3  ;;  %v1024_v52 = vmax.f32 %v996_v40, 0.0  ;;  %v1025_v41 = vmax.f32 %v1015_v46, 0.0  ;;  %v1112_v46 = vpack.c.b16 %v1110_v36, %v1110_v36 }
 0x26c   : > { %v884_v47 = vmax.f32 %v873_v37, 0.0 }
 0x272   : > { %v998_v5 = vpop.f32.mrf.mxu0  ;;  %v1017_v44 = vpop.f32.mrf.mxu1 }
 0x273   : > { %v856_v11 = vpop.f32.mrf.mxu2  ;;  %v875_v62 = vpop.f32.mrf.mxu3  ;;  %v1026_v30 = vmax.f32 %v998_v5, 0.0  ;;  %v1027_v57 = vmax.f32 %v1017_v44, 0.0 }
 0x275   : > { %v1030_v3 = vpack.c.bf16 %v1026_v30, %v1024_v52  ;;  %v1031_v43 = vpack.c.bf16 %v1027_v57, %v1025_v41  ;;  %v886_v30 = vmax.f32 %v875_v62, 0.0  ;;  %v883_v41 = vmax.f32 %v854_v54, 0.0  ;;  %v2782_v62 = vld [vmem:[%s3023_s22 + $0x38] sm:$0xff] }
 0x276   : > { %v1247_v54 = vunpack.c.h.b16 %v2782_v62 }
 0x277   : > { %1038 = vmatpush.bf16.msrb.mxu0 %v1030_v3  ;;  %1067 = vmatpush.bf16.msrb.mxu1 %v1031_v43  ;;  %v885_v43 = vmax.f32 %v856_v11, 0.0  ;;  %v892_v5 = vpack.c.bf16 %v886_v30, %v884_v47  ;;  %v1246_v11 = vunpack.c.l.b16 %v2782_v62  ;;  %v4487_v62 = vmax.f32 %v3306_v2, %v3273_v51 }
 0x279   : > { %v891_v31 = vpack.c.bf16 %v885_v43, %v883_v41  ;;  %v1248_v37 = vpack.c.b16 %v1246_v11, %v1246_v11 }
 0x27b   : > { %v859_v42 = vpop.f32.mrf.mxu2  ;;  %v878_v40 = vpop.f32.mrf.mxu3  ;;  %1039 = vmatpush.bf16.msrb.mxu0 %v1028_v38  ;;  %1068 = vmatpush.bf16.msrb.mxu1 %v1029_v35  ;;  %v1111_v35 = vpack.c.b16 %v1109_v49, %v1109_v49  ;;  %v1251_v49 = vsel %vm273_vm0, %v1248_v37, 0 }
 0x27c   : > { %v887_v57 = vmax.f32 %v859_v42, 0.0  ;;  %v888_v61 = vmax.f32 %v878_v40, 0.0  ;;  %v1117_v42 = vsel %vm273_vm0, %v1112_v46, 0  ;;  %v1249_v40 = vpack.c.b16 %v1247_v54, %v1247_v54 }
 0x27d   : > { %v1114_v19 = vsel %vm273_vm0, %v1111_v35, 0  ;;  %v4484_v35 = vmax.f32 %v3285_v28, %v3267_v8  ;;  %v4488_v54 = vmax.f32 %v3311_v45, %v3275_v60 }
 0x27e   : > { %2761 = vmatmul.msk.bf16.vlgmr.msrb.gmra.mxu0 %vm350_vm2, %v3061_v59  ;;  %2765 = vmatmul.msk.bf16.vlgmr.msrb.gmra.mxu1 %vm350_vm2, %v3061_v59  ;;  %v1254_v36 = vsel %vm273_vm0, %v1249_v40, 0 }
 0x27f   : > { %1263 = vmatpush.bf16.msra.mxu0 %v1251_v49  ;;  %1282 = vmatpush.bf16.msra.mxu1 %v1254_v36 }
 0x283   : > { %v861_v44 = vpop.f32.mrf.mxu2  ;;  %v880_v52 = vpop.f32.mrf.mxu3 }
 0x284   : > { %v889_v56 = vmax.f32 %v861_v44, 0.0  ;;  %v890_v3 = vmax.f32 %v880_v52, 0.0 }
 0x286   : > { %v893_v21 = vpack.c.bf16 %v889_v56, %v887_v57  ;;  %v894_v38 = vpack.c.bf16 %v890_v3, %v888_v61 }
 0x288   : > { %901 = vmatpush.bf16.msrb.mxu2 %v893_v21  ;;  %930 = vmatpush.bf16.msrb.mxu3 %v894_v38  ;;  %v4483_v21 = vmax.f32 %v3280_v48, %v3265_v7 }
 0x28c   : > { %902 = vmatpush.bf16.msrb.mxu2 %v891_v31  ;;  %931 = vmatpush.bf16.msrb.mxu3 %v892_v5 }
 0x28e   : > { %2762 = vmatmul.msk.bf16.gmra.mxu0 %vm350_vm2, %v3076_v0  ;;  %2766 = vmatmul.msk.bf16.gmra.mxu1 %vm350_vm2, %v3076_v0 }
 0x28f   : > { %2748 = vmatmul.msk.bf16.vlgmr.msrb.gmra.mxu2 %vm350_vm2, %v3061_v59  ;;  %2752 = vmatmul.msk.bf16.vlgmr.msrb.gmra.mxu3 %vm350_vm2, %v3061_v59 }
 0x290   : > { %1126 = vmatpush.bf16.msra.mxu2 %v1114_v19  ;;  %1145 = vmatpush.bf16.msra.mxu3 %v1117_v42 }
 0x29e   : > { %2763 = vmatmul.msk.bf16.gmra.mxu0 %vm350_vm2, %v3089_v1  ;;  %2767 = vmatmul.msk.bf16.gmra.mxu1 %vm350_vm2, %v3089_v1 }
 0x29f   : > { %2749 = vmatmul.msk.bf16.gmra.mxu2 %vm350_vm2, %v3076_v0  ;;  %2753 = vmatmul.msk.bf16.gmra.mxu3 %vm350_vm2, %v3076_v0 }
 0x2ae   : > { %2764 = vmatmul.msk.bf16.gmra.mxu0 %vm350_vm2, %v3105_v9  ;;  %2768 = vmatmul.msk.bf16.gmra.mxu1 %vm350_vm2, %v3105_v9 }
 0x2af   : > { %2750 = vmatmul.msk.bf16.gmra.mxu2 %vm350_vm2, %v3089_v1  ;;  %2754 = vmatmul.msk.bf16.gmra.mxu3 %vm350_vm2, %v3089_v1 }
 0x2be   : > { %2783 = vmatmul.msk.bf16.vlgmr.msra.gmra.mxu0 %vm266_vm1, %v3032_v12  ;;  %2785 = vmatmul.msk.bf16.vlgmr.msra.gmra.mxu1 %vm266_vm1, %v3032_v12 }
 0x2bf   : > { %2751 = vmatmul.msk.bf16.gmra.mxu2 %vm350_vm2, %v3105_v9  ;;  %2755 = vmatmul.msk.bf16.gmra.mxu3 %vm350_vm2, %v3105_v9 }
 0x2ce   : > { %2784 = vmatmul.msk.bf16.gmra.mxu0 %vm266_vm1, %v3047_v15  ;;  %2786 = vmatmul.msk.bf16.gmra.mxu1 %vm266_vm1, %v3047_v15 }
 0x2cf   : > { %2770 = vmatmul.msk.bf16.vlgmr.msra.gmra.mxu2 %vm266_vm1, %v3032_v12  ;;  %2772 = vmatmul.msk.bf16.vlgmr.msra.gmra.mxu3 %vm266_vm1, %v3032_v12 }
 0x2df   : > { %2771 = vmatmul.msk.bf16.gmra.mxu2 %vm266_vm1, %v3047_v15  ;;  %2773 = vmatmul.msk.bf16.gmra.mxu3 %vm266_vm1, %v3047_v15 }
 0x2fb   : > { %v3423_v44 = vpop.f32.mrf.mxu0  ;;  %v3425_v52 = vpop.f32.mrf.mxu1 }
 0x303   : > { %v3427_v57 = vpop.f32.mrf.mxu0  ;;  %v3429_v61 = vpop.f32.mrf.mxu1 }
 0x30b   : > { %v3431_v56 = vpop.f32.mrf.mxu0  ;;  %v3433_v3 = vpop.f32.mrf.mxu1 }
 0x312   : > { %v904_v43 = vpop.f32.mrf.mxu2  ;;  %v933_v30 = vpop.f32.mrf.mxu3 }
 0x313   : > { %v3438_v38 = vmax.f32 %v4483_v21, %v904_v43  ;;  %v3443_v46 = vmax.f32 %v4484_v35, %v933_v30  ;;  %v3445_v41 = vpop.f32.mrf.mxu0  ;;  %v3447_v47 = vpop.f32.mrf.mxu1  ;;  %v4493_v35 = vmax.f32 %v3332_v55, %v3299_v16 }
 0x314   : > { %4485 = vst [vmem:[#allocation24_spill] sm:$0xff] %v3445_v41 }
 0x315   : > { %4486 = vst [vmem:[#allocation25_spill] sm:$0xff] %v3447_v47 }
 0x31a   : > { %v3453_v19 = vpop.f32.mrf.mxu2  ;;  %v3455_v7 = vpop.f32.mrf.mxu3 }
 0x31b   : > { %v3457_v48 = vpop.f32.mrf.mxu0  ;;  %v3459_v42 = vpop.f32.mrf.mxu1 }
 0x322   : > { %v909_v8 = vpop.f32.mrf.mxu2  ;;  %v938_v28 = vpop.f32.mrf.mxu3 }
 0x323   : > { %v3464_v11 = vmax.f32 %v4487_v62, %v909_v8  ;;  %v3469_v37 = vmax.f32 %v4488_v54, %v938_v28  ;;  %v3471_v40 = vpop.f32.mrf.mxu0  ;;  %v3473_v49 = vpop.f32.mrf.mxu1  ;;  %v4494_v28 = vmax.f32 %v3337_v29, %v3301_v39  ;;  %v4499_v29 = vmax.f32 %v3354_v27, %v3325_v26 }
 0x324   : > { %4489 = vst [vmem:[#allocation26_spill] sm:$0xff] %v3471_v40 }
 0x325   : > { %4490 = vst [vmem:[#allocation27_spill] sm:$0xff] %v3473_v49 }
 0x32a   : > { %v3479_v30 = vpop.f32.mrf.mxu2  ;;  %v3481_v51 = vpop.f32.mrf.mxu3 }
 0x32b   : > { %4491 = vst [vmem:[#allocation28_spill] sm:$0xff] %v3479_v30  ;;  %v3483_v2 = vpop.f32.mrf.mxu0  ;;  %v3485_v21 = vpop.f32.mrf.mxu1 }
 0x32c   : > { %4492 = vst [vmem:[#allocation29_spill] sm:$0xff] %v3481_v51 }
 0x332   : > { %v914_v60 = vpop.f32.mrf.mxu2  ;;  %v943_v45 = vpop.f32.mrf.mxu3 }
 0x333   : > { %v3490_v8 = vmax.f32 %v4493_v35, %v914_v60  ;;  %v3495_v62 = vmax.f32 %v4494_v28, %v943_v45  ;;  %v3497_v54 = vpop.f32.mrf.mxu0  ;;  %v3499_v43 = vpop.f32.mrf.mxu1  ;;  %v4500_v28 = vmax.f32 %v3359_v17, %v3327_v6 }
 0x334   : > { %4495 = vst [vmem:[#allocation30_spill] sm:$0xff] %v3497_v54 }
 0x335   : > { %4496 = vst [vmem:[#allocation31_spill] sm:$0xff] %v3499_v43 }
 0x33a   : > { %v3505_v31 = vpop.f32.mrf.mxu2  ;;  %v3507_v16 = vpop.f32.mrf.mxu3 }
 0x33b   : > { %4497 = vst [vmem:[#allocation32_spill] sm:$0xff] %v3505_v31  ;;  %v1265_v55 = vpop.f32.mrf.mxu0  ;;  %v1284_v60 = vpop.f32.mrf.mxu1 }
 0x33c   : > { %4498 = vst [vmem:[#allocation33_spill] sm:$0xff] %v3507_v16  ;;  %v1294_v17 = vmax.f32 %v1265_v55, 0.0  ;;  %v2795_v55 = vld [vmem:[%s3023_s22 + $0x40] sm:$0xff] }
 0x342   : > { %v919_v35 = vpop.f32.mrf.mxu2  ;;  %v948_v39 = vpop.f32.mrf.mxu3 }
 0x343   : > { %v3512_v45 = vmax.f32 %v4499_v29, %v919_v35  ;;  %v3517_v36 = vmax.f32 %v4500_v28, %v948_v39  ;;  %v1267_v43 = vpop.f32.mrf.mxu0  ;;  %v1286_v5 = vpop.f32.mrf.mxu1  ;;  %v1295_v39 = vmax.f32 %v1284_v60, 0.0 }
 0x344   : > { %v1296_v47 = vmax.f32 %v1267_v43, 0.0  ;;  %v1297_v41 = vmax.f32 %v1286_v5, 0.0 }
 0x346   : > { %v1303_v63 = vpack.c.bf16 %v1297_v41, %v1295_v39 }
 0x34a   : > { %v3523_v40 = vpop.f32.mrf.mxu2  ;;  %v3525_v16 = vpop.f32.mrf.mxu3 }
 0x34b   : > { %4501 = vst [vmem:[#allocation34_spill] sm:$0xff] %v3523_v40  ;;  %v1270_v26 = vpop.f32.mrf.mxu0  ;;  %v1289_v27 = vpop.f32.mrf.mxu1  ;;  %v1302_v40 = vpack.c.bf16 %v1296_v47, %v1294_v17 }
 0x34c   : > { %4502 = vst [vmem:[#allocation35_spill] sm:$0xff] %v3525_v16  ;;  %v1298_v31 = vmax.f32 %v1270_v26, 0.0  ;;  %v1299_v6 = vmax.f32 %v1289_v27, 0.0 }
 0x352   : > { %v1128_v35 = vpop.f32.mrf.mxu2  ;;  %v1147_v29 = vpop.f32.mrf.mxu3 }
 0x353   : > { %v1272_v28 = vpop.f32.mrf.mxu0  ;;  %v1291_v34 = vpop.f32.mrf.mxu1  ;;  %v1157_v17 = vmax.f32 %v1128_v35, 0.0  ;;  %v1158_v39 = vmax.f32 %v1147_v29, 0.0  ;;  %v2808_v35 = vld [vmem:[%s3023_s22 + $0x48] sm:$0xff] }
 0x354   : > { %v1300_v54 = vmax.f32 %v1272_v28, 0.0  ;;  %v1301_v51 = vmax.f32 %v1291_v34, 0.0  ;;  %v1383_v34 = vunpack.c.l.b16 %v2795_v55  ;;  %v1520_v29 = vunpack.c.l.b16 %v2808_v35 }
 0x356   : > { %v1304_v49 = vpack.c.bf16 %v1300_v54, %v1298_v31  ;;  %v1305_v30 = vpack.c.bf16 %v1301_v51, %v1299_v6  ;;  %v1384_v31 = vunpack.c.h.b16 %v2795_v55  ;;  %v1385_v27 = vpack.c.b16 %v1383_v34, %v1383_v34 }
 0x357   : > { %v1522_v55 = vpack.c.b16 %v1520_v29, %v1520_v29 }
 0x358   : > { %1312 = vmatpush.bf16.msrb.mxu0 %v1304_v49  ;;  %1341 = vmatpush.bf16.msrb.mxu1 %v1305_v30  ;;  %v1386_v6 = vpack.c.b16 %v1384_v31, %v1384_v31 }
 0x359   : > { %v1525_v31 = vsel %vm273_vm0, %v1522_v55, 0 }
 0x35a   : > { %v1130_v16 = vpop.f32.mrf.mxu2  ;;  %v1149_v18 = vpop.f32.mrf.mxu3 }
 0x35b   : > { %v1159_v60 = vmax.f32 %v1130_v16, 0.0  ;;  %v1388_v16 = vsel %vm273_vm0, %v1385_v27, 0 }
 0x35c   : > { %1313 = vmatpush.bf16.msrb.mxu0 %v1302_v40  ;;  %1342 = vmatpush.bf16.msrb.mxu1 %v1303_v63  ;;  %v1160_v40 = vmax.f32 %v1149_v18, 0.0  ;;  %v1391_v18 = vsel %vm273_vm0, %v1386_v6, 0 }
 0x35d   : > { %v1165_v28 = vpack.c.bf16 %v1159_v60, %v1157_v17 }
 0x35f   : > { %2787 = vmatmul.msk.bf16.vlgmr.msrb.gmra.mxu0 %vm350_vm2, %v3061_v59  ;;  %2791 = vmatmul.msk.bf16.vlgmr.msrb.gmra.mxu1 %vm350_vm2, %v3061_v59 }
 0x360   : > { %1537 = vmatpush.bf16.msra.mxu0 %v1525_v31 }
 0x362   : > { %v1133_v5 = vpop.f32.mrf.mxu2  ;;  %v1152_v43 = vpop.f32.mrf.mxu3 }
 0x363   : > { %v1161_v41 = vmax.f32 %v1133_v5, 0.0  ;;  %v1162_v49 = vmax.f32 %v1152_v43, 0.0  ;;  %v1166_v5 = vpack.c.bf16 %v1160_v40, %v1158_v39  ;;  %v1521_v43 = vunpack.c.h.b16 %v2808_v35 }
 0x364   : > { %v4512_v35 = vmax.f32 %v3469_v37, %v3433_v3 }
 0x365   : > { %v1523_v34 = vpack.c.b16 %v1521_v43, %v1521_v43 }
 0x36a   : > { %v1135_v51 = vpop.f32.mrf.mxu2  ;;  %v1154_v47 = vpop.f32.mrf.mxu3 }
 0x36b   : > { %v1163_v30 = vmax.f32 %v1135_v51, 0.0  ;;  %v1164_v54 = vmax.f32 %v1154_v47, 0.0 }
 0x36d   : > { %v1167_v63 = vpack.c.bf16 %v1163_v30, %v1161_v41  ;;  %v1168_v26 = vpack.c.bf16 %v1164_v54, %v1162_v49 }
 0x36f   : > { %1175 = vmatpush.bf16.msrb.mxu2 %v1167_v63  ;;  %1204 = vmatpush.bf16.msrb.mxu3 %v1168_v26  ;;  %v4508_v63 = vmax.f32 %v3443_v46, %v3425_v52 }
 0x370   : > { %2788 = vmatmul.msk.bf16.gmra.mxu0 %vm350_vm2, %v3076_v0  ;;  %2792 = vmatmul.msk.bf16.gmra.mxu1 %vm350_vm2, %v3076_v0 }
 0x373   : > { %1176 = vmatpush.bf16.msrb.mxu2 %v1165_v28  ;;  %1205 = vmatpush.bf16.msrb.mxu3 %v1166_v5 }
 0x376   : > { %2774 = vmatmul.msk.bf16.vlgmr.msrb.gmra.mxu2 %vm350_vm2, %v3061_v59  ;;  %2778 = vmatmul.msk.bf16.vlgmr.msrb.gmra.mxu3 %vm350_vm2, %v3061_v59  ;;  %v1528_v59 = vsel %vm273_vm0, %v1523_v34, 0 }
 0x377   : > { %1400 = vmatpush.bf16.msra.mxu2 %v1388_v16  ;;  %1419 = vmatpush.bf16.msra.mxu3 %v1391_v18  ;;  %v4511_v16 = vmax.f32 %v3464_v11, %v3431_v56 }
 0x378   : > { %1556 = vmatpush.bf16.msra.mxu1 %v1528_v59 }
 0x380   : > { %2789 = vmatmul.msk.bf16.gmra.mxu0 %vm350_vm2, %v3089_v1  ;;  %2793 = vmatmul.msk.bf16.gmra.mxu1 %vm350_vm2, %v3089_v1 }
 0x386   : > { %2775 = vmatmul.msk.bf16.gmra.mxu2 %vm350_vm2, %v3076_v0  ;;  %2779 = vmatmul.msk.bf16.gmra.mxu3 %vm350_vm2, %v3076_v0  ;;  %v3576_v0 = vld [vmem:[%s4445_s1] sm:$0xff] }
 0x390   : > { %2790 = vmatmul.msk.bf16.gmra.mxu0 %vm350_vm2, %v3105_v9  ;;  %2794 = vmatmul.msk.bf16.gmra.mxu1 %vm350_vm2, %v3105_v9 }
 0x396   : > { %2776 = vmatmul.msk.bf16.gmra.mxu2 %vm350_vm2, %v3089_v1  ;;  %2780 = vmatmul.msk.bf16.gmra.mxu3 %vm350_vm2, %v3089_v1 }
 0x3a0   : > { %2809 = vmatmul.msk.bf16.vlgmr.msra.gmra.mxu0 %vm266_vm1, %v3032_v12  ;;  %2811 = vmatmul.msk.bf16.vlgmr.msra.gmra.mxu1 %vm266_vm1, %v3032_v12 }
 0x3a6   : > { %2777 = vmatmul.msk.bf16.gmra.mxu2 %vm350_vm2, %v3105_v9  ;;  %2781 = vmatmul.msk.bf16.gmra.mxu3 %vm350_vm2, %v3105_v9 }
 0x3b0   : > { %2810 = vmatmul.msk.bf16.gmra.mxu0 %vm266_vm1, %v3047_v15  ;;  %2812 = vmatmul.msk.bf16.gmra.mxu1 %vm266_vm1, %v3047_v15 }
 0x3b6   : > { %2796 = vmatmul.msk.bf16.vlgmr.msra.gmra.mxu2 %vm266_vm1, %v3576_v0  ;;  %2798 = vmatmul.msk.bf16.vlgmr.msra.gmra.mxu3 %vm266_vm1, %v3576_v0 }
 0x3c6   : > { %2797 = vmatmul.msk.bf16.gmra.mxu2 %vm266_vm1, %v3047_v15  ;;  %2799 = vmatmul.msk.bf16.gmra.mxu3 %vm266_vm1, %v3047_v15  ;;  %v4507_v15 = vmax.f32 %v3438_v38, %v3423_v44 }
 0x3dc   : > { %v3586_v12 = vpop.f32.mrf.mxu0  ;;  %v3588_v1 = vpop.f32.mrf.mxu1 }
 0x3e4   : > { %v3590_v9 = vpop.f32.mrf.mxu0  ;;  %v3592_v51 = vpop.f32.mrf.mxu1 }
 0x3e5   : > { %4503 = vst [vmem:[#allocation36_spill] sm:$0xff] %v3590_v9 }
 0x3e6   : > { %4504 = vst [vmem:[#allocation37_spill] sm:$0xff] %v3592_v51 }
 0x3ed   : > { %v3594_v47 = vpop.f32.mrf.mxu0  ;;  %v3596_v41 = vpop.f32.mrf.mxu1 }
 0x3f5   : > { %v3598_v49 = vpop.f32.mrf.mxu0  ;;  %v3600_v30 = vpop.f32.mrf.mxu1 }
 0x3f6   : > { %4505 = vst [vmem:[#allocation38_spill] sm:$0xff] %v3598_v49 }
 0x3f7   : > { %4506 = vst [vmem:[#allocation39_spill] sm:$0xff] %v3600_v30 }
 0x3f9   : > { %v1178_v54 = vpop.f32.mrf.mxu2  ;;  %v1207_v60 = vpop.f32.mrf.mxu3 }
 0x3fa   : > { %v3605_v40 = vmax.f32 %v4507_v15, %v1178_v54  ;;  %v3610_v26 = vmax.f32 %v4508_v63, %v1207_v60  ;;  %v4517_v60 = vmax.f32 %v3490_v8, %v3457_v48  ;;  %v4518_v63 = vmax.f32 %v3495_v62, %v3459_v42 }
 0x3fb   : > { %v4521_v42 = vmax.f32 %v3512_v45, %v3483_v2 }
 0x3fd   : > { %v3616_v17 = vpop.f32.mrf.mxu0  ;;  %v3618_v39 = vpop.f32.mrf.mxu1 }
 0x401   : > { %v3620_v28 = vpop.f32.mrf.mxu2  ;;  %v3622_v44 = vpop.f32.mrf.mxu3 }
 0x405   : > { %v3624_v38 = vpop.f32.mrf.mxu0  ;;  %v3626_v5 = vpop.f32.mrf.mxu1 }
 0x406   : > { %4509 = vst [vmem:[#allocation40_spill] sm:$0xff] %v3624_v38 }
 0x407   : > { %4510 = vst [vmem:[#allocation41_spill] sm:$0xff] %v3626_v5 }
 0x409   : > { %v1183_v52 = vpop.f32.mrf.mxu2  ;;  %v1212_v46 = vpop.f32.mrf.mxu3 }
 0x40a   : > { %v3631_v18 = vmax.f32 %v4511_v16, %v1183_v52  ;;  %v3636_v29 = vmax.f32 %v4512_v35, %v1212_v46 }
 0x40d   : > { %v3642_v34 = vpop.f32.mrf.mxu0  ;;  %v3644_v31 = vpop.f32.mrf.mxu1 }
 0x411   : > { %v3646_v59 = vpop.f32.mrf.mxu2  ;;  %v3648_v56 = vpop.f32.mrf.mxu3 }
 0x412   : > { %4513 = vst [vmem:[#allocation42_spill] sm:$0xff] %v3646_v59 }
 0x413   : > { %4514 = vst [vmem:[#allocation43_spill] sm:$0xff] %v3648_v56 }
 0x415   : > { %v3650_v11 = vpop.f32.mrf.mxu0  ;;  %v3652_v54 = vpop.f32.mrf.mxu1 }
 0x416   : > { %4515 = vst [vmem:[#allocation44_spill] sm:$0xff] %v3650_v11 }
 0x417   : > { %4516 = vst [vmem:[#allocation45_spill] sm:$0xff] %v3652_v54 }
 0x419   : > { %v1188_v3 = vpop.f32.mrf.mxu2  ;;  %v1217_v37 = vpop.f32.mrf.mxu3 }
 0x41a   : > { %v3657_v15 = vmax.f32 %v4517_v60, %v1188_v3  ;;  %v3662_v52 = vmax.f32 %v4518_v63, %v1217_v37  ;;  %v4522_v37 = vmax.f32 %v3517_v36, %v3485_v21 }
 0x41d   : > { %v1539_v35 = vpop.f32.mrf.mxu0  ;;  %v1558_v55 = vpop.f32.mrf.mxu1 }
 0x421   : > { %v3668_v43 = vpop.f32.mrf.mxu2  ;;  %v3670_v6 = vpop.f32.mrf.mxu3 }
 0x422   : > { %4519 = vst [vmem:[#allocation46_spill] sm:$0xff] %v3668_v43 }
 0x423   : > { %4520 = vst [vmem:[#allocation47_spill] sm:$0xff] %v3670_v6 }
 0x425   : > { %v1541_v48 = vpop.f32.mrf.mxu0  ;;  %v1560_v8 = vpop.f32.mrf.mxu1 }
 0x426   : > { %v1570_v21 = vmax.f32 %v1541_v48, 0.0  ;;  %v3703_v48 = vld [vmem:[%s4446_s2 + $0x8] sm:$0xff] }
 0x429   : > { %v1193_v3 = vpop.f32.mrf.mxu2  ;;  %v1222_v60 = vpop.f32.mrf.mxu3 }
 0x42a   : > { %v3675_v62 = vmax.f32 %v4521_v42, %v1193_v3  ;;  %v3680_v63 = vmax.f32 %v4522_v37, %v1222_v60  ;;  %v1568_v3 = vmax.f32 %v1539_v35, 0.0  ;;  %v1569_v42 = vmax.f32 %v1558_v55, 0.0  ;;  %v3693_v55 = vld [vmem:[%s4446_s2] sm:$0xff]  ;;  %v2821_v35 = vld [vmem:[%s3023_s22 + $0x50] sm:$0xff] }
 0x42b   : > { %v1571_v60 = vmax.f32 %v1560_v8, 0.0 }
 0x42c   : > { %v1576_v49 = vpack.c.bf16 %v1570_v21, %v1568_v3 }
 0x42d   : > { %v1544_v27 = vpop.f32.mrf.mxu0  ;;  %v1563_v54 = vpop.f32.mrf.mxu1  ;;  %v1577_v56 = vpack.c.bf16 %v1571_v60, %v1569_v42 }
 0x42e   : > { %v1572_v2 = vmax.f32 %v1544_v27, 0.0  ;;  %v1573_v45 = vmax.f32 %v1563_v54, 0.0 }
 0x431   : > { %v3686_v11 = vpop.f32.mrf.mxu2  ;;  %v3688_v5 = vpop.f32.mrf.mxu3 }
 0x432   : > { %4523 = vst [vmem:[#allocation48_spill] sm:$0xff] %v3686_v11 }
 0x433   : > { %4524 = vst [vmem:[#allocation49_spill] sm:$0xff] %v3688_v5 }
 0x435   : > { %v1546_v38 = vpop.f32.mrf.mxu0  ;;  %v1565_v36 = vpop.f32.mrf.mxu1 }
 0x436   : > { %v1574_v37 = vmax.f32 %v1546_v38, 0.0  ;;  %v1575_v6 = vmax.f32 %v1565_v36, 0.0 }
 0x438   : > { %v1578_v16 = vpack.c.bf16 %v1574_v37, %v1572_v2  ;;  %v1579_v43 = vpack.c.bf16 %v1575_v6, %v1573_v45 }
 0x439   : > { %v1402_v46 = vpop.f32.mrf.mxu2  ;;  %v1421_v30 = vpop.f32.mrf.mxu3 }
 0x43a   : > { %1586 = vmatpush.bf16.msrb.mxu0 %v1578_v16  ;;  %1615 = vmatpush.bf16.msrb.mxu1 %v1579_v43  ;;  %v1657_v16 = vunpack.c.l.b16 %v2821_v35  ;;  %v1658_v43 = vunpack.c.h.b16 %v2821_v35  ;;  %v1431_v5 = vmax.f32 %v1402_v46, 0.0  ;;  %v1432_v11 = vmax.f32 %v1421_v30, 0.0  ;;  %v3718_v30 = vld [vmem:[%s4446_s2 + $0x10] sm:$0xff]  ;;  %v3732_v46 = vld [vmem:[%s4446_s2 + $0x18] sm:$0xff] }
 0x43c   : > { %v1659_v37 = vpack.c.b16 %v1657_v16, %v1657_v16  ;;  %v1660_v35 = vpack.c.b16 %v1658_v43, %v1658_v43 }
 0x43e   : > { %1587 = vmatpush.bf16.msrb.mxu0 %v1576_v49  ;;  %1616 = vmatpush.bf16.msrb.mxu1 %v1577_v56  ;;  %v1662_v9 = vsel %vm273_vm0, %v1659_v37, 0  ;;  %v4529_v37 = vmax.f32 %v3605_v40, %v3586_v12 }
 0x441   : > { %v1404_v27 = vpop.f32.mrf.mxu2  ;;  %v1423_v54 = vpop.f32.mrf.mxu3  ;;  %2813 = vmatmul.msk.bf16.vlgmr.msrb.gmra.mxu0 %vm350_vm2, %v3693_v55  ;;  %2817 = vmatmul.msk.bf16.vlgmr.msrb.gmra.mxu1 %vm350_vm2, %v3693_v55 }
 0x442   : > { %v1433_v42 = vmax.f32 %v1404_v27, 0.0  ;;  %v1434_v36 = vmax.f32 %v1423_v54, 0.0 }
 0x444   : > { %v1439_v59 = vpack.c.bf16 %v1433_v42, %v1431_v5  ;;  %v1440_v51 = vpack.c.bf16 %v1434_v36, %v1432_v11 }
 0x449   : > { %v1407_v6 = vpop.f32.mrf.mxu2  ;;  %v1426_v38 = vpop.f32.mrf.mxu3 }
 0x44a   : > { %v1435_v8 = vmax.f32 %v1407_v6, 0.0  ;;  %v1436_v2 = vmax.f32 %v1426_v38, 0.0  ;;  %v1665_v6 = vsel %vm273_vm0, %v1660_v35, 0  ;;  %v3755_v38 = vld [vmem:[%s4445_s1 + $0x8] sm:$0xff] }
 0x451   : > { %v1409_v49 = vpop.f32.mrf.mxu2  ;;  %v1428_v56 = vpop.f32.mrf.mxu3  ;;  %2814 = vmatmul.msk.bf16.gmra.mxu0 %vm350_vm2, %v3703_v48  ;;  %2818 = vmatmul.msk.bf16.gmra.mxu1 %vm350_vm2, %v3703_v48 }
 0x452   : > { %v1437_v45 = vmax.f32 %v1409_v49, 0.0  ;;  %v1438_v3 = vmax.f32 %v1428_v56, 0.0 }
 0x454   : > { %v1441_v21 = vpack.c.bf16 %v1437_v45, %v1435_v8  ;;  %v1442_v60 = vpack.c.bf16 %v1438_v3, %v1436_v2 }
 0x456   : > { %1449 = vmatpush.bf16.msrb.mxu2 %v1441_v21  ;;  %1478 = vmatpush.bf16.msrb.mxu3 %v1442_v60 }
 0x45a   : > { %1450 = vmatpush.bf16.msrb.mxu2 %v1439_v59  ;;  %1479 = vmatpush.bf16.msrb.mxu3 %v1440_v51 }
 0x45d   : > { %2800 = vmatmul.msk.bf16.vlgmr.msrb.gmra.mxu2 %vm350_vm2, %v3693_v55  ;;  %2804 = vmatmul.msk.bf16.vlgmr.msrb.gmra.mxu3 %vm350_vm2, %v3693_v55 }
 0x45e   : > { %1674 = vmatpush.bf16.msra.mxu2 %v1662_v9  ;;  %1693 = vmatpush.bf16.msra.mxu3 %v1665_v6  ;;  %v2834_v9 = vld [vmem:[%s3023_s22 + $0x58] sm:$0xff]  ;;  %v4530_v6 = vmax.f32 %v3610_v26, %v3588_v1 }
 0x45f   : > { %v1794_v51 = vunpack.c.l.b16 %v2834_v9  ;;  %v1795_v5 = vunpack.c.h.b16 %v2834_v9 }
 0x461   : > { %2815 = vmatmul.msk.bf16.gmra.mxu0 %vm350_vm2, %v3718_v30  ;;  %2819 = vmatmul.msk.bf16.gmra.mxu1 %vm350_vm2, %v3718_v30  ;;  %v1796_v59 = vpack.c.b16 %v1794_v51, %v1794_v51  ;;  %v1797_v11 = vpack.c.b16 %v1795_v5, %v1795_v5 }
 0x463   : > { %v1799_v27 = vsel %vm273_vm0, %v1796_v59, 0  ;;  %v1802_v54 = vsel %vm273_vm0, %v1797_v11, 0 }
 0x464   : > { %1811 = vmatpush.bf16.msra.mxu0 %v1799_v27  ;;  %1830 = vmatpush.bf16.msra.mxu1 %v1802_v54 }
 0x46d   : > { %2801 = vmatmul.msk.bf16.gmra.mxu2 %vm350_vm2, %v3703_v48  ;;  %2805 = vmatmul.msk.bf16.gmra.mxu3 %vm350_vm2, %v3703_v48 }
 0x471   : > { %2816 = vmatmul.msk.bf16.gmra.mxu0 %vm350_vm2, %v3732_v46  ;;  %2820 = vmatmul.msk.bf16.gmra.mxu1 %vm350_vm2, %v3732_v46 }
 0x47d   : > { %2802 = vmatmul.msk.bf16.gmra.mxu2 %vm350_vm2, %v3718_v30  ;;  %2806 = vmatmul.msk.bf16.gmra.mxu3 %vm350_vm2, %v3718_v30 }
 0x481   : > { %2835 = vmatmul.msk.bf16.vlgmr.msra.gmra.mxu0 %vm266_vm1, %v3576_v0  ;;  %2837 = vmatmul.msk.bf16.vlgmr.msra.gmra.mxu1 %vm266_vm1, %v3576_v0 }
 0x48d   : > { %2803 = vmatmul.msk.bf16.gmra.mxu2 %vm350_vm2, %v3732_v46  ;;  %2807 = vmatmul.msk.bf16.gmra.mxu3 %vm350_vm2, %v3732_v46 }
 0x491   : > { %2836 = vmatmul.msk.bf16.gmra.mxu0 %vm266_vm1, %v3755_v38  ;;  %2838 = vmatmul.msk.bf16.gmra.mxu1 %vm266_vm1, %v3755_v38 }
 0x49d   : > { %2822 = vmatmul.msk.bf16.vlgmr.msra.gmra.mxu2 %vm266_vm1, %v3576_v0  ;;  %2824 = vmatmul.msk.bf16.vlgmr.msra.gmra.mxu3 %vm266_vm1, %v3576_v0 }
 0x4ad   : > { %2823 = vmatmul.msk.bf16.gmra.mxu2 %vm266_vm1, %v3755_v38  ;;  %2825 = vmatmul.msk.bf16.gmra.mxu3 %vm266_vm1, %v3755_v38 }
 0x4be   : > { %v3769_v16 = vpop.f32.mrf.mxu0  ;;  %v3771_v43 = vpop.f32.mrf.mxu1 }
 0x4c6   : > { %v3773_v49 = vpop.f32.mrf.mxu0  ;;  %v3775_v56 = vpop.f32.mrf.mxu1 }
 0x4c7   : > { %4525 = vst [vmem:[#allocation50_spill] sm:$0xff] %v3773_v49 }
 0x4c8   : > { %4526 = vst [vmem:[#allocation51_spill] sm:$0xff] %v3775_v56 }
 0x4ce   : > { %v3777_v8 = vpop.f32.mrf.mxu0  ;;  %v3779_v2 = vpop.f32.mrf.mxu1 }
 0x4d6   : > { %v3781_v45 = vpop.f32.mrf.mxu0  ;;  %v3783_v3 = vpop.f32.mrf.mxu1 }
 0x4d7   : > { %4527 = vst [vmem:[#allocation52_spill] sm:$0xff] %v3781_v45 }
 0x4d8   : > { %4528 = vst [vmem:[#allocation53_spill] sm:$0xff] %v3783_v3 }
 0x4de   : > { %v3785_v42 = vpop.f32.mrf.mxu0  ;;  %v3787_v36 = vpop.f32.mrf.mxu1 }
 0x4e0   : > { %v1452_v21 = vpop.f32.mrf.mxu2  ;;  %v1481_v60 = vpop.f32.mrf.mxu3 }
 0x4e1   : > { %v3792_v35 = vmax.f32 %v4529_v37, %v1452_v21  ;;  %v3797_v9 = vmax.f32 %v4530_v6, %v1481_v60  ;;  %v4535_v21 = vmax.f32 %v3631_v18, %v3594_v47  ;;  %v4536_v37 = vmax.f32 %v3636_v29, %v3596_v41 }
 0x4e2   : > { %v4541_v29 = vmax.f32 %v3657_v15, %v3616_v17 }
 0x4e6   : > { %v3803_v59 = vpop.f32.mrf.mxu0  ;;  %v3805_v11 = vpop.f32.mrf.mxu1 }
 0x4e7   : > { %4531 = vst [vmem:[#allocation54_spill] sm:$0xff] %v3803_v59 }
 0x4e8   : > { %4532 = vst [vmem:[#allocation55_spill] sm:$0xff] %v3805_v11  ;;  %v3807_v27 = vpop.f32.mrf.mxu2  ;;  %v3809_v12 = vpop.f32.mrf.mxu3 }
 0x4e9   : > { %4533 = vst [vmem:[#allocation56_spill] sm:$0xff] %v3807_v27 }
 0x4ea   : > { %4534 = vst [vmem:[#allocation57_spill] sm:$0xff] %v3809_v12 }
 0x4ee   : > { %v3811_v40 = vpop.f32.mrf.mxu0  ;;  %v3813_v54 = vpop.f32.mrf.mxu1 }
 0x4f0   : > { %v1457_v1 = vpop.f32.mrf.mxu2  ;;  %v1486_v26 = vpop.f32.mrf.mxu3 }
 0x4f1   : > { %v3818_v60 = vmax.f32 %v4535_v21, %v1457_v1  ;;  %v3823_v6 = vmax.f32 %v4536_v37, %v1486_v26  ;;  %v4542_v37 = vmax.f32 %v3662_v52, %v3618_v39  ;;  %v4545_v39 = vmax.f32 %v3675_v62, %v3642_v34 }
 0x4f6   : > { %v3829_v11 = vpop.f32.mrf.mxu0  ;;  %v3831_v59 = vpop.f32.mrf.mxu1 }
 0x4f7   : > { %4537 = vst [vmem:[#allocation58_spill] sm:$0xff] %v3829_v11 }
 0x4f8   : > { %4538 = vst [vmem:[#allocation59_spill] sm:$0xff] %v3831_v59  ;;  %v3833_v3 = vpop.f32.mrf.mxu2  ;;  %v3835_v47 = vpop.f32.mrf.mxu3 }
 0x4f9   : > { %4539 = vst [vmem:[#allocation60_spill] sm:$0xff] %v3833_v3 }
 0x4fa   : > { %4540 = vst [vmem:[#allocation61_spill] sm:$0xff] %v3835_v47 }
 0x4fe   : > { %v1813_v18 = vpop.f32.mrf.mxu0  ;;  %v1832_v1 = vpop.f32.mrf.mxu1 }
 0x4ff   : > { %v1842_v56 = vmax.f32 %v1813_v18, 0.0  ;;  %v1843_v49 = vmax.f32 %v1832_v1, 0.0 }
 0x500   : > { %v1462_v21 = vpop.f32.mrf.mxu2  ;;  %v1491_v41 = vpop.f32.mrf.mxu3 }
 0x501   : > { %v3840_v26 = vmax.f32 %v4541_v29, %v1462_v21  ;;  %v3845_v51 = vmax.f32 %v4542_v37, %v1491_v41  ;;  %v4546_v41 = vmax.f32 %v3680_v63, %v3644_v31 }
 0x506   : > { %v1815_v11 = vpop.f32.mrf.mxu0  ;;  %v1834_v45 = vpop.f32.mrf.mxu1 }
 0x507   : > { %v1844_v34 = vmax.f32 %v1815_v11, 0.0  ;;  %v1845_v62 = vmax.f32 %v1834_v45, 0.0 }
 0x508   : > { %v3851_v47 = vpop.f32.mrf.mxu2  ;;  %v3853_v3 = vpop.f32.mrf.mxu3 }
 0x509   : > { %4543 = vst [vmem:[#allocation62_spill] sm:$0xff] %v3851_v47  ;;  %v1851_v59 = vpack.c.bf16 %v1845_v62, %v1843_v49  ;;  %v2847_v49 = vld [vmem:[%s3023_s22 + $0x60] sm:$0xff] }
 0x50a   : > { %4544 = vst [vmem:[#allocation63_spill] sm:$0xff] %v3853_v3 }
 0x50e   : > { %v1818_v17 = vpop.f32.mrf.mxu0  ;;  %v1837_v15 = vpop.f32.mrf.mxu1 }
 0x50f   : > { %v1846_v3 = vmax.f32 %v1818_v17, 0.0  ;;  %v1847_v47 = vmax.f32 %v1837_v15, 0.0 }
 0x510   : > { %v1467_v21 = vpop.f32.mrf.mxu2  ;;  %v1496_v29 = vpop.f32.mrf.mxu3 }
 0x511   : > { %v3858_v52 = vmax.f32 %v4545_v39, %v1467_v21  ;;  %v3863_v37 = vmax.f32 %v4546_v41, %v1496_v29  ;;  %v1850_v41 = vpack.c.bf16 %v1844_v34, %v1842_v56 }
 0x516   : > { %v1820_v12 = vpop.f32.mrf.mxu0  ;;  %v1839_v27 = vpop.f32.mrf.mxu1 }
 0x517   : > { %v1848_v21 = vmax.f32 %v1820_v12, 0.0  ;;  %v1849_v39 = vmax.f32 %v1839_v27, 0.0  ;;  %v1931_v12 = vunpack.c.l.b16 %v2847_v49 }
 0x518   : > { %v3869_v20 = vpop.f32.mrf.mxu2  ;;  %v3871_v31 = vpop.f32.mrf.mxu3 }
 0x519   : > { %4547 = vst [vmem:[#allocation64_spill] sm:$0xff] %v3869_v20  ;;  %v1852_v63 = vpack.c.bf16 %v1848_v21, %v1846_v3  ;;  %v1853_v29 = vpack.c.bf16 %v1849_v39, %v1847_v47  ;;  %v1932_v47 = vunpack.c.h.b16 %v2847_v49 }
 0x51a   : > { %4548 = vst [vmem:[#allocation65_spill] sm:$0xff] %v3871_v31 }
 0x51b   : > { %1860 = vmatpush.bf16.msrb.mxu0 %v1852_v63  ;;  %1889 = vmatpush.bf16.msrb.mxu1 %v1853_v29  ;;  %v1934_v5 = vpack.c.b16 %v1932_v47, %v1932_v47 }
 0x51f   : > { %1861 = vmatpush.bf16.msrb.mxu0 %v1850_v41  ;;  %1890 = vmatpush.bf16.msrb.mxu1 %v1851_v59  ;;  %v1933_v41 = vpack.c.b16 %v1931_v12, %v1931_v12 }
 0x520   : > { %v1676_v18 = vpop.f32.mrf.mxu2  ;;  %v1695_v1 = vpop.f32.mrf.mxu3 }
 0x521   : > { %v1705_v31 = vmax.f32 %v1676_v18, 0.0  ;;  %v1706_v20 = vmax.f32 %v1695_v1, 0.0  ;;  %v1936_v25 = vsel %vm273_vm0, %v1933_v41, 0 }
 0x522   : > { %2839 = vmatmul.msk.bf16.vlgmr.msrb.gmra.mxu0 %vm350_vm2, %v3693_v55  ;;  %2843 = vmatmul.msk.bf16.vlgmr.msrb.gmra.mxu1 %vm350_vm2, %v3693_v55 }
 0x528   : > { %v1678_v45 = vpop.f32.mrf.mxu2  ;;  %v1697_v11 = vpop.f32.mrf.mxu3 }
 0x529   : > { %v1707_v21 = vmax.f32 %v1678_v45, 0.0  ;;  %v1708_v39 = vmax.f32 %v1697_v11, 0.0 }
 0x52b   : > { %v1713_v4 = vpack.c.bf16 %v1707_v21, %v1705_v31  ;;  %v1714_v33 = vpack.c.bf16 %v1708_v39, %v1706_v20  ;;  %v2860_v20 = vld [vmem:[%s3023_s22 + $0x68] sm:$0xff]  ;;  %v4554_v39 = vmax.f32 %v3797_v9, %v3771_v43 }
 0x52c   : > { %v2068_v31 = vunpack.c.l.b16 %v2860_v20  ;;  %v2069_v18 = vunpack.c.h.b16 %v2860_v20 }
 0x530   : > { %v1681_v27 = vpop.f32.mrf.mxu2  ;;  %v1700_v3 = vpop.f32.mrf.mxu3 }
 0x531   : > { %v1709_v17 = vmax.f32 %v1681_v27, 0.0  ;;  %v1710_v15 = vmax.f32 %v1700_v3, 0.0  ;;  %v1939_v27 = vsel %vm273_vm0, %v1934_v5, 0  ;;  %v2070_v5 = vpack.c.b16 %v2068_v31, %v2068_v31 }
 0x532   : > { %2840 = vmatmul.msk.bf16.gmra.mxu0 %vm350_vm2, %v3703_v48  ;;  %2844 = vmatmul.msk.bf16.gmra.mxu1 %vm350_vm2, %v3703_v48 }
 0x538   : > { %v1683_v56 = vpop.f32.mrf.mxu2  ;;  %v1702_v59 = vpop.f32.mrf.mxu3 }
 0x539   : > { %v1711_v34 = vmax.f32 %v1683_v56, 0.0  ;;  %v1712_v62 = vmax.f32 %v1702_v59, 0.0 }
 0x53b   : > { %v1715_v63 = vpack.c.bf16 %v1711_v34, %v1709_v17  ;;  %v1716_v29 = vpack.c.bf16 %v1712_v62, %v1710_v15  ;;  %v4553_v62 = vmax.f32 %v3792_v35, %v3769_v16 }
 0x53d   : > { %1723 = vmatpush.bf16.msrb.mxu2 %v1715_v63  ;;  %1752 = vmatpush.bf16.msrb.mxu3 %v1716_v29 }
 0x541   : > { %1724 = vmatpush.bf16.msrb.mxu2 %v1713_v4  ;;  %1753 = vmatpush.bf16.msrb.mxu3 %v1714_v33  ;;  %v2071_v4 = vpack.c.b16 %v2069_v18, %v2069_v18  ;;  %v2073_v33 = vsel %vm273_vm0, %v2070_v5, 0  ;;  %v4557_v5 = vmax.f32 %v3818_v60, %v3777_v8 }
 0x542   : > { %2841 = vmatmul.msk.bf16.gmra.mxu0 %vm350_vm2, %v3718_v30  ;;  %2845 = vmatmul.msk.bf16.gmra.mxu1 %vm350_vm2, %v3718_v30 }
 0x543   : > { %v2076_v1 = vsel %vm273_vm0, %v2071_v4, 0  ;;  %2085 = vmatpush.bf16.msra.mxu0 %v2073_v33  ;;  %v4558_v33 = vmax.f32 %v3823_v6, %v3779_v2  ;;  %v4561_v6 = vmax.f32 %v3840_v26, %v3785_v42 }
 0x544   : > { %2826 = vmatmul.msk.bf16.vlgmr.msrb.gmra.mxu2 %vm350_vm2, %v3693_v55  ;;  %2830 = vmatmul.msk.bf16.vlgmr.msrb.gmra.mxu3 %vm350_vm2, %v3693_v55 }
 0x545   : > { %1948 = vmatpush.bf16.msra.mxu2 %v1936_v25  ;;  %1967 = vmatpush.bf16.msra.mxu3 %v1939_v27 }
 0x546   : > { %2104 = vmatpush.bf16.msra.mxu1 %v2076_v1 }
 0x552   : > { %2842 = vmatmul.msk.bf16.gmra.mxu0 %vm350_vm2, %v3732_v46  ;;  %2846 = vmatmul.msk.bf16.gmra.mxu1 %vm350_vm2, %v3732_v46 }
 0x554   : > { %2827 = vmatmul.msk.bf16.gmra.mxu2 %vm350_vm2, %v3703_v48  ;;  %2831 = vmatmul.msk.bf16.gmra.mxu3 %vm350_vm2, %v3703_v48 }
 0x562   : > { %2861 = vmatmul.msk.bf16.vlgmr.msra.gmra.mxu0 %vm266_vm1, %v3576_v0  ;;  %2863 = vmatmul.msk.bf16.vlgmr.msra.gmra.mxu1 %vm266_vm1, %v3576_v0 }
 0x564   : > { %2828 = vmatmul.msk.bf16.gmra.mxu2 %vm350_vm2, %v3718_v30  ;;  %2832 = vmatmul.msk.bf16.gmra.mxu3 %vm350_vm2, %v3718_v30 }
 0x572   : > { %2862 = vmatmul.msk.bf16.gmra.mxu0 %vm266_vm1, %v3755_v38  ;;  %2864 = vmatmul.msk.bf16.gmra.mxu1 %vm266_vm1, %v3755_v38 }
 0x574   : > { %2829 = vmatmul.msk.bf16.gmra.mxu2 %vm350_vm2, %v3732_v46  ;;  %2833 = vmatmul.msk.bf16.gmra.mxu3 %vm350_vm2, %v3732_v46 }
 0x584   : > { %2848 = vmatmul.msk.bf16.vlgmr.msra.gmra.mxu2 %vm266_vm1, %v3576_v0  ;;  %2850 = vmatmul.msk.bf16.vlgmr.msra.gmra.mxu3 %vm266_vm1, %v3576_v0 }
 0x594   : > { %2849 = vmatmul.msk.bf16.gmra.mxu2 %vm266_vm1, %v3755_v38  ;;  %2851 = vmatmul.msk.bf16.gmra.mxu3 %vm266_vm1, %v3755_v38 }
 0x59f   : > { %v3927_v25 = vpop.f32.mrf.mxu0  ;;  %v3929_v45 = vpop.f32.mrf.mxu1 }
 0x5a7   : > { %v3931_v11 = vpop.f32.mrf.mxu0  ;;  %v3933_v3 = vpop.f32.mrf.mxu1 }
 0x5af   : > { %v3935_v49 = vpop.f32.mrf.mxu0  ;;  %v3937_v56 = vpop.f32.mrf.mxu1 }
 0x5b7   : > { %v3939_v59 = vpop.f32.mrf.mxu0  ;;  %v3941_v12 = vpop.f32.mrf.mxu1 }
 0x5b8   : > { %4549 = vst [vmem:[#allocation66_spill] sm:$0xff] %v3939_v59 }
 0x5b9   : > { %4550 = vst [vmem:[#allocation67_spill] sm:$0xff] %v3941_v12 }
 0x5bf   : > { %v3943_v47 = vpop.f32.mrf.mxu0  ;;  %v3945_v17 = vpop.f32.mrf.mxu1 }
 0x5c0   : > { %4551 = vst [vmem:[#allocation68_spill] sm:$0xff] %v3943_v47 }
 0x5c1   : > { %4552 = vst [vmem:[#allocation69_spill] sm:$0xff] %v3945_v17 }
 0x5c7   : > { %v1726_v15 = vpop.f32.mrf.mxu2  ;;  %v1755_v34 = vpop.f32.mrf.mxu3 }
 0x5c8   : > { %v3950_v21 = vmax.f32 %v4553_v62, %v1726_v15  ;;  %v3955_v63 = vmax.f32 %v4554_v39, %v1755_v34  ;;  %v3957_v29 = vpop.f32.mrf.mxu0  ;;  %v3959_v41 = vpop.f32.mrf.mxu1 }
 0x5c9   : > { %4555 = vst [vmem:[#allocation70_spill] sm:$0xff] %v3957_v29 }
 0x5ca   : > { %4556 = vst [vmem:[#allocation71_spill] sm:$0xff] %v3959_v41 }
 0x5cf   : > { %v3965_v31 = vpop.f32.mrf.mxu2  ;;  %v3967_v16 = vpop.f32.mrf.mxu3 }
 0x5d0   : > { %v3969_v35 = vpop.f32.mrf.mxu0  ;;  %v3971_v18 = vpop.f32.mrf.mxu1 }
 0x5d7   : > { %v1731_v43 = vpop.f32.mrf.mxu2  ;;  %v1760_v9 = vpop.f32.mrf.mxu3 }
 0x5d8   : > { %v3976_v4 = vmax.f32 %v4557_v5, %v1731_v43  ;;  %v3981_v1 = vmax.f32 %v4558_v33, %v1760_v9  ;;  %v3983_v15 = vpop.f32.mrf.mxu0  ;;  %v3985_v34 = vpop.f32.mrf.mxu1  ;;  %v4563_v33 = vmax.f32 %v3845_v51, %v3787_v36  ;;  %v4567_v51 = vmax.f32 %v3858_v52, %v3811_v40 }
 0x5d9   : > { %4559 = vst [vmem:[#allocation72_spill] sm:$0xff] %v3983_v15 }
 0x5da   : > { %4560 = vst [vmem:[#allocation73_spill] sm:$0xff] %v3985_v34 }
 0x5df   : > { %v3991_v20 = vpop.f32.mrf.mxu2  ;;  %v3993_v8 = vpop.f32.mrf.mxu3 }
 0x5e0   : > { %v2087_v60 = vpop.f32.mrf.mxu0  ;;  %v2106_v43 = vpop.f32.mrf.mxu1 }
 0x5e1   : > { %v2116_v15 = vmax.f32 %v2087_v60, 0.0 }
 0x5e7   : > { %v1736_v5 = vpop.f32.mrf.mxu2  ;;  %v1765_v2 = vpop.f32.mrf.mxu3 }
 0x5e8   : > { %v3998_v9 = vmax.f32 %v4561_v6, %v1736_v5  ;;  %v4003_v62 = vmax.f32 %v4563_v33, %v1765_v2  ;;  %v2089_v27 = vpop.f32.mrf.mxu0  ;;  %v2108_v39 = vpop.f32.mrf.mxu1  ;;  %v4568_v33 = vmax.f32 %v3863_v37, %v3813_v54 }
 0x5e9   : > { %v2119_v47 = vmax.f32 %v2108_v39, 0.0 }
 0x5ea   : > { %4562 = vst [vmem:[#allocation74_spill] sm:$0xff] %v3998_v9 }
 0x5eb   : > { %4564 = vst [vmem:[#allocation75_spill] sm:$0xff] %v4003_v62  ;;  %v2118_v62 = vmax.f32 %v2089_v27, 0.0  ;;  %v2873_v27 = vld [vmem:[%s3023_s22 + $0x70] sm:$0xff] }
 0x5ef   : > { %v4009_v41 = vpop.f32.mrf.mxu2  ;;  %v4011_v29 = vpop.f32.mrf.mxu3 }
 0x5f0   : > { %4565 = vst [vmem:[#allocation76_spill] sm:$0xff] %v4009_v41  ;;  %v2092_v42 = vpop.f32.mrf.mxu0  ;;  %v2111_v26 = vpop.f32.mrf.mxu1  ;;  %v2117_v41 = vmax.f32 %v2106_v43, 0.0 }
 0x5f1   : > { %4566 = vst [vmem:[#allocation77_spill] sm:$0xff] %v4011_v29  ;;  %v2120_v12 = vmax.f32 %v2092_v42, 0.0  ;;  %v2121_v36 = vmax.f32 %v2111_v26, 0.0 }
 0x5f2   : > { %v2125_v54 = vpack.c.bf16 %v2119_v47, %v2117_v41 }
 0x5f7   : > { %v1741_v5 = vpop.f32.mrf.mxu2  ;;  %v1770_v6 = vpop.f32.mrf.mxu3 }
 0x5f8   : > { %v4016_v2 = vmax.f32 %v4567_v51, %v1741_v5  ;;  %v4021_v34 = vmax.f32 %v4568_v33, %v1770_v6  ;;  %v2094_v17 = vpop.f32.mrf.mxu0  ;;  %v2113_v29 = vpop.f32.mrf.mxu1  ;;  %v2124_v5 = vpack.c.bf16 %v2118_v62, %v2116_v15  ;;  %v2205_v15 = vunpack.c.l.b16 %v2873_v27 }
 0x5f9   : > { %v2122_v9 = vmax.f32 %v2094_v17, 0.0  ;;  %v2123_v59 = vmax.f32 %v2113_v29, 0.0  ;;  %v2206_v62 = vunpack.c.h.b16 %v2873_v27 }
 0x5fb   : > { %v2126_v52 = vpack.c.bf16 %v2122_v9, %v2120_v12  ;;  %v2127_v26 = vpack.c.bf16 %v2123_v59, %v2121_v36  ;;  %v2208_v40 = vpack.c.b16 %v2206_v62, %v2206_v62 }
 0x5fd   : > { %2134 = vmatpush.bf16.msrb.mxu0 %v2126_v52  ;;  %2163 = vmatpush.bf16.msrb.mxu1 %v2127_v26 }
 0x5ff   : > { %v4027_v37 = vpop.f32.mrf.mxu2  ;;  %v4029_v60 = vpop.f32.mrf.mxu3 }
 0x600   : > { %4569 = vst [vmem:[#allocation78_spill] sm:$0xff] %v4029_v60 }
 0x601   : > { %2135 = vmatpush.bf16.msrb.mxu0 %v2124_v5  ;;  %2164 = vmatpush.bf16.msrb.mxu1 %v2125_v54  ;;  %v2207_v54 = vpack.c.b16 %v2205_v15, %v2205_v15 }
 0x604   : > { %2865 = vmatmul.msk.bf16.vlgmr.msrb.gmra.mxu0 %vm350_vm2, %v3693_v55  ;;  %2869 = vmatmul.msk.bf16.vlgmr.msrb.gmra.mxu1 %vm350_vm2, %v3693_v55 }
 0x607   : > { %v1950_v17 = vpop.f32.mrf.mxu2  ;;  %v1969_v12 = vpop.f32.mrf.mxu3 }
 0x608   : > { %v1979_v42 = vmax.f32 %v1950_v17, 0.0  ;;  %v1980_v60 = vmax.f32 %v1969_v12, 0.0  ;;  %v2886_v17 = vld [vmem:[%s3023_s22 + $0x78] sm:$0xff] }
 0x609   : > { %v2342_v12 = vunpack.c.l.b16 %v2886_v17  ;;  %v2343_v27 = vunpack.c.h.b16 %v2886_v17 }
 0x60b   : > { %v2344_v15 = vpack.c.b16 %v2342_v12, %v2342_v12  ;;  %v4574_v12 = vld [vmem:[#allocation36_spill] sm:$0xff] }
 0x60f   : > { %v1952_v59 = vpop.f32.mrf.mxu2  ;;  %v1971_v29 = vpop.f32.mrf.mxu3 }
 0x610   : > { %v1981_v33 = vmax.f32 %v1952_v59, 0.0  ;;  %v1982_v52 = vmax.f32 %v1971_v29, 0.0  ;;  %v2210_v59 = vsel %vm273_vm0, %v2207_v54, 0  ;;  %v2213_v29 = vsel %vm273_vm0, %v2208_v40, 0 }
 0x614   : > { %2866 = vmatmul.msk.bf16.gmra.mxu0 %vm350_vm2, %v3703_v48  ;;  %2870 = vmatmul.msk.bf16.gmra.mxu1 %vm350_vm2, %v3703_v48 }
 0x617   : > { %v1955_v47 = vpop.f32.mrf.mxu2  ;;  %v1974_v41 = vpop.f32.mrf.mxu3 }
 0x618   : > { %v1983_v9 = vmax.f32 %v1955_v47, 0.0  ;;  %v1984_v6 = vmax.f32 %v1974_v41, 0.0  ;;  %v1987_v47 = vpack.c.bf16 %v1981_v33, %v1979_v42  ;;  %v1988_v41 = vpack.c.bf16 %v1982_v52, %v1980_v60 }
 0x619   : > { %v2345_v42 = vpack.c.b16 %v2343_v27, %v2343_v27  ;;  %v2347_v60 = vsel %vm273_vm0, %v2344_v15, 0  ;;  %v4575_v15 = vld [vmem:[#allocation37_spill] sm:$0xff] }
 0x61a   : > { %2359 = vmatpush.bf16.msra.mxu0 %v2347_v60  ;;  %v4577_v60 = vld [vmem:[#allocation57_spill] sm:$0xff] }
 0x61b   : > { %v2350_v62 = vsel %vm273_vm0, %v2345_v42, 0 }
 0x61c   : > { %2378 = vmatpush.bf16.msra.mxu1 %v2350_v62 }
 0x61f   : > { %v1957_v39 = vpop.f32.mrf.mxu2  ;;  %v1976_v43 = vpop.f32.mrf.mxu3 }
 0x620   : > { %v1985_v36 = vmax.f32 %v1957_v39, 0.0  ;;  %v1986_v51 = vmax.f32 %v1976_v43, 0.0 }
 0x622   : > { %v1989_v26 = vpack.c.bf16 %v1985_v36, %v1983_v9  ;;  %v1990_v5 = vpack.c.bf16 %v1986_v51, %v1984_v6  ;;  %v545_v36 = vmax.f32 %v3153_v23, %v3137_v14 }
 0x624   : > { %1997 = vmatpush.bf16.msrb.mxu2 %v1989_v26  ;;  %2026 = vmatpush.bf16.msrb.mxu3 %v1990_v5  ;;  %v682_v51 = vmax.f32 %v545_v36, %v3297_v10 }
 0x625   : > { %2867 = vmatmul.msk.bf16.gmra.mxu0 %vm350_vm2, %v3718_v30  ;;  %2871 = vmatmul.msk.bf16.gmra.mxu1 %vm350_vm2, %v3718_v30 }
 0x626   : > { %v819_v5 = vmax.f32 %v682_v51, %v3271_v58  ;;  %v4570_v58 = vld [vmem:[#allocation2_spill] sm:$0xff] }
 0x628   : > { %1998 = vmatpush.bf16.msrb.mxu2 %v1987_v47  ;;  %2027 = vmatpush.bf16.msrb.mxu3 %v1988_v41  ;;  %v956_v47 = vmax.f32 %v819_v5, %v3455_v7  ;;  %v4571_v41 = vld [vmem:[#allocation3_spill] sm:$0xff] }
 0x62a   : > { %v1093_v23 = vmax.f32 %v956_v47, %v3429_v61 }
 0x62b   : > { %2852 = vmatmul.msk.bf16.vlgmr.msrb.gmra.mxu2 %vm350_vm2, %v3693_v55  ;;  %2856 = vmatmul.msk.bf16.vlgmr.msrb.gmra.mxu3 %vm350_vm2, %v3693_v55 }
 0x62c   : > { %2222 = vmatpush.bf16.msra.mxu2 %v2210_v59  ;;  %2241 = vmatpush.bf16.msra.mxu3 %v2213_v29  ;;  %v1230_v10 = vmax.f32 %v1093_v23, %v3622_v44  ;;  %v4572_v59 = vld [vmem:[#allocation16_spill] sm:$0xff]  ;;  %v4573_v29 = vld [vmem:[#allocation17_spill] sm:$0xff] }
 0x635   : > { %2868 = vmatmul.msk.bf16.gmra.mxu0 %vm350_vm2, %v3732_v46  ;;  %2872 = vmatmul.msk.bf16.gmra.mxu1 %vm350_vm2, %v3732_v46 }
 0x63b   : > { %2853 = vmatmul.msk.bf16.gmra.mxu2 %vm350_vm2, %v3703_v48  ;;  %2857 = vmatmul.msk.bf16.gmra.mxu3 %vm350_vm2, %v3703_v48 }
 0x645   : > { %2887 = vmatmul.msk.bf16.vlgmr.msra.gmra.mxu0 %vm266_vm1, %v3576_v0  ;;  %2889 = vmatmul.msk.bf16.vlgmr.msra.gmra.mxu1 %vm266_vm1, %v3576_v0 }
 0x64b   : > { %2854 = vmatmul.msk.bf16.gmra.mxu2 %vm350_vm2, %v3718_v30  ;;  %2858 = vmatmul.msk.bf16.gmra.mxu3 %vm350_vm2, %v3718_v30 }
 0x655   : > { %2888 = vmatmul.msk.bf16.gmra.mxu0 %vm266_vm1, %v3755_v38  ;;  %2890 = vmatmul.msk.bf16.gmra.mxu1 %vm266_vm1, %v3755_v38 }
 0x65b   : > { %2855 = vmatmul.msk.bf16.gmra.mxu2 %vm350_vm2, %v3732_v46  ;;  %2859 = vmatmul.msk.bf16.gmra.mxu3 %vm350_vm2, %v3732_v46 }
 0x66b   : > { %2874 = vmatmul.msk.bf16.vlgmr.msra.gmra.mxu2 %vm266_vm1, %v3576_v0  ;;  %2876 = vmatmul.msk.bf16.vlgmr.msra.gmra.mxu3 %vm266_vm1, %v3576_v0  ;;  %v544_v0 = vmax.f32 %v3151_v22, %v3135_v13 }
 0x67b   : > { %2875 = vmatmul.msk.bf16.gmra.mxu2 %vm266_vm1, %v3755_v38  ;;  %2877 = vmatmul.msk.bf16.gmra.mxu3 %vm266_vm1, %v3755_v38  ;;  %v681_v38 = vmax.f32 %v544_v0, %v3295_v53  ;;  %v4579_v0 = vld [vmem:[#allocation13_spill] sm:$0xff] }
 0x67d   : > { %v818_v26 = vmax.f32 %v681_v38, %v3269_v50  ;;  %v548_v50 = vmax.f32 %v3171_v32, %v3155_v24  ;;  %v4578_v24 = vld [vmem:[#allocation12_spill] sm:$0xff] }
 0x67e   : > { %v4580_v38 = vld [vmem:[#allocation28_spill] sm:$0xff] }
 0x67f   : > { %v955_v54 = vmax.f32 %v818_v26, %v3453_v19  ;;  %v549_v19 = vmax.f32 %v4571_v41, %v4570_v58  ;;  %v685_v7 = vmax.f32 %v548_v50, %v4572_v59  ;;  %v4581_v26 = vld [vmem:[#allocation29_spill] sm:$0xff]  ;;  %v4584_v50 = vmax.f32 %v3950_v21, %v3927_v25  ;;  %v4586_v21 = vld [vmem:[#allocation24_spill] sm:$0xff] }
 0x680   : > { %v4585_v41 = vmax.f32 %v3955_v63, %v3929_v45  ;;  %v4588_v63 = vld [vmem:[#allocation42_spill] sm:$0xff] }
 0x681   : > { %v4085_v40 = vpop.f32.mrf.mxu0  ;;  %v4087_v39 = vpop.f32.mrf.mxu1  ;;  %v1092_v14 = vmax.f32 %v955_v54, %v3427_v57  ;;  %v686_v17 = vmax.f32 %v549_v19, %v4573_v29  ;;  %v1367_v57 = vmax.f32 %v1230_v10, %v4575_v15  ;;  %v822_v32 = vmax.f32 %v685_v7, %v4578_v24  ;;  %v4587_v15 = vld [vmem:[#allocation25_spill] sm:$0xff] }
 0x683   : > { %v1229_v53 = vmax.f32 %v1092_v14, %v3620_v28  ;;  %v4576_v28 = vld [vmem:[#allocation56_spill] sm:$0xff]  ;;  %v1504_v62 = vmax.f32 %v1367_v57, %v4577_v60  ;;  %v823_v36 = vmax.f32 %v686_v17, %v4579_v0  ;;  %v959_v51 = vmax.f32 %v822_v32, %v4580_v38  ;;  %v4582_v14 = vld [vmem:[#allocation50_spill] sm:$0xff]  ;;  %v4592_v32 = vld [vmem:[#allocation5_spill] sm:$0xff] }
 0x684   : > { %v4590_v60 = vld [vmem:[#allocation4_spill] sm:$0xff]  ;;  %v4593_v0 = vld [vmem:[#allocation7_spill] sm:$0xff] }
 0x685   : > { %v1366_v27 = vmax.f32 %v1229_v53, %v4574_v12  ;;  %v960_v5 = vmax.f32 %v823_v36, %v4581_v26  ;;  %v4583_v53 = vld [vmem:[#allocation51_spill] sm:$0xff]  ;;  %v553_v36 = vmax.f32 %v4593_v0, %v4592_v32  ;;  %v4604_v0 = vld [vmem:[#allocation52_spill] sm:$0xff] }
 0x686   : > { %v1641_v10 = vmax.f32 %v1504_v62, %v4583_v53  ;;  %v4591_v62 = vld [vmem:[#allocation6_spill] sm:$0xff] }
 0x687   : > { %v1503_v44 = vmax.f32 %v1366_v27, %v4576_v28  ;;  %v1096_v27 = vmax.f32 %v959_v51, %v4586_v21  ;;  %v1097_v45 = vmax.f32 %v960_v5, %v4587_v15  ;;  %v4589_v28 = vld [vmem:[#allocation43_spill] sm:$0xff]  ;;  %v552_v24 = vmax.f32 %v4591_v62, %v4590_v60  ;;  %v4594_v5 = vld [vmem:[#allocation20_spill] sm:$0xff]  ;;  %v4596_v53 = vld [vmem:[#allocation38_spill] sm:$0xff] }
 0x688   : > { %v1778_v7 = vmax.f32 %v1641_v10, %v3967_v16  ;;  %v4597_v10 = vld [vmem:[#allocation39_spill] sm:$0xff]  ;;  %v4598_v21 = vld [vmem:[#allocation60_spill] sm:$0xff]  ;;  %v4599_v15 = vld [vmem:[#allocation61_spill] sm:$0xff] }
 0x689   : > { %v4089_v43 = vpop.f32.mrf.mxu0  ;;  %v4091_v9 = vpop.f32.mrf.mxu1  ;;  %v1640_v23 = vmax.f32 %v1503_v44, %v4582_v14  ;;  %v1233_v57 = vmax.f32 %v1096_v27, %v4588_v63  ;;  %v4595_v14 = vld [vmem:[#allocation21_spill] sm:$0xff]  ;;  %v4600_v63 = vld [vmem:[#allocation14_spill] sm:$0xff] }
 0x68a   : > { %v1915_v44 = vmax.f32 %v1778_v7, %v3933_v3  ;;  %v4603_v60 = vld [vmem:[#allocation33_spill] sm:$0xff] }
 0x68b   : > { %v1777_v59 = vmax.f32 %v1640_v23, %v3965_v31  ;;  %v1234_v31 = vmax.f32 %v1097_v45, %v4589_v28  ;;  %v690_v23 = vmax.f32 %v553_v36, %v4595_v14 }
 0x68d   : > { %v1914_v16 = vmax.f32 %v1777_v59, %v3931_v11  ;;  %v1370_v11 = vmax.f32 %v1233_v57, %v4596_v53  ;;  %v1371_v3 = vmax.f32 %v1234_v31, %v4597_v10  ;;  %v4631_v10 = vld [vmem:[#allocation68_spill] sm:$0xff] }
 0x68f   : > { %v1507_v27 = vmax.f32 %v1370_v11, %v4598_v21  ;;  %v1508_v45 = vmax.f32 %v1371_v3, %v4599_v15  ;;  %v4609_v15 = vld [vmem:[#allocation27_spill] sm:$0xff]  ;;  %v4630_v3 = vld [vmem:[#allocation74_spill] sm:$0xff] }
 0x691   : > { %v4093_v46 = vpop.f32.mrf.mxu0  ;;  %v4095_v6 = vpop.f32.mrf.mxu1  ;;  %v1644_v36 = vmax.f32 %v1507_v27, %v4604_v0  ;;  %v4617_v0 = vld [vmem:[#allocation11_spill] sm:$0xff] }
 0x699   : > { %v4103_v33 = vpop.f32.mrf.mxu0  ;;  %v4105_v52 = vpop.f32.mrf.mxu1 }
 0x6a2   : > { %v4111_v13 = vpop.f32.mrf.mxu0  ;;  %v4113_v22 = vpop.f32.mrf.mxu1 }
 0x6aa   : > { %v4127_v42 = vpop.f32.mrf.mxu0  ;;  %v4129_v61 = vpop.f32.mrf.mxu1 }
 0x6ae   : > { %v2000_v54 = vpop.f32.mrf.mxu2  ;;  %v2029_v47 = vpop.f32.mrf.mxu3 }
 0x6af   : > { %v4142_v58 = vmax.f32 %v4584_v50, %v2000_v54  ;;  %v4147_v19 = vmax.f32 %v4585_v41, %v2029_v47  ;;  %v689_v47 = vmax.f32 %v552_v24, %v4594_v5  ;;  %v4606_v5 = vmax.f32 %v3976_v4, %v3935_v49  ;;  %v4608_v4 = vld [vmem:[#allocation26_spill] sm:$0xff] }
 0x6b0   : > { %v4632_v41 = vmax.f32 %v4630_v3, %v4631_v10  ;;  %v4639_v10 = vld [vmem:[#allocation31_spill] sm:$0xff] }
 0x6b1   : > { %v2186_v29 = vmax.f32 %v4142_v58, %v4085_v40  ;;  %v826_v28 = vmax.f32 %v689_v47, %v4600_v63  ;;  %v4607_v47 = vmax.f32 %v3981_v1, %v3937_v56  ;;  %v4610_v1 = vld [vmem:[#allocation46_spill] sm:$0xff]  ;;  %v4611_v63 = vld [vmem:[#allocation47_spill] sm:$0xff] }
 0x6b2   : > { %v4155_v12 = vpop.f32.mrf.mxu0  ;;  %v4157_v25 = vpop.f32.mrf.mxu1 }
 0x6b6   : > { %v2002_v38 = vpop.f32.mrf.mxu2  ;;  %v2031_v26 = vpop.f32.mrf.mxu3 }
 0x6b7   : > { %v4169_v54 = vmax.f32 %v1914_v16, %v2002_v38  ;;  %v4171_v51 = vmax.f32 %v1915_v44, %v2031_v26  ;;  %v4601_v16 = vld [vmem:[#allocation15_spill] sm:$0xff]  ;;  %v4602_v44 = vld [vmem:[#allocation32_spill] sm:$0xff]  ;;  %v4605_v38 = vld [vmem:[#allocation53_spill] sm:$0xff] }
 0x6b8   : > { %v827_v57 = vmax.f32 %v690_v23, %v4601_v16  ;;  %v963_v31 = vmax.f32 %v826_v28, %v4602_v44  ;;  %v1645_v26 = vmax.f32 %v1508_v45, %v4605_v38  ;;  %v1781_v23 = vmax.f32 %v1644_v36, %v3991_v20  ;;  %v4612_v28 = vld [vmem:[#allocation66_spill] sm:$0xff]  ;;  %v4613_v16 = vld [vmem:[#allocation67_spill] sm:$0xff]  ;;  %v4614_v44 = vld [vmem:[#allocation8_spill] sm:$0xff] }
 0x6ba   : > { %v4181_v59 = vpop.f32.mrf.mxu0  ;;  %v4183_v7 = vpop.f32.mrf.mxu1  ;;  %v964_v62 = vmax.f32 %v827_v57, %v4603_v60  ;;  %v1782_v11 = vmax.f32 %v1645_v26, %v3993_v8  ;;  %v1100_v27 = vmax.f32 %v963_v31, %v4608_v4  ;;  %v1918_v8 = vmax.f32 %v1781_v23, %v4612_v28  ;;  %v4615_v60 = vld [vmem:[#allocation10_spill] sm:$0xff]  ;;  %v4619_v4 = vld [vmem:[#allocation23_spill] sm:$0xff] }
 0x6bc   : > { %v1101_v56 = vmax.f32 %v964_v62, %v4609_v15  ;;  %v1237_v45 = vmax.f32 %v1100_v27, %v4610_v1  ;;  %v1919_v57 = vmax.f32 %v1782_v11, %v4613_v16  ;;  %v4618_v62 = vld [vmem:[#allocation22_spill] sm:$0xff]  ;;  %v4620_v15 = vld [vmem:[#allocation40_spill] sm:$0xff]  ;;  %v4629_v1 = vld [vmem:[#allocation55_spill] sm:$0xff] }
 0x6be   : > { %v2005_v24 = vpop.f32.mrf.mxu2  ;;  %v2034_v32 = vpop.f32.mrf.mxu3  ;;  %v1238_v20 = vmax.f32 %v1101_v56, %v4611_v63  ;;  %v1374_v23 = vmax.f32 %v1237_v45, %v4620_v15  ;;  %v4621_v56 = vld [vmem:[#allocation41_spill] sm:$0xff]  ;;  %v4628_v15 = vld [vmem:[#allocation54_spill] sm:$0xff] }
 0x6bf   : > { %v4196_v14 = vmax.f32 %v4606_v5, %v2005_v24  ;;  %v4201_v53 = vmax.f32 %v4607_v47, %v2034_v32  ;;  %v556_v24 = vmax.f32 %v4615_v60, %v4614_v44  ;;  %v4616_v32 = vld [vmem:[#allocation9_spill] sm:$0xff] }
 0x6c0   : > { %v557_v36 = vmax.f32 %v4617_v0, %v4616_v32  ;;  %v1375_v11 = vmax.f32 %v1238_v20, %v4621_v56  ;;  %v4624_v32 = vld [vmem:[#allocation18_spill] sm:$0xff]  ;;  %v4625_v0 = vld [vmem:[#allocation19_spill] sm:$0xff] }
 0x6c1   : > { %v693_v47 = vmax.f32 %v556_v24, %v4618_v62 }
 0x6c2   : > { %v4209_v21 = vpop.f32.mrf.mxu0  ;;  %v4211_v49 = vpop.f32.mrf.mxu1  ;;  %v694_v27 = vmax.f32 %v557_v36, %v4619_v4 }
 0x6c3   : > { %v830_v24 = vmax.f32 %v693_v47, %v4624_v32 }
 0x6c4   : > { %v831_v36 = vmax.f32 %v694_v27, %v4625_v0  ;;  %v4636_v27 = vld [vmem:[#allocation76_spill] sm:$0xff] }
 0x6c6   : > { %v2007_v38 = vpop.f32.mrf.mxu2  ;;  %v2036_v26 = vpop.f32.mrf.mxu3 }
 0x6c7   : > { %v4223_v5 = vmax.f32 %v1918_v8, %v2007_v38  ;;  %v4225_v31 = vmax.f32 %v1919_v57, %v2036_v26  ;;  %v4622_v8 = vld [vmem:[#allocation62_spill] sm:$0xff]  ;;  %v4623_v57 = vld [vmem:[#allocation63_spill] sm:$0xff] }
 0x6c8   : > { %v1511_v44 = vmax.f32 %v1374_v23, %v4622_v8  ;;  %v1512_v60 = vmax.f32 %v1375_v11, %v4623_v57  ;;  %v4626_v38 = vld [vmem:[#allocation34_spill] sm:$0xff]  ;;  %v4627_v26 = vld [vmem:[#allocation35_spill] sm:$0xff]  ;;  %v4634_v8 = vld [vmem:[#allocation69_spill] sm:$0xff] }
 0x6c9   : > { %v967_v45 = vmax.f32 %v830_v24, %v4626_v38  ;;  %v968_v20 = vmax.f32 %v831_v36, %v4627_v26  ;;  %v4633_v11 = vld [vmem:[#allocation75_spill] sm:$0xff]  ;;  %v4637_v24 = vld [vmem:[#allocation77_spill] sm:$0xff]  ;;  %v4640_v26 = vld [vmem:[#allocation48_spill] sm:$0xff] }
 0x6ca   : > { %v2363_v28 = vpop.f32.mrf.mxu0  ;;  %v2382_v16 = vpop.f32.mrf.mxu1  ;;  %v1648_v56 = vmax.f32 %v1511_v44, %v4628_v15  ;;  %v1649_v63 = vmax.f32 %v1512_v60, %v4629_v1  ;;  %v4635_v47 = vmax.f32 %v4633_v11, %v4634_v8  ;;  %v4638_v44 = vld [vmem:[#allocation30_spill] sm:$0xff]  ;;  %v4643_v8 = vld [vmem:[#allocation71_spill] sm:$0xff]  ;;  %v4644_v1 = vld [vmem:[#allocation44_spill] sm:$0xff] }
 0x6cb   : > { %v1104_v60 = vmax.f32 %v967_v45, %v4638_v44  ;;  %v4642_v11 = vld [vmem:[#allocation70_spill] sm:$0xff]  ;;  %v4645_v44 = vld [vmem:[#allocation45_spill] sm:$0xff] }
 0x6cc   : > { %v1785_v32 = vmax.f32 %v1648_v56, %v4636_v27  ;;  %v1786_v0 = vmax.f32 %v1649_v63, %v4637_v24 }
 0x6ce   : > { %v2010_v62 = vpop.f32.mrf.mxu2  ;;  %v2039_v4 = vpop.f32.mrf.mxu3  ;;  %v1922_v56 = vmax.f32 %v1785_v32, %v4642_v11  ;;  %v1923_v63 = vmax.f32 %v1786_v0, %v4643_v8  ;;  %v2390_v11 = vmax.f32 %v4209_v21, 0.0  ;;  %v4650_v21 = vmax.f32 %v4016_v2, %v3969_v35  ;;  %v4653_v2 = vld [vmem:[#allocation72_spill] sm:$0xff] }
 0x6cf   : > { %v4246_v23 = vmax.f32 %v4632_v41, %v2010_v62  ;;  %v4251_v57 = vmax.f32 %v4635_v47, %v2039_v4  ;;  %v1105_v41 = vmax.f32 %v968_v20, %v4639_v10  ;;  %v1241_v62 = vmax.f32 %v1104_v60, %v4640_v26  ;;  %v4641_v4 = vld [vmem:[#allocation49_spill] sm:$0xff]  ;;  %v4649_v60 = vld [vmem:[#allocation59_spill] sm:$0xff] }
 0x6d0   : > { %v4647_v26 = vld [vmem:[#allocation65_spill] sm:$0xff] }
 0x6d1   : > { %v1242_v15 = vmax.f32 %v1105_v41, %v4641_v4  ;;  %v1378_v45 = vmax.f32 %v1241_v62, %v4644_v1  ;;  %v4646_v41 = vld [vmem:[#allocation64_spill] sm:$0xff]  ;;  %v2391_v1 = vmax.f32 %v4211_v49, 0.0  ;;  %v2393_v62 = vmax.f32 %v2382_v16, 0.0 }
 0x6d2   : > { %v2366_v3 = vpop.f32.mrf.mxu0  ;;  %v2385_v38 = vpop.f32.mrf.mxu1  ;;  %v4651_v49 = vmax.f32 %v4021_v34, %v3971_v18  ;;  %v4654_v18 = vld [vmem:[#allocation73_spill] sm:$0xff] }
 0x6d3   : > { %v1379_v20 = vmax.f32 %v1242_v15, %v4645_v44  ;;  %v2394_v10 = vmax.f32 %v2366_v3, 0.0  ;;  %v2395_v50 = vmax.f32 %v2385_v38, 0.0  ;;  %v1515_v0 = vmax.f32 %v1378_v45, %v4646_v41 }
 0x6d5   : > { %v1516_v4 = vmax.f32 %v1379_v20, %v4647_v26  ;;  %v2399_v20 = vpack.c.bf16 %v2393_v62, %v2391_v1 }
 0x6d6   : > { %v2012_v47 = vpop.f32.mrf.mxu2  ;;  %v2041_v27 = vpop.f32.mrf.mxu3 }
 0x6d7   : > { %v4265_v24 = vmax.f32 %v1922_v56, %v2012_v47  ;;  %v4267_v36 = vmax.f32 %v1923_v63, %v2041_v27  ;;  %v2392_v56 = vmax.f32 %v2363_v28, 0.0  ;;  %v4648_v27 = vld [vmem:[#allocation58_spill] sm:$0xff]  ;;  %v1653_v32 = vmax.f32 %v1516_v4, %v4649_v60 }
 0x6d8   : > { %v1652_v44 = vmax.f32 %v1515_v0, %v4648_v27 }
 0x6d9   : > { %v2398_v41 = vpack.c.bf16 %v2392_v56, %v2390_v11 }
 0x6da   : > { %v2368_v8 = vpop.f32.mrf.mxu0  ;;  %v2387_v63 = vpop.f32.mrf.mxu1 }
 0x6db   : > { %v2396_v3 = vmax.f32 %v2368_v8, 0.0  ;;  %v2397_v38 = vmax.f32 %v2387_v63, 0.0 }
 0x6dd   : > { %v2400_v15 = vpack.c.bf16 %v2396_v3, %v2394_v10  ;;  %v2401_v47 = vpack.c.bf16 %v2397_v38, %v2395_v50  ;;  %v1789_v50 = vmax.f32 %v1652_v44, %v4027_v37  ;;  %v4652_v10 = vld [vmem:[#allocation78_spill] sm:$0xff] }
 0x6de   : > { %v2015_v17 = vpop.f32.mrf.mxu2  ;;  %v2044_v45 = vpop.f32.mrf.mxu3  ;;  %v1790_v60 = vmax.f32 %v1653_v32, %v4652_v10 }
 0x6df   : > { %v4284_v28 = vmax.f32 %v4650_v21, %v2015_v17  ;;  %v4289_v16 = vmax.f32 %v4651_v49, %v2044_v45  ;;  %2408 = vmatpush.bf16.msrb.mxu0 %v2400_v15  ;;  %2437 = vmatpush.bf16.msrb.mxu1 %v2401_v47  ;;  %v1926_v17 = vmax.f32 %v1789_v50, %v4653_v2  ;;  %v2476_v15 = vld [vmem:[%s4447_s3] sm:$0xff]  ;;  %v2971_v47 = vmov 0  }
 0x6e0   : > { %v1927_v34 = vmax.f32 %v1790_v60, %v4654_v18  ;;  %2934 = vset.pattern.permute.xlu0 %v2971_v47  ;;  %2935 = vset.pattern.permute.xlu1 %v2971_v47  ;;  %v2477_v60 = vld [vmem:[%s4447_s3 + $0x8] sm:$0xff] }
 0x6e1   : > { %v2198_v0 = vmax.f32 %v4284_v28, %v4155_v12  ;;  %v2199_v35 = vmax.f32 %v4289_v16, %v4157_v25  ;;  %2486 = vperm.xlu0 %2934, %v2476_v15   ;;  %2936 = vset.pattern.permute.xlu2 %v2971_v47 }
 0x6e3   : > { %2409 = vmatpush.bf16.msrb.mxu0 %v2398_v41  ;;  %2438 = vmatpush.bf16.msrb.mxu1 %v2399_v20 }
 0x6e6   : > { %v2017_v26 = vpop.f32.mrf.mxu2  ;;  %v2046_v4 = vpop.f32.mrf.mxu3  ;;  %2891 = vmatmul.msk.bf16.vlgmr.msrb.gmra.mxu0 %vm350_vm2, %v3693_v55  ;;  %2895 = vmatmul.msk.bf16.vlgmr.msrb.gmra.mxu1 %vm350_vm2, %v3693_v55  ;;  %v2943_v55 = vld [vmem:[%s4446_s2 + $0x8] sm:$0xff] }
 0x6e7   : > { %v4303_v37 = vmax.f32 %v1926_v17, %v2017_v26  ;;  %v4305_v32 = vmax.f32 %v1927_v34, %v2046_v4  ;;  %v2478_v26 = vld [vmem:[%s4447_s3 + $0x10] sm:$0xff]  ;;  %v2945_v4 = vld [vmem:[%s4446_s2 + $0x18] sm:$0xff] }
 0x6e8   : > { %2496 = vperm.xlu1 %2935, %v2478_v26  }
 0x6e9   : > { %v2200_v11 = vmax.f32 %v4303_v37, %v4181_v59  ;;  %v2201_v56 = vmax.f32 %v4305_v32, %v4183_v7  ;;  %2491 = vperm.xlu0 %2934, %v2477_v60  }
 0x6ee   : > { %v2224_v8 = vpop.f32.mrf.mxu2  ;;  %v2243_v63 = vpop.f32.mrf.mxu3 }
 0x6ef   : > { %v2253_v2 = vmax.f32 %v2224_v8, 0.0  ;;  %v2254_v17 = vmax.f32 %v2243_v63, 0.0  ;;  %v2479_v8 = vld [vmem:[%s4447_s3 + $0x18] sm:$0xff]  ;;  %v2482_v63 = vld [vmem:[%s4447_s3 + $0x30] sm:$0xff] }
 0x6f0   : > { %2501 = vperm.xlu1 %2935, %v2479_v8  }
 0x6f1   : > { %2516 = vperm.xlu0 %2934, %v2482_v63  }
 0x6f6   : > { %v2226_v1 = vpop.f32.mrf.mxu2  ;;  %v2245_v62 = vpop.f32.mrf.mxu3  ;;  %2892 = vmatmul.msk.bf16.gmra.mxu0 %vm350_vm2, %v3703_v48  ;;  %2896 = vmatmul.msk.bf16.gmra.mxu1 %vm350_vm2, %v2943_v55 }
 0x6f7   : > { %v2255_v49 = vmax.f32 %v2226_v1, 0.0  ;;  %v2256_v20 = vmax.f32 %v2245_v62, 0.0  ;;  %v2480_v1 = vld [vmem:[%s4447_s3 + $0x20] sm:$0xff]  ;;  %v2483_v62 = vld [vmem:[%s4447_s3 + $0x38] sm:$0xff] }
 0x6f8   : > { %2506 = vperm.xlu2 %2936, %v2480_v1   ;;  %2521 = vperm.xlu1 %2935, %v2483_v62  }
 0x6f9   : > { %v2261_v18 = vpack.c.bf16 %v2255_v49, %v2253_v2  ;;  %v2262_v34 = vpack.c.bf16 %v2256_v20, %v2254_v17 }
 0x6fe   : > { %v2229_v3 = vpop.f32.mrf.mxu2  ;;  %v2248_v38 = vpop.f32.mrf.mxu3 }
 0x6ff   : > { %v2257_v48 = vmax.f32 %v2229_v3, 0.0  ;;  %v2258_v45 = vmax.f32 %v2248_v38, 0.0  ;;  %v2481_v3 = vld [vmem:[%s4447_s3 + $0x28] sm:$0xff] }
 0x700   : > { %2511 = vperm.xlu2 %2936, %v2481_v3  }
 0x706   : > { %v2231_v27 = vpop.f32.mrf.mxu2  ;;  %v2250_v44 = vpop.f32.mrf.mxu3  ;;  %2893 = vmatmul.msk.bf16.gmra.mxu0 %vm350_vm2, %v3718_v30  ;;  %2897 = vmatmul.msk.bf16.gmra.mxu1 %vm350_vm2, %v3718_v30  ;;  %v2944_v30 = vld [vmem:[%s4446_s2] sm:$0xff] }
 0x707   : > { %v2259_v41 = vmax.f32 %v2231_v27, 0.0  ;;  %v2260_v21 = vmax.f32 %v2250_v44, 0.0 }
 0x709   : > { %v2263_v50 = vpack.c.bf16 %v2259_v41, %v2257_v48  ;;  %v2264_v10 = vpack.c.bf16 %v2260_v21, %v2258_v45  ;;  %v4655_v21 = vmax.f32 %v4147_v19, %v4087_v39  ;;  %v4656_v19 = vmax.f32 %v4169_v54, %v4089_v43 }
 0x70a   : > { %v4658_v43 = vmax.f32 %v4196_v14, %v4093_v46  ;;  %v4660_v46 = vmax.f32 %v4223_v5, %v4103_v33 }
 0x70b   : > { %2271 = vmatpush.bf16.msrb.mxu2 %v2263_v50  ;;  %2300 = vmatpush.bf16.msrb.mxu3 %v2264_v10 }
 0x70f   : > { %2272 = vmatpush.bf16.msrb.mxu2 %v2261_v18  ;;  %2301 = vmatpush.bf16.msrb.mxu3 %v2262_v34  ;;  %v4657_v34 = vmax.f32 %v4171_v51, %v4091_v9  ;;  %v4659_v9 = vmax.f32 %v4201_v53, %v4095_v6  ;;  %v4661_v6 = vmax.f32 %v4225_v31, %v4105_v52 }
 0x710   : > { %v4662_v52 = vmax.f32 %v4246_v23, %v4111_v13  ;;  %v4663_v31 = vmax.f32 %v4251_v57, %v4113_v22  ;;  %v4664_v13 = vmax.f32 %v4265_v24, %v4127_v42  ;;  %v4665_v22 = vmax.f32 %v4267_v36, %v4129_v61 }
 0x712   : > { %2878 = vmatmul.msk.bf16.vlgmr.msrb.gmra.mxu2 %vm350_vm2, %v2944_v30  ;;  %2882 = vmatmul.msk.bf16.vlgmr.msrb.gmra.mxu3 %vm350_vm2, %v2944_v30 }
 0x716   : > { %2894 = vmatmul.msk.bf16.gmra.mxu0 %vm350_vm2, %v2945_v4  ;;  %2898 = vmatmul.msk.bf16.gmra.mxu1 %vm350_vm2, %v2945_v4 }
 0x722   : > { %2879 = vmatmul.msk.bf16.gmra.mxu2 %vm350_vm2, %v2943_v55  ;;  %2883 = vmatmul.msk.bf16.gmra.mxu3 %vm350_vm2, %v2943_v55  ;;  %v2946_v55 = vld [vmem:[%s4446_s2 + $0x10] sm:$0xff] }
 0x732   : > { %2880 = vmatmul.msk.bf16.gmra.mxu2 %vm350_vm2, %v2946_v55  ;;  %2884 = vmatmul.msk.bf16.gmra.mxu3 %vm350_vm2, %v2946_v55 }
 0x742   : > { %2881 = vmatmul.msk.bf16.gmra.mxu2 %vm350_vm2, %v2945_v4  ;;  %2885 = vmatmul.msk.bf16.gmra.mxu3 %vm350_vm2, %v2945_v4 }
 0x753   : > { %v2487_v44 = vpop.permute.xlu0 %2486 }
 0x75a   : > { %v2497_v55 = vpop.permute.xlu1 %2496 }
 0x75b   : > { %v2492_v26 = vpop.permute.xlu0 %2491 }
 0x763   : > { %v2411_v38 = vpop.f32.mrf.mxu0  ;;  %v2440_v15 = vpop.f32.mrf.mxu1 }
 0x76b   : > { %v2413_v47 = vpop.f32.mrf.mxu0  ;;  %v2442_v27 = vpop.f32.mrf.mxu1 }
 0x773   : > { %v2416_v40 = vpop.f32.mrf.mxu0  ;;  %v2445_v58 = vpop.f32.mrf.mxu1 }
 0x795   : > { %v2274_v48 = vpop.f32.mrf.mxu2  ;;  %v2303_v45 = vpop.f32.mrf.mxu3 }
 0x796   : > { %v2323_v41 = vmax.f32 %v2186_v29, %v2274_v48  ;;  %v2324_v49 = vmax.f32 %v4655_v21, %v2303_v45 }
 0x798   : > { %v2460_v20 = vmax.f32 %v2323_v41, %v2411_v38  ;;  %v2461_v50 = vmax.f32 %v2324_v49, %v2440_v15 }
 0x79a   : > { %v2524_v10 = vadd.f32 %v2487_v44, %v2460_v20  ;;  %v2525_v60 = vadd.f32 %v2487_v44, %v2461_v50 }
 0x79c   : > { %v2540_v2 = vmax.f32 %v2524_v10, 0.0  ;;  %v2541_v17 = vmax.f32 %v2525_v60, 0.0  ;;  %v2502_v10 = vpop.permute.xlu1 %2501 }
 0x79d   : > { %v2276_v29 = vpop.f32.mrf.mxu2  ;;  %v2305_v39 = vpop.f32.mrf.mxu3 }
 0x79e   : > { %2556 = vst [vmem:[%s4375_s5] sm:$0xff] %v2540_v2  ;;  %v2325_v18 = vmax.f32 %v4656_v19, %v2276_v29  ;;  %v2326_v30 = vmax.f32 %v4657_v34, %v2305_v39 }
 0x79f   : > { %2557 = vst [vmem:[%s4375_s5 + $0x8] sm:$0xff] %v2541_v17 }
 0x7a0   : > { %v2462_v4 = vmax.f32 %v2325_v18, %v2413_v47  ;;  %v2463_v8 = vmax.f32 %v2326_v30, %v2442_v27  ;;  %v2418_v47 = vpop.f32.mrf.mxu0  ;;  %v2447_v27 = vpop.f32.mrf.mxu1 }
 0x7a1   : > { %v2507_v18 = vpop.permute.xlu2 %2506 }
 0x7a2   : > { %v2526_v63 = vadd.f32 %v2492_v26, %v2462_v4  ;;  %v2527_v1 = vadd.f32 %v2492_v26, %v2463_v8 }
 0x7a4   : > { %v2542_v62 = vmax.f32 %v2526_v63, 0.0  ;;  %v2543_v3 = vmax.f32 %v2527_v1, 0.0 }
 0x7a5   : > { %v2279_v38 = vpop.f32.mrf.mxu2  ;;  %v2308_v15 = vpop.f32.mrf.mxu3 }
 0x7a6   : > { %2558 = vst [vmem:[%s4375_s5 + $0x10] sm:$0xff] %v2542_v62  ;;  %v2327_v54 = vmax.f32 %v4658_v43, %v2279_v38  ;;  %v2328_v51 = vmax.f32 %v4659_v9, %v2308_v15 }
 0x7a7   : > { %2559 = vst [vmem:[%s4375_s5 + $0x18] sm:$0xff] %v2543_v3 }
 0x7a8   : > { %v2464_v44 = vmax.f32 %v2327_v54, %v2416_v40  ;;  %v2465_v48 = vmax.f32 %v2328_v51, %v2445_v58  ;;  %v2421_v17 = vpop.f32.mrf.mxu0  ;;  %v2450_v40 = vpop.f32.mrf.mxu1 }
 0x7a9   : > { %v2512_v43 = vpop.permute.xlu2 %2511 }
 0x7aa   : > { %v2528_v45 = vadd.f32 %v2497_v55, %v2464_v44  ;;  %v2529_v41 = vadd.f32 %v2497_v55, %v2465_v48 }
 0x7ac   : > { %v2544_v21 = vmax.f32 %v2528_v45, 0.0  ;;  %v2545_v49 = vmax.f32 %v2529_v41, 0.0 }
 0x7ad   : > { %v2281_v20 = vpop.f32.mrf.mxu2  ;;  %v2310_v50 = vpop.f32.mrf.mxu3 }
 0x7ae   : > { %2560 = vst [vmem:[%s4375_s5 + $0x20] sm:$0xff] %v2544_v21  ;;  %v2329_v14 = vmax.f32 %v4660_v46, %v2281_v20  ;;  %v2330_v53 = vmax.f32 %v4661_v6, %v2310_v50 }
 0x7af   : > { %2561 = vst [vmem:[%s4375_s5 + $0x28] sm:$0xff] %v2545_v49  ;;  %v2517_v49 = vpop.permute.xlu0 %2516 }
 0x7b0   : > { %v2466_v60 = vmax.f32 %v2329_v14, %v2418_v47  ;;  %v2467_v2 = vmax.f32 %v2330_v53, %v2447_v27  ;;  %v2423_v1 = vpop.f32.mrf.mxu0  ;;  %v2452_v62 = vpop.f32.mrf.mxu1 }
 0x7b2   : > { %v2530_v58 = vadd.f32 %v2502_v10, %v2466_v60  ;;  %v2531_v29 = vadd.f32 %v2502_v10, %v2467_v2  ;;  %v2522_v10 = vpop.permute.xlu1 %2521 }
 0x7b4   : > { %v2546_v39 = vmax.f32 %v2530_v58, 0.0  ;;  %v2547_v19 = vmax.f32 %v2531_v29, 0.0 }
 0x7b5   : > { %v2284_v34 = vpop.f32.mrf.mxu2  ;;  %v2313_v33 = vpop.f32.mrf.mxu3 }
 0x7b6   : > { %2562 = vst [vmem:[%s4375_s5 + $0x30] sm:$0xff] %v2546_v39  ;;  %v2331_v5 = vmax.f32 %v4662_v52, %v2284_v34  ;;  %v2332_v30 = vmax.f32 %v4663_v31, %v2313_v33 }
 0x7b7   : > { %2563 = vst [vmem:[%s4375_s5 + $0x38] sm:$0xff] %v2547_v19 }
 0x7b8   : > { %v2468_v26 = vmax.f32 %v2331_v5, %v2421_v17  ;;  %v2469_v4 = vmax.f32 %v2332_v30, %v2450_v40  ;;  %v2426_v48 = vpop.f32.mrf.mxu0  ;;  %v2455_v45 = vpop.f32.mrf.mxu1 }
 0x7ba   : > { %v2532_v8 = vadd.f32 %v2507_v18, %v2468_v26  ;;  %v2533_v63 = vadd.f32 %v2507_v18, %v2469_v4 }
 0x7bc   : > { %v2548_v3 = vmax.f32 %v2532_v8, 0.0  ;;  %v2549_v55 = vmax.f32 %v2533_v63, 0.0 }
 0x7bd   : > { %v2286_v38 = vpop.f32.mrf.mxu2  ;;  %v2315_v15 = vpop.f32.mrf.mxu3 }
 0x7be   : > { %2564 = vst [vmem:[%s4375_s5 + $0x40] sm:$0xff] %v2548_v3  ;;  %v2333_v23 = vmax.f32 %v4664_v13, %v2286_v38  ;;  %v2334_v57 = vmax.f32 %v4665_v22, %v2315_v15 }
 0x7bf   : > { %2565 = vst [vmem:[%s4375_s5 + $0x48] sm:$0xff] %v2549_v55 }
 0x7c0   : > { %v2470_v54 = vmax.f32 %v2333_v23, %v2423_v1  ;;  %v2471_v9 = vmax.f32 %v2334_v57, %v2452_v62  ;;  %v2428_v28 = vpop.f32.mrf.mxu0  ;;  %v2457_v16 = vpop.f32.mrf.mxu1 }
 0x7c2   : > { %v2534_v51 = vadd.f32 %v2512_v43, %v2470_v54  ;;  %v2535_v47 = vadd.f32 %v2512_v43, %v2471_v9 }
 0x7c4   : > { %v2550_v27 = vmax.f32 %v2534_v51, 0.0  ;;  %v2551_v44 = vmax.f32 %v2535_v47, 0.0 }
 0x7c5   : > { %v2289_v41 = vpop.f32.mrf.mxu2  ;;  %v2318_v21 = vpop.f32.mrf.mxu3 }
 0x7c6   : > { %2566 = vst [vmem:[%s4375_s5 + $0x50] sm:$0xff] %v2550_v27  ;;  %v2335_v42 = vmax.f32 %v2198_v0, %v2289_v41  ;;  %v2336_v61 = vmax.f32 %v2199_v35, %v2318_v21 }
 0x7c7   : > { %2567 = vst [vmem:[%s4375_s5 + $0x58] sm:$0xff] %v2551_v44 }
 0x7c8   : > { %v2472_v36 = vmax.f32 %v2335_v42, %v2426_v48  ;;  %v2473_v24 = vmax.f32 %v2336_v61, %v2455_v45 }
 0x7ca   : > { %v2536_v20 = vadd.f32 %v2517_v49, %v2472_v36  ;;  %v2537_v50 = vadd.f32 %v2517_v49, %v2473_v24 }
 0x7cc   : > { %v2552_v46 = vmax.f32 %v2536_v20, 0.0  ;;  %v2553_v14 = vmax.f32 %v2537_v50, 0.0 }
 0x7cd   : > { %v2291_v6 = vpop.f32.mrf.mxu2  ;;  %v2320_v53 = vpop.f32.mrf.mxu3 }
 0x7ce   : > { %2568 = vst [vmem:[%s4375_s5 + $0x60] sm:$0xff] %v2552_v46  ;;  %v2337_v12 = vmax.f32 %v2200_v11, %v2291_v6  ;;  %v2338_v25 = vmax.f32 %v2201_v56, %v2320_v53 }
 0x7cf   : > { %2569 = vst [vmem:[%s4375_s5 + $0x68] sm:$0xff] %v2553_v14 }
 0x7d0   : > { %v2474_v0 = vmax.f32 %v2337_v12, %v2428_v28  ;;  %v2475_v35 = vmax.f32 %v2338_v25, %v2457_v16 }
 0x7d2   : > { %v2538_v60 = vadd.f32 %v2522_v10, %v2474_v0  ;;  %v2539_v2 = vadd.f32 %v2522_v10, %v2475_v35 }
 0x7d4   : > { %v2554_v17 = vmax.f32 %v2538_v60, 0.0  ;;  %v2555_v40 = vmax.f32 %v2539_v2, 0.0 }
 0x7d6   : > { %2570 = vst [vmem:[%s4375_s5 + $0x70] sm:$0xff] %v2554_v17 }
 0x7d7   : > { %2571 = vst [vmem:[%s4375_s5 + $0x78] sm:$0xff] %v2555_v40 }
 0x7d8 PF: > { %s14_s17 = sadd.s32 1, %s2969_s17   ;;  %s4666_s15 = smov %s2965_s16 }
 0x7d9   : > { %p11_p5 = scmp.ge.s32.totalorder %s14_s17, 4   ;;  %s4667_s16 = smov %s4669_s18 }
 0x7db   :  { %13 = sbr.rel (!%p11_p5) target bundleno = 2 (0x2), region = 81 }

</bundles_post_ra>
